<compile_context>
chip_gen: v7x
topology: tpu7x:2x2x1
jax: 0.10.0
libtpu: 0.0.40
codegen_flags: <defaults>
</compile_context>

<pallas_src>
import functools

import jax
import jax.numpy as jnp
from jax.experimental import pallas as pl
from jax.experimental.pallas import tpu as pltpu


def _bottleneck_kernel(x_ref, w1_ref, b1_ref, w2_ref, b2_ref, out_ref, xp_ref,
                       *, B, H, W, Cin, Cw):
    f32 = jnp.float32

    # (Re)zero only the 1-pixel halo border of the padded scratch; the interior
    # is fully overwritten below. Doing it every step (instead of once under
    # program_id==0) keeps it correct when the "parallel" batch axis is split
    # across TensorCores.
    xp_ref[:, 0:1, :, :] = jnp.zeros((B, 1, W + 2, Cw), f32)
    xp_ref[:, H + 1:H + 2, :, :] = jnp.zeros((B, 1, W + 2, Cw), f32)
    xp_ref[:, :, 0:1, :] = jnp.zeros((B, H + 2, 1, Cw), f32)
    xp_ref[:, :, W + 1:W + 2, :] = jnp.zeros((B, H + 2, 1, Cw), f32)

    def conv3x3(v, w_ref):
        """v: (B, H, W, C) f32 -> (B*H*W, Cw) f32.

        Split-K: 3 accumulated bf16 MXU matmuls, one per kernel row dy, each
        with K = 3*C built by lane-concatenating the three dx taps. dy shifts
        are along the leading H axis (free); dx shifts are sublane reads from
        the padded scratch.
        """
        C = v.shape[-1]
        xp_ref[:, 1:H + 1, 1:W + 1, :] = v          # single interior store
        acc = jnp.zeros((B * H * W, Cw), f32)
        for dy in range(3):
            taps = [
                xp_ref[:, dy:dy + H, dx:dx + W, :].astype(jnp.bfloat16)
                for dx in range(3)
            ]
            col = jnp.concatenate(taps, axis=-1)     # (B, H, W, 3*C) bf16
            col = col.reshape(B * H * W, 3 * C)      # leading-dim merge only
            acc = acc + jnp.dot(col, w_ref[dy],
                                preferred_element_type=f32)
        return acc

    # Per-grid-step tile: B_t images, full spatial extent, all channels.
    x = x_ref[...].astype(f32)                       # (B, H, W, Cin)

    # conv1 + bn1 (scale pre-folded into w1) + relu -- stays on-core.
    h = conv3x3(x, w1_ref)                           # (B*H*W, Cw) f32
    h = jnp.maximum(h + b1_ref[...], 0.0)

    # conv2 + bn2 (folded) + identity residual + relu.
    o = conv3x3(h.reshape(B, H, W, Cw), w2_ref)      # (B*H*W, Cw) f32
    o = o + b2_ref[...]
    o = o + x.reshape(B * H * W, Cin)                # identity (Cin == Cw)
    o = jnp.maximum(o, 0.0)

    out_ref[...] = o.reshape(B, H, W, Cw).astype(out_ref.dtype)
    # TODO(synk): for narrow channel counts (C < 128) this store is lane-masked;
    # a lane-dense (B, H, W*C) output layout needs a (H*W, C)->(H, W*C) relayout
    # inside the kernel that is riskier to lower. Real ResNet channel counts
    # (>=128) are lane-dense as-is.


def _fold_bn(bn_params, eps=1e-5):
    gamma, beta, mean, var = bn_params
    scale = gamma / jnp.sqrt(var + eps)
    return scale, beta - mean * scale


def _vmem_limit_bytes():
    """~75% of physical VMEM: 48 MiB on v7x (64 MiB), 96 MiB on v5e/v6e (128 MiB)."""
    cap = 64 * 1024 * 1024
    try:
        cap = int(pltpu.get_tpu_info().vmem_capacity_bytes)
    except Exception:
        pass
    return min(int(cap * 0.75), 100 * 1024 * 1024)


def _pick_images_per_step(N, H, W, C, vmem_limit):
    """Pack several images per grid step for small-spatial stages.

    Raises the matmul M-dim to a healthy multiple of 8 sublanes and amortizes
    the ~0.35us per-grid-step overhead, while keeping the per-step VMEM
    footprint (double-buffered I/O tiles + padded scratch + per-dy col chunk +
    f32 accumulator) inside the scoped limit.
    """
    f32, bf16 = 4, 2
    per_img = (
        2 * 2 * H * W * C * f32            # in + out blocks, double-buffered
        + (H + 2) * (W + 2) * C * f32      # padded scratch
        + H * W * 3 * C * bf16             # one per-dy im2col chunk
        + 3 * H * W * C * f32              # accumulator + live intermediates
    )
    budget = max(1, int(0.6 * vmem_limit))
    max_bt = max(1, budget // per_img)
    bt = 1
    for cand in range(1, N + 1):
        if N % cand or cand > max_bt:
            continue
        bt = cand
        if cand * H * W >= 1024:
            break
    return bt


def bottleneck_origin_forward(x_nchw, params, stride=1):
    """Matches BottleneckOrigin.forward (stride=1, downsample=None, groups=1, eval BN)."""
    if stride != 1:
        # TODO(synk): stride>1 requires the PyTorch `downsample` branch for the
        # residual; the reference forward (downsample=None) never exercises it.
        raise NotImplementedError("stride != 1 requires a downsample branch")

    N, Cin, H, W = x_nchw.shape
    w1, w2 = params["w1"], params["w2"]
    Cw = w1.shape[-1]
    assert w1.shape == (3, 3, Cin, Cw) and w2.shape == (3, 3, Cw, Cw)
    assert Cin == Cw, "identity residual requires inplanes == width"

    # Fold BN: scale into the conv weights (bf16 MXU operands), bias kept as a
    # (1, C) f32 add in the epilogue. Weight layout (dy, dx*Cin, Cout) matches
    # the per-dy lane-concat of dx taps in the kernel.
    s1, b1 = _fold_bn(params["bn1"])
    s2, b2 = _fold_bn(params["bn2"])
    w1f = (w1 * s1[None, None, None, :]).reshape(3, 3 * Cin, Cw).astype(jnp.bfloat16)
    w2f = (w2 * s2[None, None, None, :]).reshape(3, 3 * Cw, Cw).astype(jnp.bfloat16)
    b1 = b1.reshape(1, Cw).astype(jnp.float32)
    b2 = b2.reshape(1, Cw).astype(jnp.float32)

    # TODO(synk): when chaining several fused blocks, keep activations NHWC
    # end-to-end instead of transposing the full tensor in HBM around every call.
    x_nhwc = jnp.transpose(x_nchw, (0, 2, 3, 1))           # NCHW -> NHWC

    vmem_limit = _vmem_limit_bytes()
    B_t = _pick_images_per_step(N, H, W, max(Cin, Cw), vmem_limit)
    grid = (N // B_t,)

    kernel = functools.partial(_bottleneck_kernel, B=B_t, H=H, W=W, Cin=Cin, Cw=Cw)

    flops = 2 * N * H * W * 9 * (Cin * Cw + Cw * Cw)
    bytes_accessed = (4 * (x_nhwc.size + N * H * W * Cw + b1.size + b2.size)
                      + 2 * (w1f.size + w2f.size))

    out = pl.pallas_call(
        kernel,
        out_shape=jax.ShapeDtypeStruct((N, H, W, Cw), x_nchw.dtype),
        grid_spec=pltpu.PrefetchScalarGridSpec(
            num_scalar_prefetch=0,
            grid=grid,                                     # tile over batch groups
            in_specs=[
                pl.BlockSpec((B_t, H, W, Cin), lambda n: (n, 0, 0, 0)),
                pl.BlockSpec((3, 3 * Cin, Cw), lambda n: (0, 0, 0)),
                pl.BlockSpec((1, Cw), lambda n: (0, 0)),
                pl.BlockSpec((3, 3 * Cw, Cw), lambda n: (0, 0, 0)),
                pl.BlockSpec((1, Cw), lambda n: (0, 0)),
            ],
            out_specs=pl.BlockSpec((B_t, H, W, Cw), lambda n: (n, 0, 0, 0)),
            # Persistent padded-halo scratch reused by both convs in a step.
            scratch_shapes=[pltpu.VMEM((B_t, H + 2, W + 2, Cw), jnp.float32)],
        ),
        compiler_params=pltpu.CompilerParams(
            # batch-group tiles are independent -> shard across TensorCores
            dimension_semantics=("parallel",),
            vmem_limit_bytes=vmem_limit,
        ),
        cost_estimate=pl.CostEstimate(
            flops=flops, transcendentals=0, bytes_accessed=bytes_accessed),
    )(x_nhwc, w1f, b1, w2f, b2)

    return jnp.transpose(out, (0, 3, 1, 2))                # NHWC -> NCHW


def reference_forward(x_nchw, params):
    """Pure-JAX f32 reference (lax.conv) for correctness check."""
    x = jnp.transpose(x_nchw, (0, 2, 3, 1))

    def conv(h, w):
        return jax.lax.conv_general_dilated(
            h, w, (1, 1), "SAME", dimension_numbers=("NHWC", "HWIO", "NHWC"))

    s1, b1 = _fold_bn(params["bn1"])
    s2, b2 = _fold_bn(params["bn2"])
    out = jnp.maximum(conv(x, params["w1"]) * s1 + b1, 0.0)
    out = conv(out, params["w2"]) * s2 + b2
    out = jnp.maximum(out + x, 0.0)
    return jnp.transpose(out, (0, 3, 1, 2))


if __name__ == "__main__":
    # Small shapes: batch=2, inplanes=planes=width=8 (base_width=64, groups=1),
    # spatial 16x16, stride=1, downsample=None.
    N, C, H, W = 2, 8, 16, 16
    inplanes = planes = width = C

    key = jax.random.PRNGKey(0)
    k = jax.random.split(key, 10)

    x = jax.random.normal(k[0], (N, C, H, W), jnp.float32)          # NCHW like PyTorch

    params = {
        # HWIO weights (3, 3, Cin, Cout)
        "w1": jax.random.normal(k[1], (3, 3, inplanes, width), jnp.float32) * 0.1,
        "w2": jax.random.normal(k[2], (3, 3, width, width), jnp.float32) * 0.1,
        # BN params: (gamma, beta, running_mean, running_var)
        "bn1": (
            1.0 + 0.1 * jax.random.normal(k[3], (width,), jnp.float32),
            0.1 * jax.random.normal(k[4], (width,), jnp.float32),
            0.1 * jax.random.normal(k[5], (width,), jnp.float32),
            jnp.abs(jax.random.normal(k[6], (width,), jnp.float32)) + 0.5,
        ),
        "bn2": (
            1.0 + 0.1 * jax.random.normal(k[7], (width,), jnp.float32),
            0.1 * jax.random.normal(k[8], (width,), jnp.float32),
            0.1 * jax.random.normal(k[9], (width,), jnp.float32),
            jnp.abs(jax.random.normal(k[6], (width,), jnp.float32)) + 0.5,
        ),
    }

    out = jax.block_until_ready(bottleneck_origin_forward(x, params, stride=1))
    ref = jax.block_until_ready(reference_forward(x, params))

    assert out.shape == (N, planes, H, W)
    # bf16 MXU operands (f32 accumulation) -> looser tolerance than the all-f32 path.
    err = float(jnp.max(jnp.abs(out - ref)))
    assert jnp.allclose(out, ref, atol=5e-2, rtol=5e-2), err

    print("KERNEL_OK")
</pallas_src>

<mosaic_0001>
module attributes {stable_mosaic.version = 11 : i64} {
  func.func @_bottleneck_kernel(%arg0: i32, %arg1: memref<2x16x16x8xf32, #tpu.memory_space<vmem>>, %arg2: memref<3x24x8xbf16, #tpu.memory_space<vmem>>, %arg3: memref<1x8xf32, #tpu.memory_space<vmem>>, %arg4: memref<3x24x8xbf16, #tpu.memory_space<vmem>>, %arg5: memref<1x8xf32, #tpu.memory_space<vmem>>, %arg6: memref<2x16x16x8xf32, #tpu.memory_space<vmem>>, %arg7: memref<2x18x18x8xf32, #tpu.memory_space<vmem>>) attributes {dimension_semantics = [#tpu.dimension_semantics<parallel>], iteration_bounds = array<i64: 1>, scalar_prefetch = 0 : i64, scratch_operands = 1 : i64, tpu.core_type = #tpu.core_type<tc>, window_params = [{transform_indices = @transform_0, window_bounds = array<i64: 2, 16, 16, 8>}, {pipeline_mode = #tpu.pipeline_mode<synchronous>, transform_indices = @transform_1, window_bounds = array<i64: 3, 24, 8>}, {pipeline_mode = #tpu.pipeline_mode<synchronous>, transform_indices = @transform_2, window_bounds = array<i64: 1, 8>}, {pipeline_mode = #tpu.pipeline_mode<synchronous>, transform_indices = @transform_3, window_bounds = array<i64: 3, 24, 8>}, {pipeline_mode = #tpu.pipeline_mode<synchronous>, transform_indices = @transform_4, window_bounds = array<i64: 1, 8>}, {transform_indices = @transform_5, window_bounds = array<i64: 2, 16, 16, 8>}]} {
    %cst = arith.constant 0.000000e+00 : f32
    %0 = vector.broadcast %cst : f32 to vector<2x1x18x8xf32>
    %c0 = arith.constant 0 : index
    %c0_0 = arith.constant 0 : index
    %c0_1 = arith.constant 0 : index
    %c0_2 = arith.constant 0 : index
    %1 = vector.load %arg7[%c0, %c0_0, %c0_1, %c0_2] : memref<2x18x18x8xf32, #tpu.memory_space<vmem>>, vector<2x1x18x8xf32>
    tpu.vector_store %arg7[%c0, %c0_0, %c0_1, %c0_2], %0 {strides = array<i32>} : memref<2x18x18x8xf32, #tpu.memory_space<vmem>>, vector<2x1x18x8xf32>,
    %cst_3 = arith.constant 0.000000e+00 : f32
    %2 = vector.broadcast %cst_3 : f32 to vector<2x1x18x8xf32>
    %c0_4 = arith.constant 0 : index
    %c17 = arith.constant 17 : index
    %c0_5 = arith.constant 0 : index
    %c0_6 = arith.constant 0 : index
    %3 = vector.load %arg7[%c0_4, %c17, %c0_5, %c0_6] : memref<2x18x18x8xf32, #tpu.memory_space<vmem>>, vector<2x1x18x8xf32>
    tpu.vector_store %arg7[%c0_4, %c17, %c0_5, %c0_6], %2 {strides = array<i32>} : memref<2x18x18x8xf32, #tpu.memory_space<vmem>>, vector<2x1x18x8xf32>,
    %cst_7 = arith.constant 0.000000e+00 : f32
    %4 = vector.broadcast %cst_7 : f32 to vector<2x18x1x8xf32>
    %c0_8 = arith.constant 0 : index
    %c0_9 = arith.constant 0 : index
    %c0_10 = arith.constant 0 : index
    %c0_11 = arith.constant 0 : index
    %5 = vector.load %arg7[%c0_8, %c0_9, %c0_10, %c0_11] : memref<2x18x18x8xf32, #tpu.memory_space<vmem>>, vector<2x18x1x8xf32>
    tpu.vector_store %arg7[%c0_8, %c0_9, %c0_10, %c0_11], %4 {strides = array<i32>} : memref<2x18x18x8xf32, #tpu.memory_space<vmem>>, vector<2x18x1x8xf32>,
    %cst_12 = arith.constant 0.000000e+00 : f32
    %6 = vector.broadcast %cst_12 : f32 to vector<2x18x1x8xf32>
    %c0_13 = arith.constant 0 : index
    %c0_14 = arith.constant 0 : index
    %c17_15 = arith.constant 17 : index
    %c0_16 = arith.constant 0 : index
    %7 = vector.load %arg7[%c0_13, %c0_14, %c17_15, %c0_16] : memref<2x18x18x8xf32, #tpu.memory_space<vmem>>, vector<2x18x1x8xf32>
    tpu.vector_store %arg7[%c0_13, %c0_14, %c17_15, %c0_16], %6 {strides = array<i32>} : memref<2x18x18x8xf32, #tpu.memory_space<vmem>>, vector<2x18x1x8xf32>,
    %c0_17 = arith.constant 0 : index
    %c0_18 = arith.constant 0 : index
    %c0_19 = arith.constant 0 : index
    %c0_20 = arith.constant 0 : index
    %8 = vector.load %arg1[%c0_17, %c0_18, %c0_19, %c0_20] : memref<2x16x16x8xf32, #tpu.memory_space<vmem>>, vector<2x16x16x8xf32>
    %c0_21 = arith.constant 0 : index
    %c1 = arith.constant 1 : index
    %c1_22 = arith.constant 1 : index
    %c0_23 = arith.constant 0 : index
    %9 = vector.load %arg7[%c0_21, %c1, %c1_22, %c0_23] : memref<2x18x18x8xf32, #tpu.memory_space<vmem>>, vector<2x16x16x8xf32>
    tpu.vector_store %arg7[%c0_21, %c1, %c1_22, %c0_23], %8 {strides = array<i32>} : memref<2x18x18x8xf32, #tpu.memory_space<vmem>>, vector<2x16x16x8xf32>,
    %cst_24 = arith.constant 0.000000e+00 : f32
    %10 = vector.broadcast %cst_24 : f32 to vector<512x8xf32>
    %c0_25 = arith.constant 0 : index
    %c0_26 = arith.constant 0 : index
    %c0_27 = arith.constant 0 : index
    %c0_28 = arith.constant 0 : index
    %11 = vector.load %arg7[%c0_25, %c0_26, %c0_27, %c0_28] : memref<2x18x18x8xf32, #tpu.memory_space<vmem>>, vector<2x16x16x8xf32>
    %12 = arith.truncf %11 : vector<2x16x16x8xf32> to vector<2x16x16x8xbf16>
    %c0_29 = arith.constant 0 : index
    %c0_30 = arith.constant 0 : index
    %c1_31 = arith.constant 1 : index
    %c0_32 = arith.constant 0 : index
    %13 = vector.load %arg7[%c0_29, %c0_30, %c1_31, %c0_32] : memref<2x18x18x8xf32, #tpu.memory_space<vmem>>, vector<2x16x16x8xf32>
    %14 = arith.truncf %13 : vector<2x16x16x8xf32> to vector<2x16x16x8xbf16>
    %c0_33 = arith.constant 0 : index
    %c0_34 = arith.constant 0 : index
    %c2 = arith.constant 2 : index
    %c0_35 = arith.constant 0 : index
    %15 = vector.load %arg7[%c0_33, %c0_34, %c2, %c0_35] : memref<2x18x18x8xf32, #tpu.memory_space<vmem>>, vector<2x16x16x8xf32>
    %16 = arith.truncf %15 : vector<2x16x16x8xf32> to vector<2x16x16x8xbf16>
    %17 = tpu.concatenate %12, %14, %16 in 3 : vector<2x16x16x8xbf16>, vector<2x16x16x8xbf16>, vector<2x16x16x8xbf16> -> vector<2x16x16x24xbf16>
    %18 = vector.shape_cast %17 : vector<2x16x16x24xbf16> to vector<512x24xbf16>
    %c0_36 = arith.constant 0 : index
    %c0_37 = arith.constant 0 : index
    %c0_38 = arith.constant 0 : index
    %19 = vector.load %arg2[%c0_36, %c0_37, %c0_38] : memref<3x24x8xbf16, #tpu.memory_space<vmem>>, vector<1x24x8xbf16>
    %20 = vector.shape_cast %19 : vector<1x24x8xbf16> to vector<24x8xbf16>
    %cst_39 = arith.constant dense<0.000000e+00> : vector<512x8xf32>
    %21 = tpu.matmul %18, %20, %cst_39 {dimension_numbers = #tpu.dot_dimension_numbers<[1], [0], [0], [1], [0, 0, 1, 1], [], []>} : vector<512x24xbf16>, vector<24x8xbf16>, vector<512x8xf32> -> vector<512x8xf32>
    %22 = arith.addf %10, %21 : vector<512x8xf32>
    %c0_40 = arith.constant 0 : index
    %c1_41 = arith.constant 1 : index
    %c0_42 = arith.constant 0 : index
    %c0_43 = arith.constant 0 : index
    %23 = vector.load %arg7[%c0_40, %c1_41, %c0_42, %c0_43] : memref<2x18x18x8xf32, #tpu.memory_space<vmem>>, vector<2x16x16x8xf32>
    %24 = arith.truncf %23 : vector<2x16x16x8xf32> to vector<2x16x16x8xbf16>
    %c0_44 = arith.constant 0 : index
    %c1_45 = arith.constant 1 : index
    %c1_46 = arith.constant 1 : index
    %c0_47 = arith.constant 0 : index
    %25 = vector.load %arg7[%c0_44, %c1_45, %c1_46, %c0_47] : memref<2x18x18x8xf32, #tpu.memory_space<vmem>>, vector<2x16x16x8xf32>
    %26 = arith.truncf %25 : vector<2x16x16x8xf32> to vector<2x16x16x8xbf16>
    %c0_48 = arith.constant 0 : index
    %c1_49 = arith.constant 1 : index
    %c2_50 = arith.constant 2 : index
    %c0_51 = arith.constant 0 : index
    %27 = vector.load %arg7[%c0_48, %c1_49, %c2_50, %c0_51] : memref<2x18x18x8xf32, #tpu.memory_space<vmem>>, vector<2x16x16x8xf32>
    %28 = arith.truncf %27 : vector<2x16x16x8xf32> to vector<2x16x16x8xbf16>
    %29 = tpu.concatenate %24, %26, %28 in 3 : vector<2x16x16x8xbf16>, vector<2x16x16x8xbf16>, vector<2x16x16x8xbf16> -> vector<2x16x16x24xbf16>
    %30 = vector.shape_cast %29 : vector<2x16x16x24xbf16> to vector<512x24xbf16>
    %c1_52 = arith.constant 1 : index
    %c0_53 = arith.constant 0 : index
    %c0_54 = arith.constant 0 : index
    %31 = vector.load %arg2[%c1_52, %c0_53, %c0_54] : memref<3x24x8xbf16, #tpu.memory_space<vmem>>, vector<1x24x8xbf16>
    %32 = vector.shape_cast %31 : vector<1x24x8xbf16> to vector<24x8xbf16>
    %cst_55 = arith.constant dense<0.000000e+00> : vector<512x8xf32>
    %33 = tpu.matmul %30, %32, %cst_55 {dimension_numbers = #tpu.dot_dimension_numbers<[1], [0], [0], [1], [0, 0, 1, 1], [], []>} : vector<512x24xbf16>, vector<24x8xbf16>, vector<512x8xf32> -> vector<512x8xf32>
    %34 = arith.addf %22, %33 : vector<512x8xf32>
    %c0_56 = arith.constant 0 : index
    %c2_57 = arith.constant 2 : index
    %c0_58 = arith.constant 0 : index
    %c0_59 = arith.constant 0 : index
    %35 = vector.load %arg7[%c0_56, %c2_57, %c0_58, %c0_59] : memref<2x18x18x8xf32, #tpu.memory_space<vmem>>, vector<2x16x16x8xf32>
    %36 = arith.truncf %35 : vector<2x16x16x8xf32> to vector<2x16x16x8xbf16>
    %c0_60 = arith.constant 0 : index
    %c2_61 = arith.constant 2 : index
    %c1_62 = arith.constant 1 : index
    %c0_63 = arith.constant 0 : index
    %37 = vector.load %arg7[%c0_60, %c2_61, %c1_62, %c0_63] : memref<2x18x18x8xf32, #tpu.memory_space<vmem>>, vector<2x16x16x8xf32>
    %38 = arith.truncf %37 : vector<2x16x16x8xf32> to vector<2x16x16x8xbf16>
    %c0_64 = arith.constant 0 : index
    %c2_65 = arith.constant 2 : index
    %c2_66 = arith.constant 2 : index
    %c0_67 = arith.constant 0 : index
    %39 = vector.load %arg7[%c0_64, %c2_65, %c2_66, %c0_67] : memref<2x18x18x8xf32, #tpu.memory_space<vmem>>, vector<2x16x16x8xf32>
    %40 = arith.truncf %39 : vector<2x16x16x8xf32> to vector<2x16x16x8xbf16>
    %41 = tpu.concatenate %36, %38, %40 in 3 : vector<2x16x16x8xbf16>, vector<2x16x16x8xbf16>, vector<2x16x16x8xbf16> -> vector<2x16x16x24xbf16>
    %42 = vector.shape_cast %41 : vector<2x16x16x24xbf16> to vector<512x24xbf16>
    %c2_68 = arith.constant 2 : index
    %c0_69 = arith.constant 0 : index
    %c0_70 = arith.constant 0 : index
    %43 = vector.load %arg2[%c2_68, %c0_69, %c0_70] : memref<3x24x8xbf16, #tpu.memory_space<vmem>>, vector<1x24x8xbf16>
    %44 = vector.shape_cast %43 : vector<1x24x8xbf16> to vector<24x8xbf16>
    %cst_71 = arith.constant dense<0.000000e+00> : vector<512x8xf32>
    %45 = tpu.matmul %42, %44, %cst_71 {dimension_numbers = #tpu.dot_dimension_numbers<[1], [0], [0], [1], [0, 0, 1, 1], [], []>} : vector<512x24xbf16>, vector<24x8xbf16>, vector<512x8xf32> -> vector<512x8xf32>
    %46 = arith.addf %34, %45 : vector<512x8xf32>
    %c0_72 = arith.constant 0 : index
    %c0_73 = arith.constant 0 : index
    %47 = vector.load %arg3[%c0_72, %c0_73] : memref<1x8xf32, #tpu.memory_space<vmem>>, vector<1x8xf32>
    %48 = vector.broadcast %47 : vector<1x8xf32> to vector<512x8xf32>
    %49 = arith.addf %46, %48 : vector<512x8xf32>
    %cst_74 = arith.constant 0.000000e+00 : f32
    %50 = vector.broadcast %cst_74 : f32 to vector<512x8xf32>
    %51 = arith.maximumf %49, %50 : vector<512x8xf32>
    %52 = vector.shape_cast %51 : vector<512x8xf32> to vector<2x16x16x8xf32>
    %c0_75 = arith.constant 0 : index
    %c1_76 = arith.constant 1 : index
    %c1_77 = arith.constant 1 : index
    %c0_78 = arith.constant 0 : index
    %53 = vector.load %arg7[%c0_75, %c1_76, %c1_77, %c0_78] : memref<2x18x18x8xf32, #tpu.memory_space<vmem>>, vector<2x16x16x8xf32>
    tpu.vector_store %arg7[%c0_75, %c1_76, %c1_77, %c0_78], %52 {strides = array<i32>} : memref<2x18x18x8xf32, #tpu.memory_space<vmem>>, vector<2x16x16x8xf32>,
    %cst_79 = arith.constant 0.000000e+00 : f32
    %54 = vector.broadcast %cst_79 : f32 to vector<512x8xf32>
    %c0_80 = arith.constant 0 : index
    %c0_81 = arith.constant 0 : index
    %c0_82 = arith.constant 0 : index
    %c0_83 = arith.constant 0 : index
    %55 = vector.load %arg7[%c0_80, %c0_81, %c0_82, %c0_83] : memref<2x18x18x8xf32, #tpu.memory_space<vmem>>, vector<2x16x16x8xf32>
    %56 = arith.truncf %55 : vector<2x16x16x8xf32> to vector<2x16x16x8xbf16>
    %c0_84 = arith.constant 0 : index
    %c0_85 = arith.constant 0 : index
    %c1_86 = arith.constant 1 : index
    %c0_87 = arith.constant 0 : index
    %57 = vector.load %arg7[%c0_84, %c0_85, %c1_86, %c0_87] : memref<2x18x18x8xf32, #tpu.memory_space<vmem>>, vector<2x16x16x8xf32>
    %58 = arith.truncf %57 : vector<2x16x16x8xf32> to vector<2x16x16x8xbf16>
    %c0_88 = arith.constant 0 : index
    %c0_89 = arith.constant 0 : index
    %c2_90 = arith.constant 2 : index
    %c0_91 = arith.constant 0 : index
    %59 = vector.load %arg7[%c0_88, %c0_89, %c2_90, %c0_91] : memref<2x18x18x8xf32, #tpu.memory_space<vmem>>, vector<2x16x16x8xf32>
    %60 = arith.truncf %59 : vector<2x16x16x8xf32> to vector<2x16x16x8xbf16>
    %61 = tpu.concatenate %56, %58, %60 in 3 : vector<2x16x16x8xbf16>, vector<2x16x16x8xbf16>, vector<2x16x16x8xbf16> -> vector<2x16x16x24xbf16>
    %62 = vector.shape_cast %61 : vector<2x16x16x24xbf16> to vector<512x24xbf16>
    %c0_92 = arith.constant 0 : index
    %c0_93 = arith.constant 0 : index
    %c0_94 = arith.constant 0 : index
    %63 = vector.load %arg4[%c0_92, %c0_93, %c0_94] : memref<3x24x8xbf16, #tpu.memory_space<vmem>>, vector<1x24x8xbf16>
    %64 = vector.shape_cast %63 : vector<1x24x8xbf16> to vector<24x8xbf16>
    %cst_95 = arith.constant dense<0.000000e+00> : vector<512x8xf32>
    %65 = tpu.matmul %62, %64, %cst_95 {dimension_numbers = #tpu.dot_dimension_numbers<[1], [0], [0], [1], [0, 0, 1, 1], [], []>} : vector<512x24xbf16>, vector<24x8xbf16>, vector<512x8xf32> -> vector<512x8xf32>
    %66 = arith.addf %54, %65 : vector<512x8xf32>
    %c0_96 = arith.constant 0 : index
    %c1_97 = arith.constant 1 : index
    %c0_98 = arith.constant 0 : index
    %c0_99 = arith.constant 0 : index
    %67 = vector.load %arg7[%c0_96, %c1_97, %c0_98, %c0_99] : memref<2x18x18x8xf32, #tpu.memory_space<vmem>>, vector<2x16x16x8xf32>
    %68 = arith.truncf %67 : vector<2x16x16x8xf32> to vector<2x16x16x8xbf16>
    %c0_100 = arith.constant 0 : index
    %c1_101 = arith.constant 1 : index
    %c1_102 = arith.constant 1 : index
    %c0_103 = arith.constant 0 : index
    %69 = vector.load %arg7[%c0_100, %c1_101, %c1_102, %c0_103] : memref<2x18x18x8xf32, #tpu.memory_space<vmem>>, vector<2x16x16x8xf32>
    %70 = arith.truncf %69 : vector<2x16x16x8xf32> to vector<2x16x16x8xbf16>
    %c0_104 = arith.constant 0 : index
    %c1_105 = arith.constant 1 : index
    %c2_106 = arith.constant 2 : index
    %c0_107 = arith.constant 0 : index
    %71 = vector.load %arg7[%c0_104, %c1_105, %c2_106, %c0_107] : memref<2x18x18x8xf32, #tpu.memory_space<vmem>>, vector<2x16x16x8xf32>
    %72 = arith.truncf %71 : vector<2x16x16x8xf32> to vector<2x16x16x8xbf16>
    %73 = tpu.concatenate %68, %70, %72 in 3 : vector<2x16x16x8xbf16>, vector<2x16x16x8xbf16>, vector<2x16x16x8xbf16> -> vector<2x16x16x24xbf16>
    %74 = vector.shape_cast %73 : vector<2x16x16x24xbf16> to vector<512x24xbf16>
    %c1_108 = arith.constant 1 : index
    %c0_109 = arith.constant 0 : index
    %c0_110 = arith.constant 0 : index
    %75 = vector.load %arg4[%c1_108, %c0_109, %c0_110] : memref<3x24x8xbf16, #tpu.memory_space<vmem>>, vector<1x24x8xbf16>
    %76 = vector.shape_cast %75 : vector<1x24x8xbf16> to vector<24x8xbf16>
    %cst_111 = arith.constant dense<0.000000e+00> : vector<512x8xf32>
    %77 = tpu.matmul %74, %76, %cst_111 {dimension_numbers = #tpu.dot_dimension_numbers<[1], [0], [0], [1], [0, 0, 1, 1], [], []>} : vector<512x24xbf16>, vector<24x8xbf16>, vector<512x8xf32> -> vector<512x8xf32>
    %78 = arith.addf %66, %77 : vector<512x8xf32>
    %c0_112 = arith.constant 0 : index
    %c2_113 = arith.constant 2 : index
    %c0_114 = arith.constant 0 : index
    %c0_115 = arith.constant 0 : index
    %79 = vector.load %arg7[%c0_112, %c2_113, %c0_114, %c0_115] : memref<2x18x18x8xf32, #tpu.memory_space<vmem>>, vector<2x16x16x8xf32>
    %80 = arith.truncf %79 : vector<2x16x16x8xf32> to vector<2x16x16x8xbf16>
    %c0_116 = arith.constant 0 : index
    %c2_117 = arith.constant 2 : index
    %c1_118 = arith.constant 1 : index
    %c0_119 = arith.constant 0 : index
    %81 = vector.load %arg7[%c0_116, %c2_117, %c1_118, %c0_119] : memref<2x18x18x8xf32, #tpu.memory_space<vmem>>, vector<2x16x16x8xf32>
    %82 = arith.truncf %81 : vector<2x16x16x8xf32> to vector<2x16x16x8xbf16>
    %c0_120 = arith.constant 0 : index
    %c2_121 = arith.constant 2 : index
    %c2_122 = arith.constant 2 : index
    %c0_123 = arith.constant 0 : index
    %83 = vector.load %arg7[%c0_120, %c2_121, %c2_122, %c0_123] : memref<2x18x18x8xf32, #tpu.memory_space<vmem>>, vector<2x16x16x8xf32>
    %84 = arith.truncf %83 : vector<2x16x16x8xf32> to vector<2x16x16x8xbf16>
    %85 = tpu.concatenate %80, %82, %84 in 3 : vector<2x16x16x8xbf16>, vector<2x16x16x8xbf16>, vector<2x16x16x8xbf16> -> vector<2x16x16x24xbf16>
    %86 = vector.shape_cast %85 : vector<2x16x16x24xbf16> to vector<512x24xbf16>
    %c2_124 = arith.constant 2 : index
    %c0_125 = arith.constant 0 : index
    %c0_126 = arith.constant 0 : index
    %87 = vector.load %arg4[%c2_124, %c0_125, %c0_126] : memref<3x24x8xbf16, #tpu.memory_space<vmem>>, vector<1x24x8xbf16>
    %88 = vector.shape_cast %87 : vector<1x24x8xbf16> to vector<24x8xbf16>
    %cst_127 = arith.constant dense<0.000000e+00> : vector<512x8xf32>
    %89 = tpu.matmul %86, %88, %cst_127 {dimension_numbers = #tpu.dot_dimension_numbers<[1], [0], [0], [1], [0, 0, 1, 1], [], []>} : vector<512x24xbf16>, vector<24x8xbf16>, vector<512x8xf32> -> vector<512x8xf32>
    %90 = arith.addf %78, %89 : vector<512x8xf32>
    %c0_128 = arith.constant 0 : index
    %c0_129 = arith.constant 0 : index
    %91 = vector.load %arg5[%c0_128, %c0_129] : memref<1x8xf32, #tpu.memory_space<vmem>>, vector<1x8xf32>
    %92 = vector.broadcast %91 : vector<1x8xf32> to vector<512x8xf32>
    %93 = arith.addf %90, %92 : vector<512x8xf32>
    %94 = vector.shape_cast %8 : vector<2x16x16x8xf32> to vector<512x8xf32>
    %95 = arith.addf %93, %94 : vector<512x8xf32>
    %cst_130 = arith.constant 0.000000e+00 : f32
    %96 = vector.broadcast %cst_130 : f32 to vector<512x8xf32>
    %97 = arith.maximumf %95, %96 : vector<512x8xf32>
    %98 = vector.shape_cast %97 : vector<512x8xf32> to vector<2x16x16x8xf32>
    %c0_131 = arith.constant 0 : index
    %c0_132 = arith.constant 0 : index
    %c0_133 = arith.constant 0 : index
    %c0_134 = arith.constant 0 : index
    %99 = vector.load %arg6[%c0_131, %c0_132, %c0_133, %c0_134] : memref<2x16x16x8xf32, #tpu.memory_space<vmem>>, vector<2x16x16x8xf32>
    tpu.vector_store %arg6[%c0_131, %c0_132, %c0_133, %c0_134], %98 {strides = array<i32>} : memref<2x16x16x8xf32, #tpu.memory_space<vmem>>, vector<2x16x16x8xf32>,
    return
  }
  func.func @transform_0(%arg0: i32) -> (i32, i32, i32, i32) {
    %c0_i32 = arith.constant 0 : i32
    %c0_i32_0 = arith.constant 0 : i32
    %c0_i32_1 = arith.constant 0 : i32
    %c0_i32_2 = arith.constant 0 : i32
    return %arg0, %c0_i32, %c0_i32_0, %c0_i32_1 : i32, i32, i32, i32
  }
  func.func @transform_1(%arg0: i32) -> (i32, i32, i32) {
    %c0_i32 = arith.constant 0 : i32
    %c0_i32_0 = arith.constant 0 : i32
    %c0_i32_1 = arith.constant 0 : i32
    %c0_i32_2 = arith.constant 0 : i32
    return %c0_i32, %c0_i32_0, %c0_i32_1 : i32, i32, i32
  }
  func.func @transform_2(%arg0: i32) -> (i32, i32) {
    %c0_i32 = arith.constant 0 : i32
    %c0_i32_0 = arith.constant 0 : i32
    %c0_i32_1 = arith.constant 0 : i32
    return %c0_i32, %c0_i32_0 : i32, i32
  }
  func.func @transform_3(%arg0: i32) -> (i32, i32, i32) {
    %c0_i32 = arith.constant 0 : i32
    %c0_i32_0 = arith.constant 0 : i32
    %c0_i32_1 = arith.constant 0 : i32
    %c0_i32_2 = arith.constant 0 : i32
    return %c0_i32, %c0_i32_0, %c0_i32_1 : i32, i32, i32
  }
  func.func @transform_4(%arg0: i32) -> (i32, i32) {
    %c0_i32 = arith.constant 0 : i32
    %c0_i32_0 = arith.constant 0 : i32
    %c0_i32_1 = arith.constant 0 : i32
    return %c0_i32, %c0_i32_0 : i32, i32
  }
  func.func @transform_5(%arg0: i32) -> (i32, i32, i32, i32) {
    %c0_i32 = arith.constant 0 : i32
    %c0_i32_0 = arith.constant 0 : i32
    %c0_i32_1 = arith.constant 0 : i32
    %c0_i32_2 = arith.constant 0 : i32
    return %arg0, %c0_i32, %c0_i32_0, %c0_i32_1 : i32, i32, i32, i32
  }
}

</mosaic_0001>

<bundles_post_ra>
// kernel: tpu_custom_call.1
= control target key start
LH: loop header
LB: loop body
LE: loop exit
PB: predicated region body
PF: predicated region fallthrough
CT: control target
= control target key end

     0   :  { %vm21_vm0 = vcmask 64512   ;;  %vm36_vm1 = vcmask 57344   ;;  %v7995_v0 = vmov 0.0   ;;  %vm24_vm2 = vcmask 58368   ;;  %s7996_s16 = smov 16   ;;  %s7997_s17 = smov 8   ;;  %s10866_s0 = inlined_call_operand.vmem [shape: f32[2,16,16,8], index: 0, kind: input, shape index: {}]   ;;  %s10867_s1 = inlined_call_operand.vmem [shape: bf16[3,24,8], index: 1, kind: input, shape index: {}]   ;;  %s10868_s2 = inlined_call_operand.vmem [shape: f32[1,8], index: 2, kind: input, shape index: {}]   ;;  %s10869_s3 = inlined_call_operand.vmem [shape: bf16[3,24,8], index: 3, kind: input, shape index: {}]   ;;  %s10870_s4 = inlined_call_operand.vmem [shape: f32[1,8], index: 4, kind: input, shape index: {}]   ;;  %s10871_s5 = inlined_call_operand.vmem [shape: f32[2,16,16,8], index: 5, kind: output, shape index: {}]  }
   0x1   :  { %74 = vst.msk [vmem:[#allocation2 + $0x29] sm:$0x1] %vm36_vm1, %v7995_v0  ;;  %v8033_v1 = vld [vmem:[%s10866_s0] sm:$0xff]  ;;  %v8038_v2 = vld [vmem:[%s10866_s0 + $0x8] sm:$0xff]  ;;  %38 = vst.msk [vmem:[#allocation2 + $0x18] sm:$0x1] %vm36_vm1, %v7995_v0 }
   0x2   :  { %10945 = vst [vmem:[#allocation3_spill] sm:$0xff] %v8033_v1  ;;  %10946 = vst [vmem:[#allocation4_spill] sm:$0xff] %v8038_v2  ;;  %v8185_v3 = vld [vmem:[%s10866_s0 + $0x10] sm:$0xff]  ;;  %v8202_v4 = vld [vmem:[%s10866_s0 + $0x18] sm:$0xff]  ;;  %vm1600_vm3 = vcmask 1043456   ;;  %vm814_vm4 = vcmask 130048  }
   0x3   :  { %22 = vst.msk [vmem:[#allocation2] sm:$0xff] %vm21_vm0, %v7995_v0  ;;  %23 = vst.msk [vmem:[#allocation2 + $0x8] sm:$0xff] %vm21_vm0, %v7995_v0  ;;  %v8209_v5 = vld [vmem:[%s10866_s0 + $0x30] sm:$0xff]  ;;  %v8214_v6 = vld [vmem:[%s10866_s0 + $0x38] sm:$0xff]  ;;  %vm1535_vm5 = vcmask 195584  }
   0x4   :  { %26 = vst.msk [vmem:[#allocation2 + $0x1b0] sm:$0xff] %vm21_vm0, %v7995_v0  ;;  %27 = vst.msk [vmem:[#allocation2 + $0x1b8] sm:$0xff] %vm21_vm0, %v7995_v0  ;;  %v8225_v7 = vld [vmem:[%s10866_s0 + $0x20] sm:$0xff]  ;;  %v8230_v8 = vld [vmem:[%s10866_s0 + $0x28] sm:$0xff] }
   0x5   :  { %30 = vst.msk [vmem:[#allocation2 + $0x198] sm:$0xff] %vm21_vm0, %v7995_v0  ;;  %31 = vst.msk [vmem:[#allocation2 + $0x1a0] sm:$0xff] %vm21_vm0, %v7995_v0  ;;  %v8235_v9 = vld [vmem:[%s10866_s0 + $0x50] sm:$0xff]  ;;  %v8248_v10 = vld [vmem:[%s10866_s0 + $0x58] sm:$0xff] }
   0x6   :  { %33 = vst.msk [vmem:[#allocation2 + $0x348] sm:$0xff] %vm21_vm0, %v7995_v0  ;;  %34 = vst.msk [vmem:[#allocation2 + $0x350] sm:$0xff] %vm21_vm0, %v7995_v0  ;;  %v8255_v11 = vld [vmem:[%s10866_s0 + $0x40] sm:$0xff]  ;;  %v8260_v12 = vld [vmem:[%s10866_s0 + $0x48] sm:$0xff] }
   0x7   :  { %39 = vst.msk [vmem:[#allocation2 + $0x30] sm:$0x1] %vm36_vm1, %v7995_v0  ;;  %40 = vst.msk [vmem:[#allocation2 + $0x48] sm:$0x1] %vm36_vm1, %v7995_v0  ;;  %v8279_v13 = vld [vmem:[%s10866_s0 + $0x70] sm:$0xff]  ;;  %v8284_v14 = vld [vmem:[%s10866_s0 + $0x78] sm:$0xff] }
   0x8   :  { %41 = vst.msk [vmem:[#allocation2 + $0x60] sm:$0x1] %vm36_vm1, %v7995_v0  ;;  %42 = vst.msk [vmem:[#allocation2 + $0x78] sm:$0x1] %vm36_vm1, %v7995_v0  ;;  %v8289_v15 = vld [vmem:[%s10866_s0 + $0x60] sm:$0xff]  ;;  %v8298_v16 = vld [vmem:[%s10866_s0 + $0x68] sm:$0xff] }
   0x9   :  { %43 = vst.msk [vmem:[#allocation2 + $0x90] sm:$0x1] %vm36_vm1, %v7995_v0  ;;  %44 = vst.msk [vmem:[#allocation2 + $0xa8] sm:$0x1] %vm36_vm1, %v7995_v0  ;;  %v8305_v17 = vld [vmem:[%s10866_s0 + $0x90] sm:$0xff]  ;;  %v8310_v18 = vld [vmem:[%s10866_s0 + $0x98] sm:$0xff] }
   0xa   :  { %45 = vst.msk [vmem:[#allocation2 + $0xc0] sm:$0x1] %vm36_vm1, %v7995_v0  ;;  %46 = vst.msk [vmem:[#allocation2 + $0xd8] sm:$0x1] %vm36_vm1, %v7995_v0  ;;  %v8321_v19 = vld [vmem:[%s10866_s0 + $0x80] sm:$0xff]  ;;  %v8326_v20 = vld [vmem:[%s10866_s0 + $0x88] sm:$0xff] }
   0xb   :  { %47 = vst.msk [vmem:[#allocation2 + $0xf0] sm:$0x1] %vm36_vm1, %v7995_v0  ;;  %48 = vst.msk [vmem:[#allocation2 + $0x108] sm:$0x1] %vm36_vm1, %v7995_v0  ;;  %v8331_v21 = vld [vmem:[%s10866_s0 + $0xb0] sm:$0xff]  ;;  %v8340_v22 = vld [vmem:[%s10866_s0 + $0xb8] sm:$0xff] }
   0xc   :  { %49 = vst.msk [vmem:[#allocation2 + $0x120] sm:$0x1] %vm36_vm1, %v7995_v0  ;;  %50 = vst.msk [vmem:[#allocation2 + $0x138] sm:$0x1] %vm36_vm1, %v7995_v0  ;;  %v8347_v23 = vld [vmem:[%s10866_s0 + $0xa0] sm:$0xff]  ;;  %v8352_v24 = vld [vmem:[%s10866_s0 + $0xa8] sm:$0xff] }
   0xd   :  { %51 = vst.msk [vmem:[#allocation2 + $0x150] sm:$0x1] %vm36_vm1, %v7995_v0  ;;  %52 = vst.msk [vmem:[#allocation2 + $0x168] sm:$0x1] %vm36_vm1, %v7995_v0  ;;  %v8396_v59 = vld [vmem:[%s10866_s0 + $0xd0] sm:$0xff]  ;;  %v8401_v60 = vld [vmem:[%s10866_s0 + $0xd8] sm:$0xff] }
   0xe   :  { %53 = vst.msk [vmem:[#allocation2 + $0x180] sm:$0x1] %vm36_vm1, %v7995_v0  ;;  %56 = vst.msk [vmem:[#allocation2 + $0x1c8] sm:$0x1] %vm36_vm1, %v7995_v0  ;;  %v8406_v61 = vld [vmem:[%s10866_s0 + $0xc0] sm:$0xff]  ;;  %v8415_v62 = vld [vmem:[%s10866_s0 + $0xc8] sm:$0xff] }
   0xf   :  { %57 = vst.msk [vmem:[#allocation2 + $0x1e0] sm:$0x1] %vm36_vm1, %v7995_v0  ;;  %58 = vst.msk [vmem:[#allocation2 + $0x1f8] sm:$0x1] %vm36_vm1, %v7995_v0  ;;  %v8422_v63 = vld [vmem:[%s10866_s0 + $0xf0] sm:$0xff] }
  0x10   :  { %59 = vst.msk [vmem:[#allocation2 + $0x210] sm:$0x1] %vm36_vm1, %v7995_v0  ;;  %60 = vst.msk [vmem:[#allocation2 + $0x228] sm:$0x1] %vm36_vm1, %v7995_v0 }
  0x11   :  { %61 = vst.msk [vmem:[#allocation2 + $0x240] sm:$0x1] %vm36_vm1, %v7995_v0  ;;  %62 = vst.msk [vmem:[#allocation2 + $0x258] sm:$0x1] %vm36_vm1, %v7995_v0 }
  0x12   :  { %63 = vst.msk [vmem:[#allocation2 + $0x270] sm:$0x1] %vm36_vm1, %v7995_v0  ;;  %64 = vst.msk [vmem:[#allocation2 + $0x288] sm:$0x1] %vm36_vm1, %v7995_v0 }
  0x13   :  { %65 = vst.msk [vmem:[#allocation2 + $0x2a0] sm:$0x1] %vm36_vm1, %v7995_v0  ;;  %66 = vst.msk [vmem:[#allocation2 + $0x2b8] sm:$0x1] %vm36_vm1, %v7995_v0 }
  0x14   :  { %67 = vst.msk [vmem:[#allocation2 + $0x2d0] sm:$0x1] %vm36_vm1, %v7995_v0  ;;  %68 = vst.msk [vmem:[#allocation2 + $0x2e8] sm:$0x1] %vm36_vm1, %v7995_v0 }
  0x15   :  { %69 = vst.msk [vmem:[#allocation2 + $0x300] sm:$0x1] %vm36_vm1, %v7995_v0  ;;  %70 = vst.msk [vmem:[#allocation2 + $0x318] sm:$0x1] %vm36_vm1, %v7995_v0 }
  0x16   :  { %71 = vst.msk [vmem:[#allocation2 + $0x330] sm:$0x1] %vm36_vm1, %v7995_v0  ;;  %75 = vst.msk [vmem:[#allocation2 + $0x41] sm:$0x1] %vm36_vm1, %v7995_v0 }
  0x17   :  { %76 = vst.msk [vmem:[#allocation2 + $0x59] sm:$0x1] %vm36_vm1, %v7995_v0  ;;  %77 = vst.msk [vmem:[#allocation2 + $0x71] sm:$0x1] %vm36_vm1, %v7995_v0 }
  0x18   :  { %78 = vst.msk [vmem:[#allocation2 + $0x89] sm:$0x1] %vm36_vm1, %v7995_v0  ;;  %79 = vst.msk [vmem:[#allocation2 + $0xa1] sm:$0x1] %vm36_vm1, %v7995_v0 }
  0x19   :  { %80 = vst.msk [vmem:[#allocation2 + $0xb9] sm:$0x1] %vm36_vm1, %v7995_v0  ;;  %81 = vst.msk [vmem:[#allocation2 + $0xd1] sm:$0x1] %vm36_vm1, %v7995_v0 }
  0x1a   :  { %82 = vst.msk [vmem:[#allocation2 + $0xe9] sm:$0x1] %vm36_vm1, %v7995_v0  ;;  %83 = vst.msk [vmem:[#allocation2 + $0x101] sm:$0x1] %vm36_vm1, %v7995_v0 }
  0x1b   :  { %84 = vst.msk [vmem:[#allocation2 + $0x119] sm:$0x1] %vm36_vm1, %v7995_v0  ;;  %85 = vst.msk [vmem:[#allocation2 + $0x131] sm:$0x1] %vm36_vm1, %v7995_v0 }
  0x1c   :  { %86 = vst.msk [vmem:[#allocation2 + $0x149] sm:$0x1] %vm36_vm1, %v7995_v0  ;;  %87 = vst.msk [vmem:[#allocation2 + $0x161] sm:$0x1] %vm36_vm1, %v7995_v0 }
  0x1d   :  { %88 = vst.msk [vmem:[#allocation2 + $0x179] sm:$0x1] %vm36_vm1, %v7995_v0  ;;  %89 = vst.msk [vmem:[#allocation2 + $0x191] sm:$0x1] %vm36_vm1, %v7995_v0 }
  0x1e   :  { %92 = vst.msk [vmem:[#allocation2 + $0x1d9] sm:$0x1] %vm36_vm1, %v7995_v0  ;;  %93 = vst.msk [vmem:[#allocation2 + $0x1f1] sm:$0x1] %vm36_vm1, %v7995_v0 }
  0x1f   :  { %94 = vst.msk [vmem:[#allocation2 + $0x209] sm:$0x1] %vm36_vm1, %v7995_v0  ;;  %95 = vst.msk [vmem:[#allocation2 + $0x221] sm:$0x1] %vm36_vm1, %v7995_v0 }
  0x20   :  { %96 = vst.msk [vmem:[#allocation2 + $0x239] sm:$0x1] %vm36_vm1, %v7995_v0  ;;  %97 = vst.msk [vmem:[#allocation2 + $0x251] sm:$0x1] %vm36_vm1, %v7995_v0 }
  0x21   :  { %98 = vst.msk [vmem:[#allocation2 + $0x269] sm:$0x1] %vm36_vm1, %v7995_v0  ;;  %99 = vst.msk [vmem:[#allocation2 + $0x281] sm:$0x1] %vm36_vm1, %v7995_v0 }
  0x22   :  { %100 = vst.msk [vmem:[#allocation2 + $0x299] sm:$0x1] %vm36_vm1, %v7995_v0  ;;  %101 = vst.msk [vmem:[#allocation2 + $0x2b1] sm:$0x1] %vm36_vm1, %v7995_v0 }
  0x23   :  { %102 = vst.msk [vmem:[#allocation2 + $0x2c9] sm:$0x1] %vm36_vm1, %v7995_v0  ;;  %103 = vst.msk [vmem:[#allocation2 + $0x2e1] sm:$0x1] %vm36_vm1, %v7995_v0 }
  0x24   :  { %104 = vst.msk [vmem:[#allocation2 + $0x2f9] sm:$0x1] %vm36_vm1, %v7995_v0  ;;  %105 = vst.msk [vmem:[#allocation2 + $0x311] sm:$0x1] %vm36_vm1, %v7995_v0 }
  0x25   :  { %106 = vst.msk [vmem:[#allocation2 + $0x329] sm:$0x1] %vm36_vm1, %v7995_v0  ;;  %107 = vst.msk [vmem:[#allocation2 + $0x341] sm:$0x1] %vm36_vm1, %v7995_v0 }
  0x26   :  { %10947 = vst [vmem:[#allocation5_spill] sm:$0xff] %v8185_v3  ;;  %174 = vst.msk [vmem:[#allocation2 + $0x19] sm:$0xff] %vm21_vm0, %v8033_v1 }
  0x27   :  { %175 = vst.msk [vmem:[#allocation2 + $0x21] sm:$0xff] %vm21_vm0, %v8038_v2  ;;  %10948 = vst [vmem:[#allocation6_spill] sm:$0xff] %v8202_v4 }
  0x28   :  { %37 = vst.msk [vmem:[#allocation2] sm:$0x1] %vm36_vm1, %v7995_v0  ;;  %54 = vst.msk [vmem:[#allocation2 + $0x198] sm:$0x1] %vm36_vm1, %v7995_v0 }
  0x29   :  { %55 = vst.msk [vmem:[#allocation2 + $0x1b0] sm:$0x1] %vm36_vm1, %v7995_v0  ;;  %72 = vst.msk [vmem:[#allocation2 + $0x348] sm:$0x1] %vm36_vm1, %v7995_v0 }
  0x2a   :  { %176 = vst.msk [vmem:[#allocation2 + $0x31] sm:$0xff] %vm21_vm0, %v8185_v3  ;;  %10949 = vst [vmem:[#allocation7_spill] sm:$0xff] %v8209_v5 }
  0x2b   :  { %10950 = vst [vmem:[#allocation8_spill] sm:$0xff] %v8214_v6  ;;  %177 = vst.msk [vmem:[#allocation2 + $0x39] sm:$0xff] %vm21_vm0, %v8202_v4 }
  0x2c   :  { %180 = vst.msk [vmem:[#allocation2 + $0x61] sm:$0xff] %vm21_vm0, %v8209_v5  ;;  %181 = vst.msk [vmem:[#allocation2 + $0x69] sm:$0xff] %vm21_vm0, %v8214_v6 }
  0x2d   :  { %10951 = vst [vmem:[#allocation9_spill] sm:$0xff] %v8225_v7  ;;  %10952 = vst [vmem:[#allocation10_spill] sm:$0xff] %v8230_v8  ;;  %v978_v27 = vld [vmem:[#allocation2 + $0x19] sm:$0xff] }
  0x2e   :  { %10953 = vst [vmem:[#allocation11_spill] sm:$0xff] %v8235_v9  ;;  %25 = vst.msk [vmem:[#allocation2 + $0x10] sm:$0x3] %vm24_vm2, %v7995_v0  ;;  %v1074_v25 = vld [vmem:[#allocation2 + $0x1a] sm:$0xff]  ;;  %v1075_v26 = vld [vmem:[#allocation2 + $0x22] sm:$0xff] }
  0x2f   :  { %28 = vst.msk [vmem:[#allocation2 + $0x1c0] sm:$0x3] %vm24_vm2, %v7995_v0  ;;  %32 = vst.msk [vmem:[#allocation2 + $0x1a8] sm:$0x3] %vm24_vm2, %v7995_v0  ;;  %v1138_v28 = vpack.c.bf16 %v1075_v26, %v1074_v25  ;;  %v979_v29 = vld [vmem:[#allocation2 + $0x21] sm:$0xff] }
  0x30   :  { %35 = vst.msk [vmem:[#allocation2 + $0x358] sm:$0x3] %vm24_vm2, %v7995_v0  ;;  %10954 = vst [vmem:[#allocation12_spill] sm:$0xff] %v8248_v10  ;;  %v8360_v32 = vpack.c.bf16 %v979_v29, %v978_v27  ;;  %v8438_v27 = vld [vmem:[%s10866_s0 + $0xe0] sm:$0xff]  ;;  %v8448_v29 = vld [vmem:[%s10866_s0 + $0x110] sm:$0xff] }
  0x31   :  { %178 = vst.msk [vmem:[#allocation2 + $0x49] sm:$0xff] %vm21_vm0, %v8225_v7  ;;  %179 = vst.msk [vmem:[#allocation2 + $0x51] sm:$0xff] %vm21_vm0, %v8230_v8  ;;  %v980_v33 = vld [vmem:[#allocation2 + $0x31] sm:$0xff]  ;;  %1298 = vrot.lane.b32.xlu1 %v1138_v28, %s7996_s16  ;;  %v8443_v28 = vld [vmem:[%s10866_s0 + $0xe8] sm:$0xff] }
  0x32   :  { %184 = vst.msk [vmem:[#allocation2 + $0x91] sm:$0xff] %vm21_vm0, %v8235_v9  ;;  %10955 = vst [vmem:[#allocation13_spill] sm:$0xff] %v8255_v11  ;;  %v1076_v30 = vld [vmem:[#allocation2 + $0x32] sm:$0xff]  ;;  %v1077_v31 = vld [vmem:[#allocation2 + $0x3a] sm:$0xff]  ;;  %1202 = vrot.lane.b32.xlu0 %v8360_v32, %s7997_s17 }
  0x33   :  { %10956 = vst [vmem:[#allocation14_spill] sm:$0xff] %v8260_v12  ;;  %73 = vst.msk [vmem:[#allocation2 + $0x11] sm:$0x1] %vm36_vm1, %v7995_v0  ;;  %v981_v34 = vld [vmem:[#allocation2 + $0x39] sm:$0xff]  ;;  %v8363_v35 = vpack.c.bf16 %v1077_v31, %v1076_v30  ;;  %v984_v37 = vld [vmem:[#allocation2 + $0x61] sm:$0xff] }
  0x34   :  { %90 = vst.msk [vmem:[#allocation2 + $0x1a9] sm:$0x1] %vm36_vm1, %v7995_v0  ;;  %91 = vst.msk [vmem:[#allocation2 + $0x1c1] sm:$0x1] %vm36_vm1, %v7995_v0  ;;  %v8367_v36 = vpack.c.bf16 %v981_v34, %v980_v33  ;;  %v985_v38 = vld [vmem:[#allocation2 + $0x69] sm:$0xff]  ;;  %v8461_v34 = vld [vmem:[%s10866_s0 + $0x118] sm:$0xff] }
  0x35   :  { %108 = vst.msk [vmem:[#allocation2 + $0x359] sm:$0x1] %vm36_vm1, %v7995_v0  ;;  %10957 = vst [vmem:[#allocation15_spill] sm:$0xff] %v8279_v13  ;;  %1300 = vrot.lane.b32.xlu1 %v8363_v35, %s7996_s16  ;;  %v8371_v41 = vpack.c.bf16 %v985_v38, %v984_v37  ;;  %v1080_v43 = vld [vmem:[#allocation2 + $0x62] sm:$0xff]  ;;  %v1081_v44 = vld [vmem:[#allocation2 + $0x6a] sm:$0xff] }
  0x36   :  { %185 = vst.msk [vmem:[#allocation2 + $0x99] sm:$0xff] %vm21_vm0, %v8248_v10  ;;  %182 = vst.msk [vmem:[#allocation2 + $0x79] sm:$0xff] %vm21_vm0, %v8255_v11  ;;  %1204 = vrot.lane.b32.xlu0 %v8367_v36, %s7997_s17  ;;  %v8379_v47 = vpack.c.bf16 %v1081_v44, %v1080_v43  ;;  %v8427_v0 = vld [vmem:[%s10866_s0 + $0xf8] sm:$0xff]  ;;  %v8468_v37 = vld [vmem:[%s10866_s0 + $0x100] sm:$0xff] }
  0x37   :  { %183 = vst.msk [vmem:[#allocation2 + $0x81] sm:$0xff] %vm21_vm0, %v8260_v12  ;;  %10958 = vst [vmem:[#allocation16_spill] sm:$0xff] %v8284_v14  ;;  %v8473_v38 = vld [vmem:[%s10866_s0 + $0x108] sm:$0xff]  ;;  %v8493_v43 = vld [vmem:[%s10866_s0 + $0x138] sm:$0xff] }
  0x38   :  { %10959 = vst [vmem:[#allocation17_spill] sm:$0xff] %v8289_v15  ;;  %188 = vst.msk [vmem:[#allocation2 + $0xc1] sm:$0xff] %vm21_vm0, %v8279_v13  ;;  %v982_v39 = vld [vmem:[#allocation2 + $0x49] sm:$0xff]  ;;  %v983_v40 = vld [vmem:[#allocation2 + $0x51] sm:$0xff] }
  0x39   :  { %189 = vst.msk [vmem:[#allocation2 + $0xc9] sm:$0xff] %vm21_vm0, %v8284_v14  ;;  %10960 = vst [vmem:[#allocation18_spill] sm:$0xff] %v8298_v16  ;;  %v8375_v42 = vpack.c.bf16 %v983_v40, %v982_v39  ;;  %v1078_v45 = vld [vmem:[#allocation2 + $0x4a] sm:$0xff]  ;;  %v1079_v46 = vld [vmem:[#allocation2 + $0x52] sm:$0xff]  ;;  %1208 = vrot.lane.b32.xlu1 %v8371_v41, %s7997_s17 }
  0x3a   :  { %186 = vst.msk [vmem:[#allocation2 + $0xa9] sm:$0xff] %vm21_vm0, %v8289_v15  ;;  %10961 = vst [vmem:[#allocation19_spill] sm:$0xff] %v8305_v17  ;;  %v8383_v48 = vpack.c.bf16 %v1079_v46, %v1078_v45  ;;  %v988_v49 = vld [vmem:[#allocation2 + $0x91] sm:$0xff]  ;;  %v8498_v44 = vld [vmem:[%s10866_s0 + $0x120] sm:$0xff] }
  0x3b   :  { %10962 = vst [vmem:[#allocation20_spill] sm:$0xff] %v8310_v18  ;;  %187 = vst.msk [vmem:[#allocation2 + $0xb1] sm:$0xff] %vm21_vm0, %v8298_v16  ;;  %1206 = vrot.lane.b32.xlu0 %v8375_v42, %s7997_s17  ;;  %v8488_v40 = vld [vmem:[%s10866_s0 + $0x130] sm:$0xff]  ;;  %v8507_v45 = vld [vmem:[%s10866_s0 + $0x128] sm:$0xff] }
  0x3c   :  { %192 = vst.msk [vmem:[#allocation2 + $0xf1] sm:$0xff] %vm21_vm0, %v8305_v17  ;;  %193 = vst.msk [vmem:[#allocation2 + $0xf9] sm:$0xff] %vm21_vm0, %v8310_v18  ;;  %v8514_v46 = vld [vmem:[%s10866_s0 + $0x150] sm:$0xff]  ;;  %v888_v13 = vld [vmem:[#allocation2 + $0x60] sm:$0xff] }
  0x3d   :  { %10963 = vst [vmem:[#allocation21_spill] sm:$0xff] %v8321_v19  ;;  %10964 = vst [vmem:[#allocation22_spill] sm:$0xff] %v8326_v20  ;;  %v989_v50 = vld [vmem:[#allocation2 + $0x99] sm:$0xff]  ;;  %1304 = vrot.lane.b32.xlu1 %v8379_v47, %s7996_s16  ;;  %v889_v12 = vld [vmem:[#allocation2 + $0x68] sm:$0xff] }
  0x3e   :  { %10965 = vst [vmem:[#allocation23_spill] sm:$0xff] %v8331_v21  ;;  %190 = vst.msk [vmem:[#allocation2 + $0xd9] sm:$0xff] %vm21_vm0, %v8321_v19  ;;  %v986_v51 = vld [vmem:[#allocation2 + $0x79] sm:$0xff]  ;;  %v987_v52 = vld [vmem:[#allocation2 + $0x81] sm:$0xff]  ;;  %v8387_v54 = vpack.c.bf16 %v989_v50, %v988_v49 }
  0x3f   :  { %191 = vst.msk [vmem:[#allocation2 + $0xe1] sm:$0xff] %vm21_vm0, %v8326_v20  ;;  %10966 = vst [vmem:[#allocation24_spill] sm:$0xff] %v8340_v22  ;;  %v1084_v53 = vld [vmem:[#allocation2 + $0x92] sm:$0xff]  ;;  %v1085_v55 = vld [vmem:[#allocation2 + $0x9a] sm:$0xff]  ;;  %1302 = vrot.lane.b32.xlu0 %v8383_v48, %s7996_s16  ;;  %v8391_v58 = vpack.c.bf16 %v987_v52, %v986_v51 }
  0x40   :  { %196 = vst.msk [vmem:[#allocation2 + $0x121] sm:$0xff] %vm21_vm0, %v8331_v21  ;;  %10967 = vst [vmem:[#allocation25_spill] sm:$0xff] %v8347_v23  ;;  %v1082_v56 = vld [vmem:[#allocation2 + $0x7a] sm:$0xff]  ;;  %v1083_v57 = vld [vmem:[#allocation2 + $0x82] sm:$0xff]  ;;  %v8452_v30 = vpack.c.bf16 %v1085_v55, %v1084_v53 }
  0x41   :  { %10968 = vst [vmem:[#allocation26_spill] sm:$0xff] %v8352_v24  ;;  %197 = vst.msk [vmem:[#allocation2 + $0x129] sm:$0xff] %vm21_vm0, %v8340_v22  ;;  %v992_v25 = vld [vmem:[#allocation2 + $0xc1] sm:$0xff]  ;;  %v993_v26 = vld [vmem:[#allocation2 + $0xc9] sm:$0xff]  ;;  %1212 = vrot.lane.b32.xlu1 %v8387_v54, %s7997_s17  ;;  %v8477_v39 = vpack.c.bf16 %v1083_v57, %v1082_v56 }
  0x42   :  { %194 = vst.msk [vmem:[#allocation2 + $0x109] sm:$0xff] %vm21_vm0, %v8347_v23  ;;  %195 = vst.msk [vmem:[#allocation2 + $0x111] sm:$0xff] %vm21_vm0, %v8352_v24  ;;  %v990_v31 = vld [vmem:[#allocation2 + $0xa9] sm:$0xff]  ;;  %v991_v33 = vld [vmem:[#allocation2 + $0xb1] sm:$0xff]  ;;  %v8544_v53 = vpack.c.bf16 %v993_v26, %v992_v25 }
  0x43   :  { %10969 = vst [vmem:[#allocation27_spill] sm:$0xff] %v8396_v59  ;;  %10970 = vst [vmem:[#allocation28_spill] sm:$0xff] %v8401_v60  ;;  %1210 = vrot.lane.b32.xlu0 %v8391_v58, %s7997_s17  ;;  %v8519_v49 = vld [vmem:[%s10866_s0 + $0x158] sm:$0xff]  ;;  %v8530_v50 = vld [vmem:[%s10866_s0 + $0x140] sm:$0xff]  ;;  %v8569_v25 = vpack.c.bf16 %v991_v33, %v990_v31 }
  0x44   :  { %10971 = vst [vmem:[#allocation29_spill] sm:$0xff] %v8406_v61  ;;  %200 = vst.msk [vmem:[#allocation2 + $0x151] sm:$0xff] %vm21_vm0, %v8396_v59  ;;  %v8535_v51 = vld [vmem:[%s10866_s0 + $0x148] sm:$0xff]  ;;  %v8540_v52 = vld [vmem:[%s10866_s0 + $0x170] sm:$0xff] }
  0x45   :  { %201 = vst.msk [vmem:[#allocation2 + $0x159] sm:$0xff] %vm21_vm0, %v8401_v60  ;;  %10972 = vst [vmem:[#allocation30_spill] sm:$0xff] %v8415_v62  ;;  %1308 = vrot.lane.b32.xlu1 %v8452_v30, %s7996_s16  ;;  %v8553_v55 = vld [vmem:[%s10866_s0 + $0x178] sm:$0xff]  ;;  %v8560_v56 = vld [vmem:[%s10866_s0 + $0x160] sm:$0xff] }
  0x46   :  { %198 = vst.msk [vmem:[#allocation2 + $0x139] sm:$0xff] %vm21_vm0, %v8406_v61  ;;  %10973 = vst [vmem:[#allocation31_spill] sm:$0xff] %v8422_v63  ;;  %v8565_v57 = vld [vmem:[%s10866_s0 + $0x168] sm:$0xff]  ;;  %v996_v33 = vld [vmem:[#allocation2 + $0xf1] sm:$0xff] }
  0x47   :  { %10974 = vst [vmem:[#allocation32_spill] sm:$0xff] %v8427_v0  ;;  %199 = vst.msk [vmem:[#allocation2 + $0x141] sm:$0xff] %vm21_vm0, %v8415_v62  ;;  %1306 = vrot.lane.b32.xlu0 %v8477_v39, %s7996_s16  ;;  %v1088_v26 = vld [vmem:[#allocation2 + $0xc2] sm:$0xff]  ;;  %v2366_v11 = vld [vmem:[#allocation2 + $0xb1] sm:$0xff] }
  0x48   :  { %204 = vst.msk [vmem:[#allocation2 + $0x181] sm:$0xff] %vm21_vm0, %v8422_v63  ;;  %205 = vst.msk [vmem:[#allocation2 + $0x189] sm:$0xff] %vm21_vm0, %v8427_v0  ;;  %v8709_v0 = vld [vmem:[%s10867_s1] sm:$0xff]   ;;  %v2360_v10 = vld [vmem:[#allocation2 + $0x69] sm:$0xff] }
  0x49   :  { %10975 = vst [vmem:[#allocation33_spill] sm:$0xff] %v8438_v27  ;;  %10976 = vst [vmem:[#allocation34_spill] sm:$0xff] %v8443_v28  ;;  %1216 = vrot.lane.b32.xlu1 %v8544_v53, %s7997_s17  ;;  %v2364_v9 = vld [vmem:[#allocation2 + $0x99] sm:$0xff]  ;;  %v2370_v8 = vld [vmem:[#allocation2 + $0xe1] sm:$0xff] }
  0x4a   :  { %10977 = vst [vmem:[#allocation35_spill] sm:$0xff] %v8448_v29  ;;  %202 = vst.msk [vmem:[#allocation2 + $0x169] sm:$0xff] %vm21_vm0, %v8438_v27  ;;  %v2368_v6 = vld [vmem:[#allocation2 + $0xc9] sm:$0xff]  ;;  %v2374_v7 = vld [vmem:[#allocation2 + $0x111] sm:$0xff] }
  0x4b   :  { %203 = vst.msk [vmem:[#allocation2 + $0x171] sm:$0xff] %vm21_vm0, %v8443_v28  ;;  %10978 = vst [vmem:[#allocation36_spill] sm:$0xff] %v8461_v34  ;;  %1214 = vrot.lane.b32.xlu0 %v8569_v25, %s7997_s17  ;;  %v2372_v5 = vld [vmem:[#allocation2 + $0xf9] sm:$0xff]  ;;  %v2376_v4 = vld [vmem:[#allocation2 + $0x129] sm:$0xff] }
  0x4c   :  { %208 = vst.msk [vmem:[#allocation2 + $0x1e1] sm:$0xff] %vm21_vm0, %v8448_v29  ;;  %10979 = vst [vmem:[#allocation37_spill] sm:$0xff] %v8468_v37  ;;  %v1095_v29 = vld [vmem:[#allocation2 + $0x112] sm:$0xff] }
  0x4d   :  { %10980 = vst [vmem:[#allocation38_spill] sm:$0xff] %v8473_v38  ;;  %209 = vst.msk [vmem:[#allocation2 + $0x1e9] sm:$0xff] %vm21_vm0, %v8461_v34  ;;  %v1097_v34 = vld [vmem:[#allocation2 + $0x12a] sm:$0xff] }
  0x4e   :  { %206 = vst.msk [vmem:[#allocation2 + $0x1c9] sm:$0xff] %vm21_vm0, %v8468_v37  ;;  %207 = vst.msk [vmem:[#allocation2 + $0x1d1] sm:$0xff] %vm21_vm0, %v8473_v38  ;;  %v999_v38 = vld [vmem:[#allocation2 + $0x111] sm:$0xff]  ;;  %v1098_v27 = vld [vmem:[#allocation2 + $0x13a] sm:$0xff] }
  0x4f   :  { %10981 = vst [vmem:[#allocation39_spill] sm:$0xff] %v8488_v40  ;;  %10982 = vst [vmem:[#allocation40_spill] sm:$0xff] %v8493_v43  ;;  %v1094_v37 = vld [vmem:[#allocation2 + $0x10a] sm:$0xff]  ;;  %v1099_v63 = vld [vmem:[#allocation2 + $0x142] sm:$0xff] }
  0x50   :  { %10983 = vst [vmem:[#allocation41_spill] sm:$0xff] %v8498_v44  ;;  %212 = vst.msk [vmem:[#allocation2 + $0x211] sm:$0xff] %vm21_vm0, %v8488_v40  ;;  %v998_v40 = vld [vmem:[#allocation2 + $0x109] sm:$0xff]  ;;  %v8677_v28 = vpack.c.bf16 %v1095_v29, %v1094_v37  ;;  %v1002_v29 = vld [vmem:[#allocation2 + $0x139] sm:$0xff] }
  0x51   :  { %213 = vst.msk [vmem:[#allocation2 + $0x219] sm:$0xff] %vm21_vm0, %v8493_v43  ;;  %10984 = vst [vmem:[#allocation42_spill] sm:$0xff] %v8507_v45  ;;  %v1090_v43 = vld [vmem:[#allocation2 + $0xda] sm:$0xff]  ;;  %v1104_v60 = vld [vmem:[#allocation2 + $0x182] sm:$0xff] }
  0x52   :  { %210 = vst.msk [vmem:[#allocation2 + $0x1f9] sm:$0xff] %vm21_vm0, %v8498_v44  ;;  %10985 = vst [vmem:[#allocation43_spill] sm:$0xff] %v8514_v46  ;;  %v1091_v44 = vld [vmem:[#allocation2 + $0xe2] sm:$0xff]  ;;  %v1007_v62 = vld [vmem:[#allocation2 + $0x171] sm:$0xff] }
  0x53   :  { %10986 = vst [vmem:[#allocation44_spill] sm:$0xff] %v8519_v49  ;;  %211 = vst.msk [vmem:[#allocation2 + $0x201] sm:$0xff] %vm21_vm0, %v8507_v45  ;;  %v995_v45 = vld [vmem:[#allocation2 + $0xe1] sm:$0xff]  ;;  %v1105_v61 = vld [vmem:[#allocation2 + $0x18a] sm:$0xff] }
  0x54   :  { %216 = vst.msk [vmem:[#allocation2 + $0x241] sm:$0xff] %vm21_vm0, %v8514_v46  ;;  %217 = vst.msk [vmem:[#allocation2 + $0x249] sm:$0xff] %vm21_vm0, %v8519_v49  ;;  %v1087_v49 = vld [vmem:[#allocation2 + $0xb2] sm:$0xff]  ;;  %v1003_v37 = vld [vmem:[#allocation2 + $0x141] sm:$0xff] }
  0x55   :  { %10987 = vst [vmem:[#allocation45_spill] sm:$0xff] %v8530_v50  ;;  %10988 = vst [vmem:[#allocation46_spill] sm:$0xff] %v8535_v51  ;;  %v994_v46 = vld [vmem:[#allocation2 + $0xd9] sm:$0xff]  ;;  %v2378_v2 = vld [vmem:[#allocation2 + $0x141] sm:$0xff] }
  0x56   :  { %10989 = vst [vmem:[#allocation47_spill] sm:$0xff] %v8540_v52  ;;  %214 = vst.msk [vmem:[#allocation2 + $0x229] sm:$0xff] %vm21_vm0, %v8530_v50  ;;  %v2479_v1 = vld [vmem:[#allocation2 + $0x182] sm:$0xff] }
  0x57   :  { %215 = vst.msk [vmem:[#allocation2 + $0x231] sm:$0xff] %vm21_vm0, %v8535_v51  ;;  %10990 = vst [vmem:[#allocation48_spill] sm:$0xff] %v8553_v55  ;;  %v1089_v51 = vld [vmem:[#allocation2 + $0xca] sm:$0xff] }
  0x58   :  { %220 = vst.msk [vmem:[#allocation2 + $0x271] sm:$0xff] %vm21_vm0, %v8540_v52  ;;  %10991 = vst [vmem:[#allocation49_spill] sm:$0xff] %v8560_v56  ;;  %v1086_v52 = vld [vmem:[#allocation2 + $0xaa] sm:$0xff]  ;;  %v8579_v50 = vpack.c.bf16 %v1089_v51, %v1088_v26  ;;  %v1092_v51 = vld [vmem:[#allocation2 + $0xf2] sm:$0xff] }
  0x59   :  { %10992 = vst [vmem:[#allocation50_spill] sm:$0xff] %v8565_v57  ;;  %221 = vst.msk [vmem:[#allocation2 + $0x279] sm:$0xff] %vm21_vm0, %v8553_v55  ;;  %v8583_v31 = vpack.c.bf16 %v1087_v49, %v1086_v52  ;;  %v997_v55 = vld [vmem:[#allocation2 + $0xf9] sm:$0xff]  ;;  %v8599_v52 = vpack.c.bf16 %v1091_v44, %v1090_v43  ;;  %v8612_v43 = vld [vmem:[%s10866_s0 + $0x190] sm:$0xff] }
  0x5a   :  { %218 = vst.msk [vmem:[#allocation2 + $0x259] sm:$0xff] %vm21_vm0, %v8560_v56  ;;  %219 = vst.msk [vmem:[#allocation2 + $0x261] sm:$0xff] %vm21_vm0, %v8565_v57  ;;  %1312 = vrot.lane.b32.xlu1 %v8579_v50, %s7996_s16  ;;  %v8587_v57 = vpack.c.bf16 %v997_v55, %v996_v33  ;;  %v8591_v56 = vpack.c.bf16 %v995_v45, %v994_v46  ;;  %v1093_v26 = vld [vmem:[#allocation2 + $0xfa] sm:$0xff]  ;;  %v1001_v33 = vld [vmem:[#allocation2 + $0x129] sm:$0xff] }
  0x5b   :  { %1310 = vrot.lane.b32.xlu0 %v8583_v31, %s7996_s16  ;;  %v8595_v49 = vpack.c.bf16 %v1093_v26, %v1092_v51  ;;  %v1000_v55 = vld [vmem:[#allocation2 + $0x121] sm:$0xff]  ;;  %v8607_v51 = vpack.c.bf16 %v999_v38, %v998_v40  ;;  %10993 = vst [vmem:[#allocation51_spill] sm:$0xff] %v8612_v43  ;;  %v8617_v44 = vld [vmem:[%s10866_s0 + $0x198] sm:$0xff]  ;;  %224 = vst.msk [vmem:[#allocation2 + $0x2a1] sm:$0xff] %vm21_vm0, %v8612_v43 }
  0x5c   :  { %v1096_v45 = vld [vmem:[#allocation2 + $0x122] sm:$0xff]  ;;  %v8603_v46 = vpack.c.bf16 %v1001_v33, %v1000_v55  ;;  %10994 = vst [vmem:[#allocation52_spill] sm:$0xff] %v8617_v44  ;;  %225 = vst.msk [vmem:[#allocation2 + $0x2a9] sm:$0xff] %vm21_vm0, %v8617_v44  ;;  %v8638_v40 = vld [vmem:[%s10866_s0 + $0x1b0] sm:$0xff] }
  0x5d   :  { %v8622_v26 = vld [vmem:[%s10866_s0 + $0x180] sm:$0xff]  ;;  %v8631_v38 = vld [vmem:[%s10866_s0 + $0x188] sm:$0xff]  ;;  %10997 = vst [vmem:[#allocation55_spill] sm:$0xff] %v8638_v40  ;;  %v8643_v55 = vld [vmem:[%s10866_s0 + $0x1b8] sm:$0xff] }
  0x5e   :  { %1220 = vrot.lane.b32.xlu1 %v8587_v57, %s7997_s17  ;;  %10995 = vst [vmem:[#allocation53_spill] sm:$0xff] %v8622_v26  ;;  %10996 = vst [vmem:[#allocation54_spill] sm:$0xff] %v8631_v38  ;;  %v1004_v33 = vld [vmem:[#allocation2 + $0x151] sm:$0xff]  ;;  %v1005_v44 = vld [vmem:[#allocation2 + $0x159] sm:$0xff] }
  0x5f   :  { %1218 = vrot.lane.b32.xlu0 %v8591_v56, %s7997_s17  ;;  %222 = vst.msk [vmem:[#allocation2 + $0x289] sm:$0xff] %vm21_vm0, %v8622_v26  ;;  %10998 = vst [vmem:[#allocation56_spill] sm:$0xff] %v8643_v55  ;;  %v8654_v26 = vld [vmem:[%s10866_s0 + $0x1a0] sm:$0xff]  ;;  %v8659_v43 = vld [vmem:[%s10866_s0 + $0x1a8] sm:$0xff] }
  0x60   :  { %223 = vst.msk [vmem:[#allocation2 + $0x291] sm:$0xff] %vm21_vm0, %v8631_v38  ;;  %228 = vst.msk [vmem:[#allocation2 + $0x2d1] sm:$0xff] %vm21_vm0, %v8638_v40  ;;  %v1149_v38 = vpack.c.bf16 %v1097_v34, %v1096_v45  ;;  %v8673_v40 = vld [vmem:[%s10866_s0 + $0x1d0] sm:$0xff]  ;;  %v8682_v34 = vld [vmem:[%s10866_s0 + $0x1d8] sm:$0xff] }
  0x61   :  { %229 = vst.msk [vmem:[#allocation2 + $0x2d9] sm:$0xff] %vm21_vm0, %v8643_v55  ;;  %10999 = vst [vmem:[#allocation57_spill] sm:$0xff] %v8654_v26  ;;  %v7983_v55 = vld [vmem:[%s10867_s1 + $0xc] sm:$0xff]   ;;  %v8689_v45 = vld [vmem:[%s10866_s0 + $0x1c0] sm:$0xff] }
  0x62   :  { %1316 = vrot.lane.b32.xlu1 %v8595_v49, %s7996_s16  ;;  %11000 = vst [vmem:[#allocation58_spill] sm:$0xff] %v8659_v43  ;;  %226 = vst.msk [vmem:[#allocation2 + $0x2b9] sm:$0xff] %vm21_vm0, %v8654_v26  ;;  %7310 = vmatprep.subr.bf16.mxu0 %v7983_v55  ;;  %v1055_v26 = vpack.c.bf16 %v1005_v44, %v1004_v33  ;;  %v1008_v33 = vld [vmem:[#allocation2 + $0x181] sm:$0xff]  ;;  %v1016_v24 = vld [vmem:[#allocation2 + $0x211] sm:$0xff] }
  0x63   :  { %1314 = vrot.lane.b32.xlu0 %v8599_v52, %s7996_s16  ;;  %227 = vst.msk [vmem:[#allocation2 + $0x2c1] sm:$0xff] %vm21_vm0, %v8659_v43  ;;  %11001 = vst [vmem:[#allocation59_spill] sm:$0xff] %v8673_v40  ;;  %v8694_v43 = vld [vmem:[%s10866_s0 + $0x1c8] sm:$0xff]  ;;  %7311 = vmatpush3.bf16.msra.mxu0 %v7983_v55  ;;  %v1017_v22 = vld [vmem:[#allocation2 + $0x219] sm:$0xff] }
  0x64   :  { %11002 = vst [vmem:[#allocation60_spill] sm:$0xff] %v8682_v34  ;;  %232 = vst.msk [vmem:[#allocation2 + $0x301] sm:$0xff] %vm21_vm0, %v8673_v40  ;;  %v7984_v40 = vld [vmem:[%s10867_s1 + $0x14] ss:$0 sps:$4 sm:$0xff]   ;;  %v1113_v23 = vld [vmem:[#allocation2 + $0x21a] sm:$0xff] }
  0x65   :  { %11003 = vst [vmem:[#allocation61_spill] sm:$0xff] %v8689_v45  ;;  %11004 = vst [vmem:[#allocation62_spill] sm:$0xff] %v8694_v43  ;;  %7974 = vmatprep.subr.msk.bf16.mxu0 %vm1600_vm3, %v7984_v40  ;;  %v1602_v55 = vsel %vm1600_vm3, %v7984_v40, 0  ;;  %v1110_v21 = vld [vmem:[#allocation2 + $0x1fa] sm:$0xff]  ;;  %v1018_v20 = vld [vmem:[#allocation2 + $0x229] sm:$0xff] }
  0x66   :  { %1224 = vrot.lane.b32.xlu1 %v8603_v46, %s7997_s17  ;;  %233 = vst.msk [vmem:[#allocation2 + $0x309] sm:$0xff] %vm21_vm0, %v8682_v34  ;;  %230 = vst.msk [vmem:[#allocation2 + $0x2e9] sm:$0xff] %vm21_vm0, %v8689_v45  ;;  %v8713_v34 = vpack.c.bf16 %v1003_v37, %v1002_v29  ;;  %v1101_v45 = vld [vmem:[#allocation2 + $0x15a] sm:$0xff]  ;;  %v1009_v29 = vld [vmem:[#allocation2 + $0x189] sm:$0xff] }
  0x67   :  { %1222 = vrot.lane.b32.xlu0 %v8607_v51, %s7997_s17  ;;  %231 = vst.msk [vmem:[#allocation2 + $0x2f1] sm:$0xff] %vm21_vm0, %v8694_v43  ;;  %v1100_v43 = vld [vmem:[#allocation2 + $0x152] sm:$0xff]  ;;  %7313 = vmatpush3.bf16.msra.mxu0 %v1602_v55  ;;  %v1006_v37 = vld [vmem:[#allocation2 + $0x169] sm:$0xff]  ;;  %v1057_v40 = vpack.c.bf16 %v1009_v29, %v1008_v33  ;;  %v1012_v29 = vld [vmem:[#allocation2 + $0x1e1] sm:$0xff] }
  0x68   :  { %v1151_v44 = vpack.c.bf16 %v1101_v45, %v1100_v43  ;;  %7378 = vmatprep.subr.bf16.mxu0 %v8709_v0  ;;  %v8726_v43 = vpack.c.bf16 %v1007_v62, %v1006_v37  ;;  %v1102_v45 = vld [vmem:[#allocation2 + $0x16a] sm:$0xff]  ;;  %v1103_v55 = vld [vmem:[#allocation2 + $0x172] sm:$0xff]  ;;  %v1023_v19 = vld [vmem:[#allocation2 + $0x261] sm:$0xff] }
  0x69   :  { %v8750_v62 = vld [vmem:[%s10866_s0 + $0x1e8] sm:$0xff]  ;;  %v8759_v33 = vpack.c.bf16 %v1103_v55, %v1102_v45  ;;  %v1115_v18 = vld [vmem:[#allocation2 + $0x232] sm:$0xff]  ;;  %v277_v3 = vld [vmem:[#allocation2 + $0x200] sm:$0xff] }
  0x6a   :  { %1320 = vrot.lane.b32.xlu1 %v1149_v38, %s7996_s16  ;;  %v8721_v38 = vpack.c.bf16 %v1099_v63, %v1098_v27  ;;  %v8736_v63 = vld [vmem:[%s10866_s0 + $0x1f8] sm:$0xff]  ;;  %v8741_v27 = vld [vmem:[%s10866_s0 + $0x1e0] sm:$0xff]  ;;  %11008 = vst [vmem:[#allocation66_spill] sm:$0xff] %v8750_v62  ;;  %235 = vst.msk [vmem:[#allocation2 + $0x321] sm:$0xff] %vm21_vm0, %v8750_v62 }
  0x6b   :  { %1318 = vrot.lane.b32.xlu0 %v8677_v28, %s7996_s16  ;;  %11006 = vst [vmem:[#allocation64_spill] sm:$0xff] %v8736_v63  ;;  %11007 = vst [vmem:[#allocation65_spill] sm:$0xff] %v8741_v27  ;;  %v1013_v37 = vld [vmem:[#allocation2 + $0x1e9] sm:$0xff] }
  0x6c   :  { %237 = vst.msk [vmem:[#allocation2 + $0x339] sm:$0xff] %vm21_vm0, %v8736_v63  ;;  %234 = vst.msk [vmem:[#allocation2 + $0x319] sm:$0xff] %vm21_vm0, %v8741_v27  ;;  %v1010_v63 = vld [vmem:[#allocation2 + $0x1c9] sm:$0xff]  ;;  %v1059_v59 = vpack.c.bf16 %v1013_v37, %v1012_v29  ;;  %v1015_v29 = vld [vmem:[#allocation2 + $0x201] sm:$0xff]  ;;  %v1061_v37 = vpack.c.bf16 %v1017_v22, %v1016_v24 }
  0x6d   :  { %v1108_v62 = vld [vmem:[#allocation2 + $0x1e2] sm:$0xff] }
  0x6e   :  { %1228 = vrot.lane.b32.xlu1 %v1055_v26, %s7997_s17  ;;  %v8731_v26 = vld [vmem:[%s10866_s0 + $0x1f0] sm:$0xff] }
  0x6f   :  { %1226 = vrot.lane.b32.xlu0 %v8713_v34, %s7997_s17  ;;  %11005 = vst [vmem:[#allocation63_spill] sm:$0xff] %v8731_v26  ;;  %236 = vst.msk [vmem:[#allocation2 + $0x331] sm:$0xff] %vm21_vm0, %v8731_v26  ;;  %v1011_v26 = vld [vmem:[#allocation2 + $0x1d1] sm:$0xff] }
  0x70   :  { %v8764_v27 = vpack.c.bf16 %v1011_v26, %v1010_v63  ;;  %v1112_v63 = vld [vmem:[#allocation2 + $0x212] sm:$0xff]  ;;  %v1130_v17 = vld [vmem:[#allocation2 + $0x2ea] sm:$0xff] }
  0x71   :  { %v1135_v14 = vld [vmem:[#allocation2 + $0x322] sm:$0xff] }
  0x72   :  { %1324 = vrot.lane.b32.xlu1 %v1151_v44, %s7996_s16  ;;  %v1153_v44 = vpack.c.bf16 %v1105_v61, %v1104_v60  ;;  %v1106_v60 = vld [vmem:[#allocation2 + $0x1ca] sm:$0xff]  ;;  %v1107_v61 = vld [vmem:[#allocation2 + $0x1d2] sm:$0xff] }
  0x73   :  { %1322 = vrot.lane.b32.xlu0 %v8721_v38, %s7996_s16  ;;  %v1154_v55 = vpack.c.bf16 %v1107_v61, %v1106_v60  ;;  %v1020_v60 = vld [vmem:[#allocation2 + $0x241] sm:$0xff]  ;;  %v1021_v61 = vld [vmem:[#allocation2 + $0x249] sm:$0xff] }
  0x74   :  { %v1063_v22 = vpack.c.bf16 %v1021_v61, %v1020_v60  ;;  %v1121_v60 = vld [vmem:[#allocation2 + $0x27a] sm:$0xff] }
  0x75   :  { %v1118_v61 = vld [vmem:[#allocation2 + $0x25a] sm:$0xff] }
  0x76   :  { %1232 = vrot.lane.b32.xlu1 %v1057_v40, %s7997_s17  ;;  %v1109_v40 = vld [vmem:[#allocation2 + $0x1ea] sm:$0xff] }
  0x77   :  { %1230 = vrot.lane.b32.xlu0 %v8726_v43, %s7997_s17  ;;  %v1155_v45 = vpack.c.bf16 %v1109_v40, %v1108_v62  ;;  %v1157_v62 = vpack.c.bf16 %v1113_v23, %v1112_v63  ;;  %v1025_v63 = vld [vmem:[#allocation2 + $0x279] sm:$0xff] }
  0x7a   :  { %1328 = vrot.lane.b32.xlu1 %v1153_v44, %s7996_s16  ;;  %v1014_v44 = vld [vmem:[#allocation2 + $0x1f9] sm:$0xff] }
  0x7b   :  { %1326 = vrot.lane.b32.xlu0 %v8759_v33, %s7996_s16  ;;  %v8771_v26 = vpack.c.bf16 %v1015_v29, %v1014_v44  ;;  %v1117_v44 = vld [vmem:[#allocation2 + $0x24a] sm:$0xff] }
  0x7c   :  { %v1114_v29 = vld [vmem:[#allocation2 + $0x22a] sm:$0xff] }
  0x7e   :  { %1236 = vrot.lane.b32.xlu1 %v1059_v59, %s7997_s17  ;;  %v1111_v59 = vld [vmem:[#allocation2 + $0x202] sm:$0xff] }
  0x7f   :  { %1234 = vrot.lane.b32.xlu0 %v8764_v27, %s7997_s17  ;;  %v1156_v40 = vpack.c.bf16 %v1111_v59, %v1110_v21  ;;  %v1158_v21 = vpack.c.bf16 %v1115_v18, %v1114_v29  ;;  %v1022_v59 = vld [vmem:[#allocation2 + $0x259] sm:$0xff]  ;;  %v1027_v29 = vld [vmem:[#allocation2 + $0x291] sm:$0xff] }
  0x82   :  { %1332 = vrot.lane.b32.xlu1 %v1155_v45, %s7996_s16  ;;  %v1019_v45 = vld [vmem:[#allocation2 + $0x231] sm:$0xff] }
  0x83   :  { %1330 = vrot.lane.b32.xlu0 %v1154_v55, %s7996_s16  ;;  %v1062_v24 = vpack.c.bf16 %v1019_v45, %v1018_v20  ;;  %v1116_v55 = vld [vmem:[#allocation2 + $0x242] sm:$0xff]  ;;  %v1064_v20 = vpack.c.bf16 %v1023_v19, %v1022_v59  ;;  %v1123_v59 = vld [vmem:[#allocation2 + $0x292] sm:$0xff] }
  0x84   :  { %v1159_v23 = vpack.c.bf16 %v1117_v44, %v1116_v55  ;;  %v1119_v45 = vld [vmem:[#allocation2 + $0x262] sm:$0xff] }
  0x85   :  { %v1160_v18 = vpack.c.bf16 %v1119_v45, %v1118_v61  ;;  %v1029_v55 = vld [vmem:[#allocation2 + $0x2a9] sm:$0xff]  ;;  %v1030_v61 = vld [vmem:[#allocation2 + $0x2b9] sm:$0xff]  ;;  %v1031_v45 = vld [vmem:[#allocation2 + $0x2c1] sm:$0xff] }
  0x86   :  { %1240 = vrot.lane.b32.xlu1 %v1061_v37, %s7997_s17  ;;  %v1024_v37 = vld [vmem:[#allocation2 + $0x271] sm:$0xff]  ;;  %v1026_v44 = vld [vmem:[#allocation2 + $0x289] sm:$0xff] }
  0x87   :  { %1238 = vrot.lane.b32.xlu0 %v8771_v26, %s7997_s17  ;;  %v1066_v19 = vpack.c.bf16 %v1027_v29, %v1026_v44  ;;  %v1126_v44 = vld [vmem:[#allocation2 + $0x2ba] sm:$0xff]  ;;  %v1127_v29 = vld [vmem:[#allocation2 + $0x2c2] sm:$0xff] }
  0x8a   :  { %1336 = vrot.lane.b32.xlu1 %v1157_v62, %s7996_s16  ;;  %v1065_v62 = vpack.c.bf16 %v1025_v63, %v1024_v37  ;;  %v1125_v37 = vld [vmem:[#allocation2 + $0x2aa] sm:$0xff] }
  0x8b   :  { %1334 = vrot.lane.b32.xlu0 %v1156_v40, %s7996_s16  ;;  %v1120_v40 = vld [vmem:[#allocation2 + $0x272] sm:$0xff]  ;;  %v1122_v63 = vld [vmem:[#allocation2 + $0x28a] sm:$0xff] }
  0x8e   :  { %1244 = vrot.lane.b32.xlu1 %v1063_v22, %s7997_s17  ;;  %v1161_v22 = vpack.c.bf16 %v1121_v60, %v1120_v40  ;;  %v1032_v40 = vld [vmem:[#allocation2 + $0x2d1] sm:$0xff]  ;;  %v1033_v60 = vld [vmem:[#allocation2 + $0x2d9] sm:$0xff] }
  0x8f   :  { %1242 = vrot.lane.b32.xlu0 %v1062_v24, %s7997_s17  ;;  %v1028_v24 = vld [vmem:[#allocation2 + $0x2a1] sm:$0xff] }
  0x92   :  { %1340 = vrot.lane.b32.xlu1 %v1159_v23, %s7996_s16  ;;  %v1067_v23 = vpack.c.bf16 %v1029_v55, %v1028_v24  ;;  %v1128_v24 = vld [vmem:[#allocation2 + $0x2d2] sm:$0xff]  ;;  %v1129_v55 = vld [vmem:[#allocation2 + $0x2da] sm:$0xff] }
  0x93   :  { %1338 = vrot.lane.b32.xlu0 %v1158_v21, %s7996_s16  ;;  %v1124_v21 = vld [vmem:[#allocation2 + $0x2a2] sm:$0xff] }
  0x96   :  { %1248 = vrot.lane.b32.xlu1 %v1065_v62, %s7997_s17  ;;  %v1163_v62 = vpack.c.bf16 %v1125_v37, %v1124_v21  ;;  %v1036_v21 = vld [vmem:[#allocation2 + $0x301] sm:$0xff]  ;;  %v1037_v37 = vld [vmem:[#allocation2 + $0x309] sm:$0xff] }
  0x97   :  { %1246 = vrot.lane.b32.xlu0 %v1064_v20, %s7997_s17  ;;  %v1162_v20 = vpack.c.bf16 %v1123_v59, %v1122_v63  ;;  %v1034_v63 = vld [vmem:[#allocation2 + $0x2e9] sm:$0xff]  ;;  %v1035_v59 = vld [vmem:[#allocation2 + $0x2f1] sm:$0xff] }
  0x9a   :  { %1344 = vrot.lane.b32.xlu1 %v1161_v22, %s7996_s16  ;;  %v1069_v22 = vpack.c.bf16 %v1033_v60, %v1032_v40  ;;  %v882_v40 = vld [vmem:[#allocation2 + $0x18] sm:$0xff]  ;;  %v883_v60 = vld [vmem:[#allocation2 + $0x20] sm:$0xff] }
  0x9b   :  { %1342 = vrot.lane.b32.xlu0 %v1160_v18, %s7996_s16  ;;  %v1068_v18 = vpack.c.bf16 %v1031_v45, %v1030_v61  ;;  %v1132_v61 = vld [vmem:[#allocation2 + $0x302] sm:$0xff]  ;;  %v1133_v45 = vld [vmem:[#allocation2 + $0x30a] sm:$0xff] }
  0x9e   :  { %1252 = vrot.lane.b32.xlu1 %v1067_v23, %s7997_s17  ;;  %v1165_v23 = vpack.c.bf16 %v1129_v55, %v1128_v24  ;;  %v1167_v24 = vpack.c.bf16 %v1133_v45, %v1132_v61  ;;  %v884_v55 = vld [vmem:[#allocation2 + $0x30] sm:$0xff]  ;;  %v1137_v61 = vld [vmem:[#allocation2 + $0x33a] sm:$0xff] }
  0x9f   :  { %1250 = vrot.lane.b32.xlu0 %v1066_v19, %s7997_s17  ;;  %v1164_v19 = vpack.c.bf16 %v1127_v29, %v1126_v44  ;;  %v885_v29 = vld [vmem:[#allocation2 + $0x38] sm:$0xff] }
  0xa2   :  { %1348 = vrot.lane.b32.xlu1 %v1163_v62, %s7996_s16  ;;  %v1071_v62 = vpack.c.bf16 %v1037_v37, %v1036_v21  ;;  %v1041_v21 = vld [vmem:[#allocation2 + $0x339] sm:$0xff] }
  0xa3   :  { %1346 = vrot.lane.b32.xlu0 %v1162_v20, %s7996_s16  ;;  %v1070_v20 = vpack.c.bf16 %v1035_v59, %v1034_v63  ;;  %v1299_v37 = vpop.permute.xlu1 %1298  ;;  %v1039_v63 = vld [vmem:[#allocation2 + $0x321] sm:$0xff] }
  0xa4   :  { %v1203_v59 = vpop.permute.xlu0 %1202 }
  0xa6   :  { %1256 = vrot.lane.b32.xlu1 %v1069_v22, %s7997_s17  ;;  %v1131_v22 = vld [vmem:[#allocation2 + $0x2f2] sm:$0xff] }
  0xa7   :  { %1254 = vrot.lane.b32.xlu0 %v1068_v18, %s7997_s17  ;;  %v946_v18 = vpack.c.bf16 %v883_v60, %v882_v40  ;;  %v1166_v44 = vpack.c.bf16 %v1131_v22, %v1130_v17  ;;  %v1136_v60 = vld [vmem:[#allocation2 + $0x332] sm:$0xff]  ;;  %v1301_v45 = vpop.permute.xlu1 %1300  ;;  %v1134_v22 = vld [vmem:[#allocation2 + $0x31a] sm:$0xff] }
  0xa8   :  { %v1205_v15 = vpop.permute.xlu0 %1204 }
  0xa9   :  { %v1364_v16 = vsel %vm21_vm0, %v946_v18, %v1203_v59 }
  0xaa   :  { %1352 = vrot.lane.b32.xlu1 %v1165_v23, %s7996_s16  ;;  %v1040_v23 = vld [vmem:[#allocation2 + $0x331] sm:$0xff] }
  0xab   :  { %1350 = vrot.lane.b32.xlu0 %v1164_v19, %s7996_s16  ;;  %v1038_v19 = vld [vmem:[#allocation2 + $0x319] sm:$0xff]  ;;  %v1073_v40 = vpack.c.bf16 %v1041_v21, %v1040_v23  ;;  %v1168_v23 = vpack.c.bf16 %v1135_v14, %v1134_v22  ;;  %v949_v21 = vpack.c.bf16 %v889_v12, %v888_v13 }
  0xac   :  { %v1072_v17 = vpack.c.bf16 %v1039_v63, %v1038_v19  ;;  %v334_v19 = vld [vmem:[#allocation2 + $0x1] sm:$0xff]  ;;  %v8816_v14 = vld [vmem:[%s10867_s1 + $0x18] sm:$0xff]  }
  0xad   :  { %v1207_v59 = vpop.permute.xlu0 %1206  ;;  %v432_v13 = vld [vmem:[#allocation2 + $0x1a] sm:$0xff] }
  0xae   :  { %1260 = vrot.lane.b32.xlu1 %v1071_v62, %s7997_s17  ;;  %v947_v62 = vpack.c.bf16 %v885_v29, %v884_v55  ;;  %v887_v55 = vld [vmem:[#allocation2 + $0x50] sm:$0xff] }
  0xaf   :  { %1258 = vrot.lane.b32.xlu0 %v1070_v20, %s7997_s17  ;;  %v1459_v20 = vsel %vm814_vm4, %v1364_v16, %v1299_v37  ;;  %v7986_v16 = vld [vmem:[%s10867_s1 + $0x8] ss:$0 sps:$4 sm:$0xff]   ;;  %v1209_v37 = vpop.permute.xlu1 %1208 }
  0xb0   :  { %7314 = vmatprep.mubr.msk.bf16.mxu0 %vm1535_vm5, %v1459_v20  ;;  %v1367_v18 = vsel %vm21_vm0, %v947_v62, %v1205_v15  ;;  %v335_v15 = vld [vmem:[#allocation2 + $0x9] sm:$0xff]  ;;  %v1967_v62 = vsel %vm1600_vm3, %v7986_v16, 0 }
  0xb1   :  { %v1461_v29 = vsel %vm814_vm4, %v1367_v18, %v1301_v45  ;;  %v398_v12 = vpack.c.bf16 %v335_v15, %v334_v19  ;;  %v1303_v22 = vpop.permute.xlu0 %1302  ;;  %v892_v18 = vld [vmem:[#allocation2 + $0x90] sm:$0xff] }
  0xb2   :  { %1356 = vrot.lane.b32.xlu1 %v1167_v24, %s7996_s16  ;;  %v886_v24 = vld [vmem:[#allocation2 + $0x48] sm:$0xff]  ;;  %7315 = vmatmul.mubr.msk.bf16.vlgmr.msra.gmra.mrb[0].mxu0 %vm1535_vm5, %v1461_v29 }
  0xb3   :  { %1354 = vrot.lane.b32.xlu0 %v1166_v44, %s7996_s16  ;;  %v1169_v44 = vpack.c.bf16 %v1137_v61, %v1136_v60  ;;  %7379 = vmatpush3.bf16.msra.mxu0 %v8709_v0  ;;  %v948_v63 = vpack.c.bf16 %v887_v55, %v886_v24  ;;  %v1373_v0 = vsel %vm21_vm0, %v949_v21, %v1209_v37  ;;  %v1305_v20 = vpop.permute.xlu1 %1304  ;;  %v431_v60 = vld [vmem:[#allocation2 + $0xa] sm:$0xff]  ;;  %v893_v24 = vld [vmem:[#allocation2 + $0x98] sm:$0xff] }
  0xb4   :  { %7975 = vmatprep.subr.msk.bf16.mxu0 %vm1600_vm3, %v7986_v16  ;;  %v1465_v45 = vsel %vm814_vm4, %v1373_v0, %v1305_v20  ;;  %v891_v16 = vld [vmem:[#allocation2 + $0x80] sm:$0xff]  ;;  %v951_v21 = vpack.c.bf16 %v893_v24, %v892_v18  ;;  %v894_v20 = vld [vmem:[#allocation2 + $0xa8] sm:$0xff] }
  0xb5   :  { %v1370_v61 = vsel %vm21_vm0, %v948_v63, %v1207_v59  ;;  %v1211_v15 = vpop.permute.xlu0 %1210 }
  0xb6   :  { %1264 = vrot.lane.b32.xlu1 %v1073_v40, %s7997_s17  ;;  %v433_v40 = vld [vmem:[#allocation2 + $0x22] sm:$0xff]  ;;  %v1463_v55 = vsel %vm814_vm4, %v1370_v61, %v1303_v22 }
  0xb7   :  { %1262 = vrot.lane.b32.xlu0 %v1072_v17, %s7997_s17  ;;  %v430_v17 = vld [vmem:[#allocation2 + $0x2] sm:$0xff]  ;;  %7381 = vmatpush3.bf16.msra.mxu0 %v1967_v62  ;;  %v495_v29 = vpack.c.bf16 %v433_v40, %v432_v13  ;;  %v1213_v37 = vpop.permute.xlu1 %1212 }
  0xb8   :  { %7446 = vmatprep.subr.bf16.mxu0 %v8816_v14  ;;  %7318 = vmatprep.mubr.msk.bf16.mxu0 %vm1535_vm5, %v1463_v55  ;;  %v896_v13 = vld [vmem:[#allocation2 + $0xc0] sm:$0xff]  ;;  %v897_v40 = vld [vmem:[#allocation2 + $0xc8] sm:$0xff] }
  0xba   :  { %1360 = vrot.lane.b32.xlu1 %v1169_v44, %s7996_s16  ;;  %v890_v44 = vld [vmem:[#allocation2 + $0x78] sm:$0xff]  ;;  %7319 = vmatmul.mubr.msk.bf16.gmra.mrb[4].mxu0 %vm1535_vm5, %v1465_v45 }
  0xbb   :  { %1358 = vrot.lane.b32.xlu0 %v1168_v23, %s7996_s16  ;;  %v494_v23 = vpack.c.bf16 %v431_v60, %v430_v17  ;;  %v950_v19 = vpack.c.bf16 %v891_v16, %v890_v44  ;;  %v1309_v63 = vpop.permute.xlu1 %1308  ;;  %v895_v17 = vld [vmem:[#allocation2 + $0xb0] sm:$0xff]  ;;  %v953_v60 = vpack.c.bf16 %v897_v40, %v896_v13  ;;  %v901_v16 = vld [vmem:[#allocation2 + $0xf8] sm:$0xff]  ;;  %v902_v13 = vld [vmem:[#allocation2 + $0x108] sm:$0xff] }
  0xbc   :  { %v952_v45 = vpack.c.bf16 %v895_v17, %v894_v20  ;;  %v900_v44 = vld [vmem:[#allocation2 + $0xf0] sm:$0xff] }
  0xbd   :  { %v1376_v59 = vsel %vm21_vm0, %v950_v19, %v1211_v15 }
  0xbe   :  { %560 = vrot.lane.b32.xlu1 %v8360_v32, %s7997_s17  ;;  %v1379_v32 = vsel %vm21_vm0, %v951_v21, %v1213_v37 }
  0xbf   :  { %558 = vrot.lane.b32.xlu0 %v398_v12, %s7997_s17  ;;  %v1469_v62 = vsel %vm814_vm4, %v1379_v32, %v1309_v63  ;;  %v1307_v12 = vpop.permute.xlu0 %1306  ;;  %v1217_v61 = vpop.permute.xlu1 %1216 }
  0xc0   :  { %v1467_v0 = vsel %vm814_vm4, %v1376_v59, %v1307_v12  ;;  %v904_v59 = vld [vmem:[#allocation2 + $0x120] sm:$0xff] }
  0xc1   :  { %7322 = vmatprep.mubr.msk.bf16.mxu0 %vm1535_vm5, %v1467_v0 }
  0xc2   :  { %656 = vrot.lane.b32.xlu1 %v495_v29, %s7996_s16  ;;  %7323 = vmatmul.mubr.msk.bf16.gmra.mrb[8].mxu0 %vm1535_vm5, %v1469_v62  ;;  %v905_v62 = vld [vmem:[#allocation2 + $0x128] sm:$0xff] }
  0xc3   :  { %654 = vrot.lane.b32.xlu0 %v494_v23, %s7996_s16  ;;  %v1215_v22 = vpop.permute.xlu0 %1214  ;;  %v898_v23 = vld [vmem:[#allocation2 + $0xd8] sm:$0xff] }
  0xc4   :  { %v1382_v24 = vsel %vm21_vm0, %v952_v45, %v1215_v22  ;;  %v908_v45 = vld [vmem:[#allocation2 + $0x150] sm:$0xff]  ;;  %v909_v22 = vld [vmem:[#allocation2 + $0x158] sm:$0xff] }
  0xc6   :  { %564 = vrot.lane.b32.xlu1 %v8375_v42, %s7997_s17  ;;  %v1385_v42 = vsel %vm21_vm0, %v953_v60, %v1217_v61 }
  0xc7   :  { %562 = vrot.lane.b32.xlu0 %v8367_v36, %s7997_s17 }
  0xca   :  { %660 = vrot.lane.b32.xlu1 %v8383_v48, %s7996_s16  ;;  %v899_v48 = vld [vmem:[#allocation2 + $0xe0] sm:$0xff] }
  0xcb   :  { %658 = vrot.lane.b32.xlu0 %v8363_v35, %s7996_s16  ;;  %v955_v35 = vpack.c.bf16 %v901_v16, %v900_v44  ;;  %v954_v37 = vpack.c.bf16 %v899_v48, %v898_v23  ;;  %v912_v23 = vld [vmem:[#allocation2 + $0x180] sm:$0xff]  ;;  %v913_v48 = vld [vmem:[#allocation2 + $0x188] sm:$0xff] }
  0xcc   :  { %v1313_v18 = vpop.permute.xlu1 %1312 }
  0xcd   :  { %v1473_v36 = vsel %vm814_vm4, %v1385_v42, %v1313_v18  ;;  %v1311_v55 = vpop.permute.xlu0 %1310  ;;  %v906_v18 = vld [vmem:[#allocation2 + $0x138] sm:$0xff] }
  0xce   :  { %v1471_v29 = vsel %vm814_vm4, %v1382_v24, %v1311_v55  ;;  %568 = vrot.lane.b32.xlu1 %v8391_v58, %s7997_s17 }
  0xcf   :  { %566 = vrot.lane.b32.xlu0 %v8371_v41, %s7997_s17  ;;  %7326 = vmatprep.mubr.msk.bf16.mxu0 %vm1535_vm5, %v1471_v29 }
  0xd0   :  { %7327 = vmatmul.mubr.msk.bf16.gmra.mrb[12].mxu0 %vm1535_vm5, %v1473_v36  ;;  %v1221_v21 = vpop.permute.xlu1 %1220 }
  0xd1   :  { %v1219_v19 = vpop.permute.xlu0 %1218  ;;  %v1391_v58 = vsel %vm21_vm0, %v955_v35, %v1221_v21  ;;  %v910_v21 = vld [vmem:[#allocation2 + $0x168] sm:$0xff] }
  0xd2   :  { %664 = vrot.lane.b32.xlu1 %v8477_v39, %s7996_s16  ;;  %v1388_v32 = vsel %vm21_vm0, %v954_v37, %v1219_v19  ;;  %v903_v39 = vld [vmem:[#allocation2 + $0x110] sm:$0xff] }
  0xd3   :  { %662 = vrot.lane.b32.xlu0 %v8379_v47, %s7996_s16  ;;  %v957_v47 = vpack.c.bf16 %v905_v62, %v904_v59  ;;  %v956_v0 = vpack.c.bf16 %v903_v39, %v902_v13  ;;  %v916_v62 = vld [vmem:[#allocation2 + $0x1e0] sm:$0xff]  ;;  %v915_v39 = vld [vmem:[#allocation2 + $0x1d0] sm:$0xff] }
  0xd4   :  { %v1317_v15 = vpop.permute.xlu1 %1316 }
  0xd5   :  { %v1477_v41 = vsel %vm814_vm4, %v1391_v58, %v1317_v15  ;;  %v1315_v63 = vpop.permute.xlu0 %1314 }
  0xd6   :  { %v1475_v12 = vsel %vm814_vm4, %v1388_v32, %v1315_v63  ;;  %572 = vrot.lane.b32.xlu1 %v8569_v25, %s7997_s17  ;;  %v454_v32 = vld [vmem:[#allocation2 + $0x122] sm:$0xff] }
  0xd7   :  { %570 = vrot.lane.b32.xlu0 %v8387_v54, %s7997_s17  ;;  %7330 = vmatprep.mubr.msk.bf16.mxu0 %vm1535_vm5, %v1475_v12  ;;  %v917_v12 = vld [vmem:[#allocation2 + $0x1e8] sm:$0xff] }
  0xd8   :  { %7331 = vmatmul.mubr.msk.bf16.gmra.mrb[16].mxu0 %vm1535_vm5, %v1477_v41  ;;  %v1225_v40 = vpop.permute.xlu1 %1224  ;;  %v455_v41 = vld [vmem:[#allocation2 + $0x12a] sm:$0xff] }
  0xd9   :  { %v1223_v20 = vpop.permute.xlu0 %1222  ;;  %v1397_v25 = vsel %vm21_vm0, %v957_v47, %v1225_v40  ;;  %v963_v47 = vpack.c.bf16 %v917_v12, %v916_v62  ;;  %v370_v12 = vld [vmem:[#allocation2 + $0x1e1] sm:$0xff] }
  0xda   :  { %668 = vrot.lane.b32.xlu1 %v8583_v31, %s7996_s16  ;;  %v1394_v60 = vsel %vm21_vm0, %v956_v0, %v1223_v20  ;;  %v907_v31 = vld [vmem:[#allocation2 + $0x140] sm:$0xff]  ;;  %v362_v0 = vld [vmem:[#allocation2 + $0x151] sm:$0xff] }
  0xdb   :  { %666 = vrot.lane.b32.xlu0 %v8452_v30, %s7996_s16  ;;  %v959_v30 = vpack.c.bf16 %v909_v22, %v908_v45  ;;  %v958_v36 = vpack.c.bf16 %v907_v31, %v906_v18  ;;  %v363_v20 = vld [vmem:[#allocation2 + $0x159] sm:$0xff]  ;;  %v920_v18 = vld [vmem:[#allocation2 + $0x210] sm:$0xff] }
  0xdc   :  { %v1321_v17 = vpop.permute.xlu1 %1320  ;;  %v921_v31 = vld [vmem:[#allocation2 + $0x218] sm:$0xff] }
  0xdd   :  { %v1481_v54 = vsel %vm814_vm4, %v1397_v25, %v1321_v17  ;;  %v1319_v61 = vpop.permute.xlu0 %1318 }
  0xde   :  { %v1479_v42 = vsel %vm814_vm4, %v1394_v60, %v1319_v61  ;;  %576 = vrot.lane.b32.xlu1 %v8591_v56, %s7997_s17  ;;  %v459_v61 = vld [vmem:[#allocation2 + $0x15a] sm:$0xff] }
  0xdf   :  { %574 = vrot.lane.b32.xlu0 %v8544_v53, %s7997_s17  ;;  %7334 = vmatprep.mubr.msk.bf16.mxu0 %vm1535_vm5, %v1479_v42 }
  0xe0   :  { %7335 = vmatmul.mubr.msk.bf16.gmra.mrb[20].mxu0 %vm1535_vm5, %v1481_v54  ;;  %v1229_v24 = vpop.permute.xlu1 %1228  ;;  %v458_v54 = vld [vmem:[#allocation2 + $0x152] sm:$0xff] }
  0xe1   :  { %v1227_v55 = vpop.permute.xlu0 %1226  ;;  %v1403_v56 = vsel %vm21_vm0, %v959_v30, %v1229_v24  ;;  %v919_v24 = vld [vmem:[#allocation2 + $0x200] sm:$0xff] }
  0xe2   :  { %672 = vrot.lane.b32.xlu1 %v8599_v52, %s7996_s16  ;;  %v1400_v16 = vsel %vm21_vm0, %v958_v36, %v1227_v55  ;;  %v911_v52 = vld [vmem:[#allocation2 + $0x170] sm:$0xff]  ;;  %v8928_v36 = vpack.c.bf16 %v459_v61, %v458_v54  ;;  %v965_v55 = vpack.c.bf16 %v921_v31, %v920_v18  ;;  %v927_v18 = vld [vmem:[#allocation2 + $0x260] sm:$0xff] }
  0xe3   :  { %670 = vrot.lane.b32.xlu0 %v8579_v50, %s7996_s16  ;;  %v961_v50 = vpack.c.bf16 %v913_v48, %v912_v23  ;;  %v960_v19 = vpack.c.bf16 %v911_v52, %v910_v21  ;;  %v464_v23 = vld [vmem:[#allocation2 + $0x1ca] sm:$0xff]  ;;  %v465_v48 = vld [vmem:[#allocation2 + $0x1d2] sm:$0xff] }
  0xe4   :  { %v1325_v44 = vpop.permute.xlu1 %1324  ;;  %v462_v52 = vld [vmem:[#allocation2 + $0x1b2] sm:$0xff] }
  0xe5   :  { %v1485_v53 = vsel %vm814_vm4, %v1403_v56, %v1325_v44  ;;  %v1323_v29 = vpop.permute.xlu0 %1322  ;;  %v366_v44 = vld [vmem:[#allocation2 + $0x1b1] sm:$0xff] }
  0xe6   :  { %v1483_v35 = vsel %vm814_vm4, %v1400_v16, %v1323_v29  ;;  %580 = vrot.lane.b32.xlu1 %v8607_v51, %s7997_s17  ;;  %v367_v16 = vld [vmem:[#allocation2 + $0x1b9] sm:$0xff]  ;;  %v928_v61 = vld [vmem:[#allocation2 + $0x270] sm:$0xff] }
  0xe7   :  { %578 = vrot.lane.b32.xlu0 %v8587_v57, %s7997_s17  ;;  %7338 = vmatprep.mubr.msk.bf16.mxu0 %vm1535_vm5, %v1483_v35 }
  0xe8   :  { %7339 = vmatmul.mubr.msk.bf16.gmra.mrb[24].mxu0 %vm1535_vm5, %v1485_v53  ;;  %v1233_v37 = vpop.permute.xlu1 %1232 }
  0xe9   :  { %v1231_v58 = vpop.permute.xlu0 %1230  ;;  %v1409_v51 = vsel %vm21_vm0, %v961_v50, %v1233_v37  ;;  %v463_v50 = vld [vmem:[#allocation2 + $0x1ba] sm:$0xff] }
  0xea   :  { %676 = vrot.lane.b32.xlu1 %v8677_v28, %s7996_s16  ;;  %v1406_v57 = vsel %vm21_vm0, %v960_v19, %v1231_v58  ;;  %v914_v28 = vld [vmem:[#allocation2 + $0x1c8] sm:$0xff] }
  0xeb   :  { %674 = vrot.lane.b32.xlu0 %v8595_v49, %s7996_s16  ;;  %v8910_v49 = vpack.c.bf16 %v455_v41, %v454_v32  ;;  %v962_v25 = vpack.c.bf16 %v915_v39, %v914_v28  ;;  %v922_v32 = vld [vmem:[#allocation2 + $0x228] sm:$0xff]  ;;  %v923_v41 = vld [vmem:[#allocation2 + $0x230] sm:$0xff] }
  0xec   :  { %v1329_v15 = vpop.permute.xlu1 %1328  ;;  %v966_v28 = vpack.c.bf16 %v923_v41, %v922_v32  ;;  %v930_v32 = vld [vmem:[#allocation2 + $0x288] sm:$0xff]  ;;  %v931_v41 = vld [vmem:[#allocation2 + $0x290] sm:$0xff] }
  0xed   :  { %v1489_v63 = vsel %vm814_vm4, %v1409_v51, %v1329_v15  ;;  %v1327_v59 = vpop.permute.xlu0 %1326  ;;  %v924_v51 = vld [vmem:[#allocation2 + $0x240] sm:$0xff]  ;;  %v925_v15 = vld [vmem:[#allocation2 + $0x248] sm:$0xff] }
  0xee   :  { %v1487_v13 = vsel %vm814_vm4, %v1406_v57, %v1327_v59  ;;  %584 = vrot.lane.b32.xlu1 %v8713_v34, %s7997_s17  ;;  %v8917_v34 = vpack.c.bf16 %v363_v20, %v362_v0  ;;  %v511_v57 = vpack.c.bf16 %v465_v48, %v464_v23  ;;  %v967_v59 = vpack.c.bf16 %v925_v15, %v924_v51  ;;  %v472_v23 = vld [vmem:[#allocation2 + $0x22a] sm:$0xff]  ;;  %v473_v48 = vld [vmem:[#allocation2 + $0x232] sm:$0xff]  ;;  %v932_v51 = vld [vmem:[#allocation2 + $0x2a0] sm:$0xff] }
  0xef   :  { %582 = vrot.lane.b32.xlu0 %v8603_v46, %s7997_s17  ;;  %7342 = vmatprep.mubr.msk.bf16.mxu0 %vm1535_vm5, %v1487_v13  ;;  %v371_v13 = vld [vmem:[#allocation2 + $0x1e9] sm:$0xff] }
  0xf0   :  { %7343 = vmatmul.mubr.msk.bf16.gmra.mrb[28].mxu0 %vm1535_vm5, %v1489_v63  ;;  %v1237_v40 = vpop.permute.xlu1 %1236  ;;  %v510_v63 = vpack.c.bf16 %v463_v50, %v462_v52  ;;  %v470_v52 = vld [vmem:[#allocation2 + $0x212] sm:$0xff]  ;;  %v471_v50 = vld [vmem:[#allocation2 + $0x21a] sm:$0xff]  ;;  %v933_v15 = vld [vmem:[#allocation2 + $0x2a8] sm:$0xff] }
  0xf1   :  { %v1235_v17 = vpop.permute.xlu0 %1234  ;;  %v1415_v46 = vsel %vm21_vm0, %v963_v47, %v1237_v40  ;;  %v468_v47 = vld [vmem:[#allocation2 + $0x1fa] sm:$0xff]  ;;  %v469_v40 = vld [vmem:[#allocation2 + $0x202] sm:$0xff] }
  0xf2   :  { %680 = vrot.lane.b32.xlu1 %v8721_v38, %s7996_s16  ;;  %v1412_v45 = vsel %vm21_vm0, %v962_v25, %v1235_v17  ;;  %v918_v38 = vld [vmem:[#allocation2 + $0x1f8] sm:$0xff]  ;;  %v466_v25 = vld [vmem:[#allocation2 + $0x1e2] sm:$0xff]  ;;  %v467_v17 = vld [vmem:[#allocation2 + $0x1ea] sm:$0xff]  ;;  %v8954_v31 = vpack.c.bf16 %v469_v40, %v468_v47  ;;  %v970_v47 = vpack.c.bf16 %v931_v41, %v930_v32 }
  0xf3   :  { %678 = vrot.lane.b32.xlu0 %v8910_v49, %s7996_s16  ;;  %v964_v53 = vpack.c.bf16 %v919_v24, %v918_v38  ;;  %v376_v38 = vld [vmem:[#allocation2 + $0x229] sm:$0xff]  ;;  %v377_v24 = vld [vmem:[#allocation2 + $0x231] sm:$0xff]  ;;  %v479_v41 = vld [vmem:[#allocation2 + $0x27a] sm:$0xff] }
  0xf4   :  { %v1333_v60 = vpop.permute.xlu1 %1332  ;;  %v478_v32 = vld [vmem:[#allocation2 + $0x272] sm:$0xff] }
  0xf5   :  { %v1493_v22 = vsel %vm814_vm4, %v1415_v46, %v1333_v60  ;;  %v1331_v42 = vpop.permute.xlu0 %1330 }
  0xf6   :  { %v1491_v30 = vsel %vm814_vm4, %v1412_v45, %v1331_v42  ;;  %588 = vrot.lane.b32.xlu1 %v8726_v43, %s7997_s17  ;;  %v414_v43 = vpack.c.bf16 %v367_v16, %v366_v44  ;;  %v929_v45 = vld [vmem:[#allocation2 + $0x278] sm:$0xff] }
  0xf7   :  { %586 = vrot.lane.b32.xlu0 %v8917_v34, %s7997_s17  ;;  %7346 = vmatprep.mubr.msk.bf16.mxu0 %vm1535_vm5, %v1491_v30  ;;  %v926_v42 = vld [vmem:[#allocation2 + $0x258] sm:$0xff]  ;;  %v8959_v30 = vpack.c.bf16 %v467_v17, %v466_v25  ;;  %v477_v17 = vld [vmem:[#allocation2 + $0x262] sm:$0xff] }
  0xf8   :  { %7347 = vmatmul.mubr.msk.bf16.gmra.mrb[32].mxu0 %vm1535_vm5, %v1493_v22  ;;  %v1241_v56 = vpop.permute.xlu1 %1240  ;;  %v374_v44 = vld [vmem:[#allocation2 + $0x211] sm:$0xff]  ;;  %v375_v16 = vld [vmem:[#allocation2 + $0x219] sm:$0xff] }
  0xf9   :  { %v1239_v29 = vpop.permute.xlu0 %1238  ;;  %v1421_v35 = vsel %vm21_vm0, %v965_v55, %v1241_v56  ;;  %v969_v55 = vpack.c.bf16 %v929_v45, %v928_v61  ;;  %v476_v25 = vld [vmem:[#allocation2 + $0x25a] sm:$0xff]  ;;  %v475_v61 = vld [vmem:[#allocation2 + $0x24a] sm:$0xff] }
  0xfa   :  { %684 = vrot.lane.b32.xlu1 %v8759_v33, %s7996_s16  ;;  %v1418_v37 = vsel %vm21_vm0, %v964_v53, %v1239_v29  ;;  %v8964_v29 = vpack.c.bf16 %v377_v24, %v376_v38  ;;  %v937_v38 = vld [vmem:[#allocation2 + $0x2d8] sm:$0xff] }
  0xfb   :  { %682 = vrot.lane.b32.xlu0 %v8928_v36, %s7996_s16 }
  0xfc   :  { %v1337_v21 = vpop.permute.xlu1 %1336 }
  0xfd   :  { %v1497_v19 = vsel %vm814_vm4, %v1421_v35, %v1337_v21  ;;  %v1335_v58 = vpop.permute.xlu0 %1334 }
  0xfe   :  { %v1495_v33 = vsel %vm814_vm4, %v1418_v37, %v1335_v58  ;;  %592 = vrot.lane.b32.xlu1 %v8764_v27, %s7997_s17  ;;  %v8946_v27 = vpack.c.bf16 %v371_v13, %v370_v12  ;;  %v971_v12 = vpack.c.bf16 %v933_v15, %v932_v51  ;;  %v481_v51 = vld [vmem:[#allocation2 + $0x292] sm:$0xff] }
  0xff   :  { %590 = vrot.lane.b32.xlu0 %v414_v43, %s7997_s17  ;;  %7350 = vmatprep.mubr.msk.bf16.mxu0 %vm1535_vm5, %v1495_v33  ;;  %v8968_v43 = vpack.c.bf16 %v375_v16, %v374_v44  ;;  %v8998_v44 = vpack.c.bf16 %v477_v17, %v476_v25  ;;  %v9025_v17 = vpack.c.bf16 %v479_v41, %v478_v32 }
 0x100   :  { %7351 = vmatmul.mubr.msk.bf16.gmra.mrb[36].mxu0 %vm1535_vm5, %v1497_v19  ;;  %v1245_v62 = vpop.permute.xlu1 %1244 }
 0x101   :  { %v1243_v39 = vpop.permute.xlu0 %1242  ;;  %v1427_v0 = vsel %vm21_vm0, %v967_v59, %v1245_v62  ;;  %v380_v59 = vld [vmem:[#allocation2 + $0x259] sm:$0xff]  ;;  %v381_v62 = vld [vmem:[#allocation2 + $0x261] sm:$0xff] }
 0x102   :  { %688 = vrot.lane.b32.xlu1 %v511_v57, %s7996_s16  ;;  %v1424_v46 = vsel %vm21_vm0, %v966_v28, %v1243_v39  ;;  %v8976_v57 = vpack.c.bf16 %v473_v48, %v472_v23  ;;  %v378_v28 = vld [vmem:[#allocation2 + $0x241] sm:$0xff]  ;;  %v379_v39 = vld [vmem:[#allocation2 + $0x249] sm:$0xff] }
 0x103   :  { %686 = vrot.lane.b32.xlu0 %v510_v63, %s7996_s16  ;;  %v8981_v63 = vpack.c.bf16 %v471_v50, %v470_v52 }
 0x104   :  { %v1341_v20 = vpop.permute.xlu1 %1340 }
 0x105   :  { %v1501_v60 = vsel %vm814_vm4, %v1427_v0, %v1341_v20  ;;  %v1339_v54 = vpop.permute.xlu0 %1338  ;;  %v8986_v0 = vpack.c.bf16 %v381_v62, %v380_v59  ;;  %v8990_v20 = vpack.c.bf16 %v379_v39, %v378_v28  ;;  %v941_v28 = vld [vmem:[#allocation2 + $0x308] sm:$0xff] }
 0x106   :  { %v1499_v22 = vsel %vm814_vm4, %v1424_v46, %v1339_v54  ;;  %596 = vrot.lane.b32.xlu1 %v8771_v26, %s7997_s17  ;;  %v968_v26 = vpack.c.bf16 %v927_v18, %v926_v42  ;;  %v474_v54 = vld [vmem:[#allocation2 + $0x242] sm:$0xff]  ;;  %v936_v18 = vld [vmem:[#allocation2 + $0x2d0] sm:$0xff] }
 0x107   :  { %594 = vrot.lane.b32.xlu0 %v8946_v27, %s7997_s17  ;;  %7354 = vmatprep.mubr.msk.bf16.mxu0 %vm1535_vm5, %v1499_v22  ;;  %v9003_v16 = vpack.c.bf16 %v475_v61, %v474_v54  ;;  %v973_v23 = vpack.c.bf16 %v937_v38, %v936_v18 }
 0x108   :  { %7355 = vmatmul.mubr.msk.bf16.gmra.mrb[40].mxu0 %vm1535_vm5, %v1501_v60  ;;  %v1249_v56 = vpop.permute.xlu1 %1248 }
 0x109   :  { %v1247_v53 = vpop.permute.xlu0 %1246  ;;  %v1433_v35 = vsel %vm21_vm0, %v969_v55, %v1249_v56  ;;  %v934_v55 = vld [vmem:[#allocation2 + $0x2b8] sm:$0xff]  ;;  %v935_v56 = vld [vmem:[#allocation2 + $0x2c0] sm:$0xff] }
 0x10a   :  { %692 = vrot.lane.b32.xlu1 %v8954_v31, %s7996_s16  ;;  %v1430_v37 = vsel %vm21_vm0, %v968_v26, %v1247_v53  ;;  %v384_v26 = vld [vmem:[#allocation2 + $0x289] sm:$0xff]  ;;  %v385_v53 = vld [vmem:[#allocation2 + $0x291] sm:$0xff]  ;;  %v972_v52 = vpack.c.bf16 %v935_v56, %v934_v55  ;;  %v484_v55 = vld [vmem:[#allocation2 + $0x2ba] sm:$0xff] }
 0x10b   :  { %690 = vrot.lane.b32.xlu0 %v8959_v30, %s7996_s16  ;;  %v485_v56 = vld [vmem:[#allocation2 + $0x2c2] sm:$0xff] }
 0x10c   :  { %v1345_v21 = vpop.permute.xlu1 %1344  ;;  %v9042_v32 = vpack.c.bf16 %v485_v56, %v484_v55 }
 0x10d   :  { %v1505_v19 = vsel %vm814_vm4, %v1433_v35, %v1345_v21  ;;  %v1343_v58 = vpop.permute.xlu0 %1342  ;;  %v382_v35 = vld [vmem:[#allocation2 + $0x271] sm:$0xff]  ;;  %v383_v21 = vld [vmem:[#allocation2 + $0x279] sm:$0xff] }
 0x10e   :  { %v1503_v33 = vsel %vm814_vm4, %v1430_v37, %v1343_v58  ;;  %600 = vrot.lane.b32.xlu1 %v8964_v29, %s7997_s17  ;;  %v9008_v37 = vpack.c.bf16 %v385_v53, %v384_v26  ;;  %v480_v58 = vld [vmem:[#allocation2 + $0x28a] sm:$0xff] }
 0x10f   :  { %598 = vrot.lane.b32.xlu0 %v8968_v43, %s7997_s17  ;;  %7358 = vmatprep.mubr.msk.bf16.mxu0 %vm1535_vm5, %v1503_v33  ;;  %v9020_v25 = vpack.c.bf16 %v481_v51, %v480_v58  ;;  %v945_v58 = vld [vmem:[#allocation2 + $0x338] sm:$0xff] }
 0x110   :  { %7359 = vmatmul.mubr.msk.bf16.gmra.mrb[44].mxu0 %vm1535_vm5, %v1505_v19  ;;  %v1253_v13 = vpop.permute.xlu1 %1252  ;;  %v9012_v19 = vpack.c.bf16 %v383_v21, %v382_v35 }
 0x111   :  { %v1251_v40 = vpop.permute.xlu0 %1250  ;;  %v1439_v46 = vsel %vm21_vm0, %v971_v12, %v1253_v13  ;;  %v940_v13 = vld [vmem:[#allocation2 + $0x300] sm:$0xff] }
 0x112   :  { %696 = vrot.lane.b32.xlu1 %v8976_v57, %s7996_s16  ;;  %v1436_v45 = vsel %vm21_vm0, %v970_v47, %v1251_v40  ;;  %v938_v47 = vld [vmem:[#allocation2 + $0x2e8] sm:$0xff]  ;;  %v939_v40 = vld [vmem:[#allocation2 + $0x2f0] sm:$0xff]  ;;  %v975_v54 = vpack.c.bf16 %v941_v28, %v940_v13 }
 0x113   :  { %694 = vrot.lane.b32.xlu0 %v8981_v63, %s7996_s16  ;;  %v390_v28 = vld [vmem:[#allocation2 + $0x2d1] sm:$0xff] }
 0x114   :  { %v1349_v60 = vpop.permute.xlu1 %1348 }
 0x115   :  { %v1509_v22 = vsel %vm814_vm4, %v1439_v46, %v1349_v60  ;;  %v1347_v42 = vpop.permute.xlu0 %1346  ;;  %v388_v46 = vld [vmem:[#allocation2 + $0x2b9] sm:$0xff]  ;;  %v389_v60 = vld [vmem:[#allocation2 + $0x2c1] sm:$0xff] }
 0x116   :  { %v1507_v24 = vsel %vm814_vm4, %v1436_v45, %v1347_v42  ;;  %604 = vrot.lane.b32.xlu1 %v8986_v0, %s7997_s17  ;;  %v386_v45 = vld [vmem:[#allocation2 + $0x2a1] sm:$0xff]  ;;  %v974_v42 = vpack.c.bf16 %v939_v40, %v938_v47  ;;  %v9030_v38 = vpack.c.bf16 %v389_v60, %v388_v46 }
 0x117   :  { %602 = vrot.lane.b32.xlu0 %v8990_v20, %s7997_s17  ;;  %7362 = vmatprep.mubr.msk.bf16.mxu0 %vm1535_vm5, %v1507_v24 }
 0x118   :  { %7363 = vmatmul.mubr.msk.bf16.gmra.mrb[48].mxu0 %vm1535_vm5, %v1509_v22  ;;  %v1257_v48 = vpop.permute.xlu1 %1256  ;;  %v387_v22 = vld [vmem:[#allocation2 + $0x2a9] sm:$0xff] }
 0x119   :  { %v1255_v50 = vpop.permute.xlu0 %1254  ;;  %v1445_v15 = vsel %vm21_vm0, %v973_v23, %v1257_v48  ;;  %v9034_v24 = vpack.c.bf16 %v387_v22, %v386_v45  ;;  %v482_v23 = vld [vmem:[#allocation2 + $0x2a2] sm:$0xff]  ;;  %v483_v48 = vld [vmem:[#allocation2 + $0x2aa] sm:$0xff] }
 0x11a   :  { %700 = vrot.lane.b32.xlu1 %v8998_v44, %s7996_s16  ;;  %v1442_v59 = vsel %vm21_vm0, %v972_v52, %v1255_v50  ;;  %v944_v50 = vld [vmem:[#allocation2 + $0x330] sm:$0xff]  ;;  %v9047_v41 = vpack.c.bf16 %v483_v48, %v482_v23  ;;  %v241_v23 = vld [vmem:[#allocation2 + $0x20] sm:$0xff] }
 0x11b   :  { %698 = vrot.lane.b32.xlu0 %v9003_v16, %s7996_s16 }
 0x11c   :  { %v1353_v33 = vpop.permute.xlu1 %1352 }
 0x11d   :  { %v1513_v62 = vsel %vm814_vm4, %v1445_v15, %v1353_v33  ;;  %v1351_v12 = vpop.permute.xlu0 %1350  ;;  %v942_v15 = vld [vmem:[#allocation2 + $0x318] sm:$0xff]  ;;  %v943_v33 = vld [vmem:[#allocation2 + $0x320] sm:$0xff] }
 0x11e   :  { %v1511_v39 = vsel %vm814_vm4, %v1442_v59, %v1351_v12  ;;  %608 = vrot.lane.b32.xlu1 %v9008_v37, %s7997_s17  ;;  %v392_v59 = vld [vmem:[#allocation2 + $0x2e9] sm:$0xff]  ;;  %v977_v12 = vpack.c.bf16 %v945_v58, %v944_v50  ;;  %v976_v47 = vpack.c.bf16 %v943_v33, %v942_v15  ;;  %v396_v58 = vld [vmem:[#allocation2 + $0x319] sm:$0xff] }
 0x11f   :  { %606 = vrot.lane.b32.xlu0 %v9012_v19, %s7997_s17  ;;  %7366 = vmatprep.mubr.msk.bf16.mxu0 %vm1535_vm5, %v1511_v39  ;;  %v391_v39 = vld [vmem:[#allocation2 + $0x2d9] sm:$0xff] }
 0x120   :  { %7367 = vmatmul.mubr.msk.bf16.gmra.mrb[52].mxu0 %vm1535_vm5, %v1513_v62  ;;  %v1261_v61 = vpop.permute.xlu1 %1260  ;;  %v393_v62 = vld [vmem:[#allocation2 + $0x2f1] sm:$0xff]  ;;  %v9056_v60 = vpack.c.bf16 %v391_v39, %v390_v28 }
 0x121   :  { %v1259_v18 = vpop.permute.xlu0 %1258  ;;  %v1451_v26 = vsel %vm21_vm0, %v975_v54, %v1261_v61  ;;  %v9052_v46 = vpack.c.bf16 %v393_v62, %v392_v59  ;;  %v488_v54 = vld [vmem:[#allocation2 + $0x2ea] sm:$0xff]  ;;  %v489_v61 = vld [vmem:[#allocation2 + $0x2f2] sm:$0xff]  ;;  %v394_v59 = vld [vmem:[#allocation2 + $0x301] sm:$0xff] }
 0x122   :  { %704 = vrot.lane.b32.xlu1 %v9020_v25, %s7996_s16  ;;  %v1448_v35 = vsel %vm21_vm0, %v974_v42, %v1259_v18  ;;  %v486_v42 = vld [vmem:[#allocation2 + $0x2d2] sm:$0xff]  ;;  %v487_v18 = vld [vmem:[#allocation2 + $0x2da] sm:$0xff]  ;;  %v395_v62 = vld [vmem:[#allocation2 + $0x309] sm:$0xff] }
 0x123   :  { %702 = vrot.lane.b32.xlu0 %v9025_v17, %s7996_s16  ;;  %v9069_v50 = vpack.c.bf16 %v487_v18, %v486_v42  ;;  %v9078_v39 = vpack.c.bf16 %v395_v62, %v394_v59  ;;  %v2355_v62 = vld [vmem:[#allocation2 + $0x31] sm:$0xff] }
 0x124   :  { %v1357_v53 = vpop.permute.xlu1 %1356 }
 0x125   :  { %v1517_v21 = vsel %vm814_vm4, %v1451_v26, %v1357_v53  ;;  %v1355_v52 = vpop.permute.xlu0 %1354  ;;  %v240_v53 = vld [vmem:[#allocation2 + $0x18] sm:$0xff] }
 0x126   :  { %v1515_v51 = vsel %vm814_vm4, %v1448_v35, %v1355_v52  ;;  %612 = vrot.lane.b32.xlu1 %v9030_v38, %s7997_s17  ;;  %v238_v35 = vld [vmem:[#allocation2] sm:$0xff]  ;;  %v9064_v52 = vpack.c.bf16 %v489_v61, %v488_v54  ;;  %v303_v33 = vpack.c.bf16 %v241_v23, %v240_v53  ;;  %v242_v23 = vld [vmem:[#allocation2 + $0x30] sm:$0xff] }
 0x127   :  { %610 = vrot.lane.b32.xlu0 %v9034_v24, %s7997_s17  ;;  %7370 = vmatprep.mubr.msk.bf16.mxu0 %vm1535_vm5, %v1515_v51  ;;  %v397_v51 = vld [vmem:[#allocation2 + $0x321] sm:$0xff] }
 0x128   :  { %7371 = vmatmul.mubr.msk.bf16.gmra.mrb[56].mxu0 %vm1535_vm5, %v1517_v21  ;;  %v1265_v13 = vpop.permute.xlu1 %1264  ;;  %v239_v21 = vld [vmem:[#allocation2 + $0x8] sm:$0xff]  ;;  %v9074_v28 = vpack.c.bf16 %v397_v51, %v396_v58 }
 0x129   :  { %v1263_v40 = vpop.permute.xlu0 %1262  ;;  %v1457_v45 = vsel %vm21_vm0, %v977_v12, %v1265_v13  ;;  %v302_v12 = vpack.c.bf16 %v239_v21, %v238_v35  ;;  %v7988_v21 = vld [vmem:[%s10867_s1 + $0x20] ss:$0 sps:$4 sm:$0xff]   ;;  %v2357_v51 = vld [vmem:[#allocation2 + $0x49] sm:$0xff] }
 0x12a   :  { %708 = vrot.lane.b32.xlu1 %v9042_v32, %s7996_s16  ;;  %v1454_v55 = vsel %vm21_vm0, %v976_v47, %v1263_v40  ;;  %v492_v47 = vld [vmem:[#allocation2 + $0x31a] sm:$0xff]  ;;  %v493_v40 = vld [vmem:[#allocation2 + $0x322] sm:$0xff] }
 0x12b   :  { %706 = vrot.lane.b32.xlu0 %v9047_v41, %s7996_s16  ;;  %v9086_v35 = vpack.c.bf16 %v493_v40, %v492_v47 }
 0x12c   :  { %v1361_v22 = vpop.permute.xlu1 %1360 }
 0x12d   :  { %v1521_v56 = vsel %vm814_vm4, %v1457_v45, %v1361_v22  ;;  %v1359_v26 = vpop.permute.xlu0 %1358  ;;  %v490_v45 = vld [vmem:[#allocation2 + $0x302] sm:$0xff]  ;;  %v491_v22 = vld [vmem:[#allocation2 + $0x30a] sm:$0xff] }
 0x12e   :  { %v1519_v48 = vsel %vm814_vm4, %v1454_v55, %v1359_v26  ;;  %616 = vrot.lane.b32.xlu1 %v9052_v46, %s7997_s17  ;;  %v245_v26 = vld [vmem:[#allocation2 + $0x50] sm:$0xff]  ;;  %v9094_v58 = vpack.c.bf16 %v491_v22, %v490_v45 }
 0x12f   :  { %614 = vrot.lane.b32.xlu0 %v9056_v60, %s7997_s17  ;;  %7374 = vmatprep.mubr.msk.bf16.mxu0 %vm1535_vm5, %v1519_v48  ;;  %v243_v48 = vld [vmem:[#allocation2 + $0x38] sm:$0xff]  ;;  %v2453_v45 = vld [vmem:[#allocation2 + $0x4a] sm:$0xff] }
 0x130   :  { %7375 = vmatmul.mubr.msk.bf16.gmra.mrb[60].mxu0 %vm1535_vm5, %v1521_v56  ;;  %v561_v15 = vpop.permute.xlu1 %560  ;;  %v244_v56 = vld [vmem:[#allocation2 + $0x48] sm:$0xff]  ;;  %v2454_v22 = vld [vmem:[#allocation2 + $0x52] sm:$0xff] }
 0x131   :  { %v559_v13 = vpop.permute.xlu0 %558  ;;  %v723_v54 = vsel %vm21_vm0, %v303_v33, %v561_v15  ;;  %v2358_v15 = vld [vmem:[#allocation2 + $0x51] sm:$0xff]  ;;  %v9097_v33 = vpack.c.bf16 %v245_v26, %v244_v56 }
 0x132   :  { %712 = vrot.lane.b32.xlu1 %v9064_v52, %s7996_s16  ;;  %v720_v42 = vsel %vm21_vm0, %v302_v12, %v559_v13  ;;  %v2356_v12 = vld [vmem:[#allocation2 + $0x39] sm:$0xff]  ;;  %v9100_v13 = vpack.c.bf16 %v243_v48, %v242_v23  ;;  %v2420_v40 = vpack.c.bf16 %v2358_v15, %v2357_v51  ;;  %v247_v15 = vld [vmem:[#allocation2 + $0x68] sm:$0xff] }
 0x133   :  { %710 = vrot.lane.b32.xlu0 %v9069_v50, %s7996_s16  ;;  %v248_v23 = vld [vmem:[#allocation2 + $0x78] sm:$0xff]  ;;  %v249_v48 = vld [vmem:[#allocation2 + $0x80] sm:$0xff] }
 0x134   :  { %v657_v61 = vpop.permute.xlu1 %656  ;;  %v246_v51 = vld [vmem:[#allocation2 + $0x60] sm:$0xff] }
 0x135   :  { %v655_v18 = vpop.permute.xlu0 %654  ;;  %v818_v55 = vsel %vm814_vm4, %v723_v54, %v657_v61  ;;  %v2977_v54 = vsel %vm1600_vm3, %v7988_v21, 0  ;;  %v2419_v61 = vpack.c.bf16 %v2356_v12, %v2355_v62  ;;  %v2516_v62 = vpack.c.bf16 %v2454_v22, %v2453_v45  ;;  %v2361_v12 = vld [vmem:[#allocation2 + $0x79] sm:$0xff] }
 0x136   :  { %v816_v53 = vsel %vm814_vm4, %v720_v42, %v655_v18  ;;  %620 = vrot.lane.b32.xlu1 %v9074_v28, %s7997_s17  ;;  %v2451_v18 = vld [vmem:[#allocation2 + $0x32] sm:$0xff]  ;;  %v2457_v22 = vld [vmem:[#allocation2 + $0x7a] sm:$0xff] }
 0x137   :  { %618 = vrot.lane.b32.xlu0 %v9078_v39, %s7997_s17  ;;  %7382 = vmatprep.mubr.msk.bf16.mxu0 %vm1535_vm5, %v816_v53 }
 0x138   :  { %7383 = vmatmul.mubr.msk.bf16.vlgmr.msra.gmra.mrb[0].mxu0 %vm1535_vm5, %v818_v55  ;;  %v565_v59 = vpop.permute.xlu1 %564  ;;  %v2452_v55 = vld [vmem:[#allocation2 + $0x3a] sm:$0xff] }
 0x139   :  { %7447 = vmatpush3.bf16.msra.mxu0 %v8816_v14  ;;  %v563_v47 = vpop.permute.xlu0 %562  ;;  %v729_v14 = vsel %vm21_vm0, %v9097_v33, %v565_v59  ;;  %v2515_v59 = vpack.c.bf16 %v2452_v55, %v2451_v18  ;;  %v2458_v18 = vld [vmem:[#allocation2 + $0x82] sm:$0xff] }
 0x13a   :  { %716 = vrot.lane.b32.xlu1 %v9086_v35, %s7996_s16  ;;  %7976 = vmatprep.subr.msk.bf16.mxu0 %vm1600_vm3, %v7988_v21  ;;  %v726_v56 = vsel %vm21_vm0, %v9100_v13, %v563_v47  ;;  %v2362_v47 = vld [vmem:[#allocation2 + $0x81] sm:$0xff] }
 0x13b   :  { %714 = vrot.lane.b32.xlu0 %v9094_v58, %s7996_s16  ;;  %v2422_v45 = vpack.c.bf16 %v2362_v47, %v2361_v12  ;;  %v2518_v47 = vpack.c.bf16 %v2458_v18, %v2457_v22  ;;  %v2461_v18 = vld [vmem:[#allocation2 + $0xaa] sm:$0xff] }
 0x13c   :  { %v661_v42 = vpop.permute.xlu1 %660 }
 0x13d   :  { %v659_v26 = vpop.permute.xlu0 %658  ;;  %v822_v53 = vsel %vm814_vm4, %v729_v14, %v661_v42  ;;  %7449 = vmatpush3.bf16.msra.mxu0 %v2977_v54  ;;  %v9118_v14 = vpack.c.bf16 %v249_v48, %v248_v23  ;;  %v2359_v54 = vld [vmem:[#allocation2 + $0x61] sm:$0xff]  ;;  %v2456_v23 = vld [vmem:[#allocation2 + $0x6a] sm:$0xff] }
 0x13e   :  { %v820_v21 = vsel %vm814_vm4, %v726_v56, %v659_v26  ;;  %2581 = vrot.lane.b32.xlu1 %v2420_v40, %s7997_s17  ;;  %v9120_v56 = vpack.c.bf16 %v247_v15, %v246_v51  ;;  %v252_v15 = vld [vmem:[#allocation2 + $0xa8] sm:$0xff] }
 0x13f   :  { %2579 = vrot.lane.b32.xlu0 %v2419_v61, %s7997_s17  ;;  %7386 = vmatprep.mubr.msk.bf16.mxu0 %vm1535_vm5, %v820_v21  ;;  %v2421_v61 = vpack.c.bf16 %v2360_v10, %v2359_v54  ;;  %v250_v10 = vld [vmem:[#allocation2 + $0x90] sm:$0xff] }
 0x140   :  { %7387 = vmatmul.mubr.msk.bf16.gmra.mrb[4].mxu0 %vm1535_vm5, %v822_v53  ;;  %v569_v42 = vpop.permute.xlu1 %568  ;;  %v2455_v53 = vld [vmem:[#allocation2 + $0x62] sm:$0xff] }
 0x141   :  { %v567_v40 = vpop.permute.xlu0 %566  ;;  %v735_v55 = vsel %vm21_vm0, %v9118_v14, %v569_v42  ;;  %v2517_v42 = vpack.c.bf16 %v2456_v23, %v2455_v53  ;;  %v2365_v54 = vld [vmem:[#allocation2 + $0xa9] sm:$0xff]  ;;  %v2462_v53 = vld [vmem:[#allocation2 + $0xb2] sm:$0xff] }
 0x142   :  { %2677 = vrot.lane.b32.xlu1 %v2516_v62, %s7996_s16  ;;  %v732_v48 = vsel %vm21_vm0, %v9120_v56, %v567_v40  ;;  %v253_v62 = vld [vmem:[#allocation2 + $0xb0] sm:$0xff]  ;;  %v2424_v22 = vpack.c.bf16 %v2366_v11, %v2365_v54  ;;  %v2520_v54 = vpack.c.bf16 %v2462_v53, %v2461_v18  ;;  %v2465_v53 = vld [vmem:[#allocation2 + $0xda] sm:$0xff] }
 0x143   :  { %2675 = vrot.lane.b32.xlu0 %v2515_v59, %s7996_s16  ;;  %v251_v59 = vld [vmem:[#allocation2 + $0x98] sm:$0xff]  ;;  %v9134_v40 = vpack.c.bf16 %v253_v62, %v252_v15 }
 0x144   :  { %v665_v26 = vpop.permute.xlu1 %664  ;;  %v2460_v15 = vld [vmem:[#allocation2 + $0x9a] sm:$0xff] }
 0x145   :  { %v663_v21 = vpop.permute.xlu0 %662  ;;  %v826_v51 = vsel %vm814_vm4, %v735_v55, %v665_v26  ;;  %v2363_v26 = vld [vmem:[#allocation2 + $0x91] sm:$0xff] }
 0x146   :  { %v824_v12 = vsel %vm814_vm4, %v732_v48, %v663_v21  ;;  %2585 = vrot.lane.b32.xlu1 %v2422_v45, %s7997_s17  ;;  %v9136_v48 = vpack.c.bf16 %v251_v59, %v250_v10  ;;  %v256_v59 = vld [vmem:[#allocation2 + $0xd8] sm:$0xff] }
 0x147   :  { %2583 = vrot.lane.b32.xlu0 %v2421_v61, %s7997_s17  ;;  %7390 = vmatprep.mubr.msk.bf16.mxu0 %vm1535_vm5, %v824_v12  ;;  %v2423_v61 = vpack.c.bf16 %v2364_v9, %v2363_v26  ;;  %v254_v9 = vld [vmem:[#allocation2 + $0xc0] sm:$0xff] }
 0x148   :  { %7391 = vmatmul.mubr.msk.bf16.gmra.mrb[8].mxu0 %vm1535_vm5, %v826_v51  ;;  %v573_v55 = vpop.permute.xlu1 %572  ;;  %v2459_v51 = vld [vmem:[#allocation2 + $0x92] sm:$0xff] }
 0x149   :  { %v571_v45 = vpop.permute.xlu0 %570  ;;  %v741_v23 = vsel %vm21_vm0, %v9134_v40, %v573_v55  ;;  %v2519_v55 = vpack.c.bf16 %v2460_v15, %v2459_v51  ;;  %v2369_v26 = vld [vmem:[#allocation2 + $0xd9] sm:$0xff]  ;;  %v2466_v51 = vld [vmem:[#allocation2 + $0xe2] sm:$0xff] }
 0x14a   :  { %2681 = vrot.lane.b32.xlu1 %v2518_v47, %s7996_s16  ;;  %v738_v62 = vsel %vm21_vm0, %v9136_v48, %v571_v45  ;;  %v257_v47 = vld [vmem:[#allocation2 + $0xe0] sm:$0xff]  ;;  %v2426_v18 = vpack.c.bf16 %v2370_v8, %v2369_v26  ;;  %v2522_v26 = vpack.c.bf16 %v2466_v51, %v2465_v53  ;;  %v2469_v51 = vld [vmem:[#allocation2 + $0x10a] sm:$0xff] }
 0x14b   :  { %2679 = vrot.lane.b32.xlu0 %v2517_v42, %s7996_s16  ;;  %v255_v42 = vld [vmem:[#allocation2 + $0xc8] sm:$0xff]  ;;  %v9150_v45 = vpack.c.bf16 %v257_v47, %v256_v59 }
 0x14c   :  { %v669_v21 = vpop.permute.xlu1 %668  ;;  %v2464_v59 = vld [vmem:[#allocation2 + $0xca] sm:$0xff] }
 0x14d   :  { %v667_v12 = vpop.permute.xlu0 %666  ;;  %v830_v10 = vsel %vm814_vm4, %v741_v23, %v669_v21  ;;  %v2367_v21 = vld [vmem:[#allocation2 + $0xc1] sm:$0xff] }
 0x14e   :  { %v828_v11 = vsel %vm814_vm4, %v738_v62, %v667_v12  ;;  %2589 = vrot.lane.b32.xlu1 %v2424_v22, %s7997_s17  ;;  %v9152_v62 = vpack.c.bf16 %v255_v42, %v254_v9  ;;  %v260_v42 = vld [vmem:[#allocation2 + $0x108] sm:$0xff] }
 0x14f   :  { %2587 = vrot.lane.b32.xlu0 %v2423_v61, %s7997_s17  ;;  %7394 = vmatprep.mubr.msk.bf16.mxu0 %vm1535_vm5, %v828_v11  ;;  %v2425_v61 = vpack.c.bf16 %v2368_v6, %v2367_v21  ;;  %v258_v6 = vld [vmem:[#allocation2 + $0xf0] sm:$0xff] }
 0x150   :  { %7395 = vmatmul.mubr.msk.bf16.gmra.mrb[12].mxu0 %vm1535_vm5, %v830_v10  ;;  %v577_v23 = vpop.permute.xlu1 %576  ;;  %v2463_v10 = vld [vmem:[#allocation2 + $0xc2] sm:$0xff] }
 0x151   :  { %v575_v22 = vpop.permute.xlu0 %574  ;;  %v747_v15 = vsel %vm21_vm0, %v9150_v45, %v577_v23  ;;  %v2521_v23 = vpack.c.bf16 %v2464_v59, %v2463_v10  ;;  %v2373_v21 = vld [vmem:[#allocation2 + $0x109] sm:$0xff]  ;;  %v2470_v10 = vld [vmem:[#allocation2 + $0x112] sm:$0xff] }
 0x152   :  { %2685 = vrot.lane.b32.xlu1 %v2520_v54, %s7996_s16  ;;  %v744_v47 = vsel %vm21_vm0, %v9152_v62, %v575_v22  ;;  %v261_v54 = vld [vmem:[#allocation2 + $0x110] sm:$0xff]  ;;  %v2428_v53 = vpack.c.bf16 %v2374_v7, %v2373_v21  ;;  %v2524_v21 = vpack.c.bf16 %v2470_v10, %v2469_v51  ;;  %v2473_v10 = vld [vmem:[#allocation2 + $0x13a] sm:$0xff] }
 0x153   :  { %2683 = vrot.lane.b32.xlu0 %v2519_v55, %s7996_s16  ;;  %v259_v55 = vld [vmem:[#allocation2 + $0xf8] sm:$0xff]  ;;  %v9166_v22 = vpack.c.bf16 %v261_v54, %v260_v42 }
 0x154   :  { %v673_v12 = vpop.permute.xlu1 %672  ;;  %v2468_v42 = vld [vmem:[#allocation2 + $0xfa] sm:$0xff] }
 0x155   :  { %v671_v11 = vpop.permute.xlu0 %670  ;;  %v834_v9 = vsel %vm814_vm4, %v747_v15, %v673_v12  ;;  %v2371_v12 = vld [vmem:[#allocation2 + $0xf1] sm:$0xff] }
 0x156   :  { %v832_v8 = vsel %vm814_vm4, %v744_v47, %v671_v11  ;;  %2593 = vrot.lane.b32.xlu1 %v2426_v18, %s7997_s17  ;;  %v9168_v47 = vpack.c.bf16 %v259_v55, %v258_v6  ;;  %v264_v55 = vld [vmem:[#allocation2 + $0x138] sm:$0xff] }
 0x157   :  { %2591 = vrot.lane.b32.xlu0 %v2425_v61, %s7997_s17  ;;  %7398 = vmatprep.mubr.msk.bf16.mxu0 %vm1535_vm5, %v832_v8  ;;  %v2427_v61 = vpack.c.bf16 %v2372_v5, %v2371_v12  ;;  %v262_v5 = vld [vmem:[#allocation2 + $0x120] sm:$0xff] }
 0x158   :  { %7399 = vmatmul.mubr.msk.bf16.gmra.mrb[16].mxu0 %vm1535_vm5, %v834_v9  ;;  %v581_v15 = vpop.permute.xlu1 %580  ;;  %v2467_v9 = vld [vmem:[#allocation2 + $0xf2] sm:$0xff] }
 0x159   :  { %v579_v18 = vpop.permute.xlu0 %578  ;;  %v753_v59 = vsel %vm21_vm0, %v9166_v22, %v581_v15  ;;  %v2523_v15 = vpack.c.bf16 %v2468_v42, %v2467_v9  ;;  %v2377_v12 = vld [vmem:[#allocation2 + $0x139] sm:$0xff]  ;;  %v2474_v9 = vld [vmem:[#allocation2 + $0x142] sm:$0xff] }
 0x15a   :  { %2689 = vrot.lane.b32.xlu1 %v2522_v26, %s7996_s16  ;;  %v750_v54 = vsel %vm21_vm0, %v9168_v47, %v579_v18  ;;  %v265_v26 = vld [vmem:[#allocation2 + $0x140] sm:$0xff]  ;;  %v2430_v51 = vpack.c.bf16 %v2378_v2, %v2377_v12  ;;  %v266_v2 = vld [vmem:[#allocation2 + $0x150] sm:$0xff] }
 0x15b   :  { %2687 = vrot.lane.b32.xlu0 %v2521_v23, %s7996_s16  ;;  %v263_v23 = vld [vmem:[#allocation2 + $0x128] sm:$0xff]  ;;  %v9182_v18 = vpack.c.bf16 %v265_v26, %v264_v55  ;;  %v2382_v12 = vld [vmem:[#allocation2 + $0x171] sm:$0xff] }
 0x15c   :  { %v677_v11 = vpop.permute.xlu1 %676 }
 0x15d   :  { %v675_v8 = vpop.permute.xlu0 %674  ;;  %v838_v6 = vsel %vm814_vm4, %v753_v59, %v677_v11  ;;  %v2375_v11 = vld [vmem:[#allocation2 + $0x121] sm:$0xff] }
 0x15e   :  { %v836_v7 = vsel %vm814_vm4, %v750_v54, %v675_v8  ;;  %2597 = vrot.lane.b32.xlu1 %v2428_v53, %s7997_s17  ;;  %v9184_v54 = vpack.c.bf16 %v263_v23, %v262_v5  ;;  %v269_v5 = vld [vmem:[#allocation2 + $0x170] sm:$0xff] }
 0x15f   :  { %2595 = vrot.lane.b32.xlu0 %v2427_v61, %s7997_s17  ;;  %7402 = vmatprep.mubr.msk.bf16.mxu0 %vm1535_vm5, %v836_v7  ;;  %v2429_v61 = vpack.c.bf16 %v2376_v4, %v2375_v11  ;;  %v268_v7 = vld [vmem:[#allocation2 + $0x168] sm:$0xff]  ;;  %v267_v4 = vld [vmem:[#allocation2 + $0x158] sm:$0xff] }
 0x160   :  { %7403 = vmatmul.mubr.msk.bf16.gmra.mrb[20].mxu0 %vm1535_vm5, %v838_v6  ;;  %v585_v59 = vpop.permute.xlu1 %584 }
 0x161   :  { %v583_v53 = vpop.permute.xlu0 %582  ;;  %v759_v42 = vsel %vm21_vm0, %v9182_v18, %v585_v59  ;;  %v9198_v59 = vpack.c.bf16 %v269_v5, %v268_v7  ;;  %v272_v7 = vld [vmem:[#allocation2 + $0x1c8] sm:$0xff]  ;;  %v273_v5 = vld [vmem:[#allocation2 + $0x1d0] sm:$0xff] }
 0x162   :  { %2693 = vrot.lane.b32.xlu1 %v2524_v21, %s7996_s16  ;;  %v756_v6 = vsel %vm21_vm0, %v9184_v54, %v583_v53  ;;  %v2526_v21 = vpack.c.bf16 %v2474_v9, %v2473_v10  ;;  %v9200_v53 = vpack.c.bf16 %v267_v4, %v266_v2  ;;  %v2477_v10 = vld [vmem:[#allocation2 + $0x16a] sm:$0xff] }
 0x163   :  { %2691 = vrot.lane.b32.xlu0 %v2523_v15, %s7996_s16  ;;  %v2381_v15 = vld [vmem:[#allocation2 + $0x169] sm:$0xff] }
 0x164   :  { %v681_v8 = vpop.permute.xlu1 %680  ;;  %v270_v2 = vld [vmem:[#allocation2 + $0x1b0] sm:$0xff] }
 0x165   :  { %v679_v55 = vpop.permute.xlu0 %678  ;;  %v842_v26 = vsel %vm814_vm4, %v759_v42, %v681_v8 }
 0x166   :  { %v840_v23 = vsel %vm814_vm4, %v756_v6, %v679_v55  ;;  %2601 = vrot.lane.b32.xlu1 %v2430_v51, %s7997_s17  ;;  %v2432_v51 = vpack.c.bf16 %v2382_v12, %v2381_v15  ;;  %v2386_v15 = vld [vmem:[#allocation2 + $0x1a1] sm:$0xff]  ;;  %v319_v12 = vpack.c.bf16 %v273_v5, %v272_v7 }
 0x167   :  { %2599 = vrot.lane.b32.xlu0 %v2429_v61, %s7997_s17  ;;  %7406 = vmatprep.mubr.msk.bf16.mxu0 %vm1535_vm5, %v840_v23  ;;  %v2478_v61 = vld [vmem:[#allocation2 + $0x172] sm:$0xff] }
 0x168   :  { %7407 = vmatmul.mubr.msk.bf16.gmra.mrb[24].mxu0 %vm1535_vm5, %v842_v26  ;;  %v589_v11 = vpop.permute.xlu1 %588  ;;  %v2528_v4 = vpack.c.bf16 %v2478_v61, %v2477_v10  ;;  %v2482_v61 = vld [vmem:[#allocation2 + $0x1a2] sm:$0xff] }
 0x169   :  { %v587_v42 = vpop.permute.xlu0 %586  ;;  %v765_v9 = vsel %vm21_vm0, %v9198_v59, %v589_v11 }
 0x16a   :  { %2697 = vrot.lane.b32.xlu1 %v2526_v21, %s7996_s16  ;;  %v762_v6 = vsel %vm21_vm0, %v9200_v53, %v587_v42  ;;  %v2385_v21 = vld [vmem:[#allocation2 + $0x199] sm:$0xff]  ;;  %v2383_v42 = vld [vmem:[#allocation2 + $0x181] sm:$0xff] }
 0x16b   :  { %2695 = vrot.lane.b32.xlu0 %v8910_v49, %s7996_s16  ;;  %v271_v49 = vld [vmem:[#allocation2 + $0x1b8] sm:$0xff] }
 0x16c   :  { %v685_v8 = vpop.permute.xlu1 %684 }
 0x16d   :  { %v683_v55 = vpop.permute.xlu0 %682  ;;  %v846_v26 = vsel %vm814_vm4, %v765_v9, %v685_v8  ;;  %v2384_v9 = vld [vmem:[#allocation2 + $0x189] sm:$0xff]  ;;  %v318_v8 = vpack.c.bf16 %v271_v49, %v270_v2  ;;  %v276_v49 = vld [vmem:[#allocation2 + $0x1f8] sm:$0xff] }
 0x16e   :  { %v844_v23 = vsel %vm814_vm4, %v762_v6, %v683_v55  ;;  %2605 = vrot.lane.b32.xlu1 %v2432_v51, %s7997_s17  ;;  %v2434_v51 = vpack.c.bf16 %v2386_v15, %v2385_v21  ;;  %v2433_v10 = vpack.c.bf16 %v2384_v9, %v2383_v42  ;;  %v275_v21 = vld [vmem:[#allocation2 + $0x1e8] sm:$0xff]  ;;  %v9227_v9 = vpack.c.bf16 %v277_v3, %v276_v49 }
 0x16f   :  { %2603 = vrot.lane.b32.xlu0 %v8917_v34, %s7997_s17  ;;  %7410 = vmatprep.mubr.msk.bf16.mxu0 %vm1535_vm5, %v844_v23  ;;  %v2481_v34 = vld [vmem:[#allocation2 + $0x19a] sm:$0xff] }
 0x170   :  { %7411 = vmatmul.mubr.msk.bf16.gmra.mrb[28].mxu0 %vm1535_vm5, %v846_v26  ;;  %v593_v11 = vpop.permute.xlu1 %592  ;;  %v2480_v26 = vld [vmem:[#allocation2 + $0x18a] sm:$0xff]  ;;  %v2530_v15 = vpack.c.bf16 %v2482_v61, %v2481_v34  ;;  %v2390_v42 = vld [vmem:[#allocation2 + $0x201] sm:$0xff] }
 0x171   :  { %v591_v6 = vpop.permute.xlu0 %590  ;;  %v771_v55 = vsel %vm21_vm0, %v319_v12, %v593_v11  ;;  %v2529_v12 = vpack.c.bf16 %v2480_v26, %v2479_v1  ;;  %v2389_v11 = vld [vmem:[#allocation2 + $0x1f9] sm:$0xff]  ;;  %v281_v26 = vld [vmem:[#allocation2 + $0x230] sm:$0xff] }
 0x172   :  { %2701 = vrot.lane.b32.xlu1 %v2528_v4, %s7996_s16  ;;  %v768_v7 = vsel %vm21_vm0, %v318_v8, %v591_v6 }
 0x173   :  { %2699 = vrot.lane.b32.xlu0 %v8928_v36, %s7996_s16  ;;  %v274_v36 = vld [vmem:[#allocation2 + $0x1e0] sm:$0xff] }
 0x174   :  { %v689_v23 = vpop.permute.xlu1 %688  ;;  %v9229_v6 = vpack.c.bf16 %v275_v21, %v274_v36 }
 0x175   :  { %v687_v5 = vpop.permute.xlu0 %686  ;;  %v850_v2 = vsel %vm814_vm4, %v771_v55, %v689_v23  ;;  %v280_v23 = vld [vmem:[#allocation2 + $0x228] sm:$0xff] }
 0x176   :  { %v848_v4 = vsel %vm814_vm4, %v768_v7, %v687_v5  ;;  %2609 = vrot.lane.b32.xlu1 %v2434_v51, %s7997_s17  ;;  %v2436_v51 = vpack.c.bf16 %v2390_v42, %v2389_v11  ;;  %v278_v5 = vld [vmem:[#allocation2 + $0x210] sm:$0xff]  ;;  %v9244_v49 = vpack.c.bf16 %v281_v26, %v280_v23 }
 0x177   :  { %2607 = vrot.lane.b32.xlu0 %v2433_v10, %s7997_s17  ;;  %7414 = vmatprep.mubr.msk.bf16.mxu0 %vm1535_vm5, %v848_v4 }
 0x178   :  { %7415 = vmatmul.mubr.msk.bf16.gmra.mrb[32].mxu0 %vm1535_vm5, %v850_v2  ;;  %v597_v8 = vpop.permute.xlu1 %596  ;;  %v279_v2 = vld [vmem:[#allocation2 + $0x218] sm:$0xff] }
 0x179   :  { %v595_v55 = vpop.permute.xlu0 %594  ;;  %v777_v10 = vsel %vm21_vm0, %v9227_v9, %v597_v8  ;;  %v9246_v36 = vpack.c.bf16 %v279_v2, %v278_v5  ;;  %v284_v8 = vld [vmem:[#allocation2 + $0x258] sm:$0xff]  ;;  %v289_v5 = vld [vmem:[#allocation2 + $0x290] sm:$0xff] }
 0x17a   :  { %2705 = vrot.lane.b32.xlu1 %v2530_v15, %s7996_s16  ;;  %v774_v1 = vsel %vm21_vm0, %v9229_v6, %v595_v55  ;;  %v285_v55 = vld [vmem:[#allocation2 + $0x260] sm:$0xff] }
 0x17b   :  { %2703 = vrot.lane.b32.xlu0 %v2529_v12, %s7996_s16 }
 0x17c   :  { %v693_v34 = vpop.permute.xlu1 %692 }
 0x17d   :  { %v691_v61 = vpop.permute.xlu0 %690  ;;  %v854_v3 = vsel %vm814_vm4, %v777_v10, %v693_v34  ;;  %v283_v10 = vld [vmem:[#allocation2 + $0x248] sm:$0xff] }
 0x17e   :  { %v852_v7 = vsel %vm814_vm4, %v774_v1, %v691_v61  ;;  %2613 = vrot.lane.b32.xlu1 %v2436_v51, %s7997_s17 }
 0x17f   :  { %2611 = vrot.lane.b32.xlu0 %v8946_v27, %s7997_s17  ;;  %7418 = vmatprep.mubr.msk.bf16.mxu0 %vm1535_vm5, %v852_v7  ;;  %v288_v7 = vld [vmem:[#allocation2 + $0x288] sm:$0xff] }
 0x180   :  { %7419 = vmatmul.mubr.msk.bf16.gmra.mrb[36].mxu0 %vm1535_vm5, %v854_v3  ;;  %v601_v4 = vpop.permute.xlu1 %600 }
 0x181   :  { %v599_v21 = vpop.permute.xlu0 %598  ;;  %v783_v15 = vsel %vm21_vm0, %v9244_v49, %v601_v4  ;;  %v287_v4 = vld [vmem:[#allocation2 + $0x278] sm:$0xff] }
 0x182   :  { %2709 = vrot.lane.b32.xlu1 %v8954_v31, %s7996_s16  ;;  %v780_v12 = vsel %vm21_vm0, %v9246_v36, %v599_v21  ;;  %v282_v31 = vld [vmem:[#allocation2 + $0x240] sm:$0xff] }
 0x183   :  { %2707 = vrot.lane.b32.xlu0 %v8959_v30, %s7996_s16  ;;  %v9264_v30 = vpack.c.bf16 %v285_v55, %v284_v8  ;;  %v9266_v1 = vpack.c.bf16 %v283_v10, %v282_v31  ;;  %v292_v8 = vld [vmem:[#allocation2 + $0x2b8] sm:$0xff]  ;;  %v293_v55 = vld [vmem:[#allocation2 + $0x2c0] sm:$0xff]  ;;  %v291_v31 = vld [vmem:[#allocation2 + $0x2a8] sm:$0xff] }
 0x184   :  { %v697_v27 = vpop.permute.xlu1 %696 }
 0x185   :  { %v695_v11 = vpop.permute.xlu0 %694  ;;  %v858_v42 = vsel %vm814_vm4, %v783_v15, %v697_v27 }
 0x186   :  { %v856_v51 = vsel %vm814_vm4, %v780_v12, %v695_v11  ;;  %2617 = vrot.lane.b32.xlu1 %v8964_v29, %s7997_s17 }
 0x187   :  { %2615 = vrot.lane.b32.xlu0 %v8968_v43, %s7997_s17  ;;  %7422 = vmatprep.mubr.msk.bf16.mxu0 %vm1535_vm5, %v856_v51 }
 0x188   :  { %7423 = vmatmul.mubr.msk.bf16.gmra.mrb[40].mxu0 %vm1535_vm5, %v858_v42  ;;  %v605_v34 = vpop.permute.xlu1 %604 }
 0x189   :  { %v603_v61 = vpop.permute.xlu0 %602  ;;  %v789_v29 = vsel %vm21_vm0, %v9264_v30, %v605_v34 }
 0x18a   :  { %2713 = vrot.lane.b32.xlu1 %v8976_v57, %s7996_s16  ;;  %v786_v3 = vsel %vm21_vm0, %v9266_v1, %v603_v61  ;;  %v286_v57 = vld [vmem:[#allocation2 + $0x270] sm:$0xff] }
 0x18b   :  { %2711 = vrot.lane.b32.xlu0 %v8981_v63, %s7996_s16  ;;  %v9284_v63 = vpack.c.bf16 %v289_v5, %v288_v7  ;;  %v9286_v15 = vpack.c.bf16 %v287_v4, %v286_v57  ;;  %v295_v5 = vld [vmem:[#allocation2 + $0x2d8] sm:$0xff] }
 0x18c   :  { %v701_v43 = vpop.permute.xlu1 %700 }
 0x18d   :  { %v699_v23 = vpop.permute.xlu0 %698  ;;  %v862_v26 = vsel %vm814_vm4, %v789_v29, %v701_v43 }
 0x18e   :  { %v860_v2 = vsel %vm814_vm4, %v786_v3, %v699_v23  ;;  %2621 = vrot.lane.b32.xlu1 %v8986_v0, %s7997_s17  ;;  %v296_v23 = vld [vmem:[#allocation2 + $0x2e8] sm:$0xff] }
 0x18f   :  { %2619 = vrot.lane.b32.xlu0 %v8990_v20, %s7997_s17  ;;  %7426 = vmatprep.mubr.msk.bf16.mxu0 %vm1535_vm5, %v860_v2 }
 0x190   :  { %7427 = vmatmul.mubr.msk.bf16.gmra.mrb[44].mxu0 %vm1535_vm5, %v862_v26  ;;  %v609_v21 = vpop.permute.xlu1 %608  ;;  %v297_v26 = vld [vmem:[#allocation2 + $0x2f0] sm:$0xff] }
 0x191   :  { %v607_v27 = vpop.permute.xlu0 %606  ;;  %v795_v0 = vsel %vm21_vm0, %v9284_v63, %v609_v21 }
 0x192   :  { %2717 = vrot.lane.b32.xlu1 %v8998_v44, %s7996_s16  ;;  %v792_v12 = vsel %vm21_vm0, %v9286_v15, %v607_v27  ;;  %v290_v44 = vld [vmem:[#allocation2 + $0x2a0] sm:$0xff] }
 0x193   :  { %2715 = vrot.lane.b32.xlu0 %v9003_v16, %s7996_s16  ;;  %v9304_v16 = vpack.c.bf16 %v293_v55, %v292_v8  ;;  %v9306_v34 = vpack.c.bf16 %v291_v31, %v290_v44 }
 0x194   :  { %v705_v20 = vpop.permute.xlu1 %704 }
 0x195   :  { %v703_v11 = vpop.permute.xlu0 %702  ;;  %v866_v42 = vsel %vm814_vm4, %v795_v0, %v705_v20  ;;  %v300_v20 = vld [vmem:[#allocation2 + $0x318] sm:$0xff] }
 0x196   :  { %v864_v51 = vsel %vm814_vm4, %v792_v12, %v703_v11  ;;  %2625 = vrot.lane.b32.xlu1 %v9008_v37, %s7997_s17  ;;  %v301_v12 = vld [vmem:[#allocation2 + $0x320] sm:$0xff] }
 0x197   :  { %2623 = vrot.lane.b32.xlu0 %v9012_v19, %s7997_s17  ;;  %7430 = vmatprep.mubr.msk.bf16.mxu0 %vm1535_vm5, %v864_v51 }
 0x198   :  { %7431 = vmatmul.mubr.msk.bf16.gmra.mrb[48].mxu0 %vm1535_vm5, %v866_v42  ;;  %v613_v10 = vpop.permute.xlu1 %612  ;;  %v299_v42 = vld [vmem:[#allocation2 + $0x308] sm:$0xff] }
 0x199   :  { %v611_v61 = vpop.permute.xlu0 %610  ;;  %v801_v37 = vsel %vm21_vm0, %v9304_v16, %v613_v10 }
 0x19a   :  { %2721 = vrot.lane.b32.xlu1 %v9020_v25, %s7996_s16  ;;  %v798_v29 = vsel %vm21_vm0, %v9306_v34, %v611_v61  ;;  %v294_v25 = vld [vmem:[#allocation2 + $0x2d0] sm:$0xff] }
 0x19b   :  { %2719 = vrot.lane.b32.xlu0 %v9025_v17, %s7996_s16  ;;  %v9324_v17 = vpack.c.bf16 %v297_v26, %v296_v23  ;;  %v9326_v57 = vpack.c.bf16 %v295_v5, %v294_v25  ;;  %v2513_v23 = vld [vmem:[#allocation2 + $0x34a] sm:$0xff]  ;;  %v2511_v25 = vld [vmem:[#allocation2 + $0x332] sm:$0xff]  ;;  %v2512_v5 = vld [vmem:[#allocation2 + $0x33a] sm:$0xff] }
 0x19c   :  { %v709_v19 = vpop.permute.xlu1 %708 }
 0x19d   :  { %v707_v43 = vpop.permute.xlu0 %706  ;;  %v870_v3 = vsel %vm814_vm4, %v801_v37, %v709_v19  ;;  %v2415_v19 = vld [vmem:[#allocation2 + $0x331] sm:$0xff] }
 0x19e   :  { %v868_v7 = vsel %vm814_vm4, %v798_v29, %v707_v43  ;;  %2629 = vrot.lane.b32.xlu1 %v9030_v38, %s7997_s17  ;;  %v2416_v29 = vld [vmem:[#allocation2 + $0x339] sm:$0xff] }
 0x19f   :  { %2627 = vrot.lane.b32.xlu0 %v9034_v24, %s7997_s17  ;;  %7434 = vmatprep.mubr.msk.bf16.mxu0 %vm1535_vm5, %v868_v7 }
 0x1a0   :  { %7435 = vmatmul.mubr.msk.bf16.gmra.mrb[52].mxu0 %vm1535_vm5, %v870_v3  ;;  %v617_v2 = vpop.permute.xlu1 %616 }
 0x1a1   :  { %v615_v4 = vpop.permute.xlu0 %614  ;;  %v807_v38 = vsel %vm21_vm0, %v9324_v17, %v617_v2 }
 0x1a2   :  { %2725 = vrot.lane.b32.xlu1 %v9042_v32, %s7996_s16  ;;  %v804_v21 = vsel %vm21_vm0, %v9326_v57, %v615_v4  ;;  %v298_v32 = vld [vmem:[#allocation2 + $0x300] sm:$0xff] }
 0x1a3   :  { %2723 = vrot.lane.b32.xlu0 %v9047_v41, %s7996_s16  ;;  %v9344_v41 = vpack.c.bf16 %v301_v12, %v300_v20  ;;  %v9346_v55 = vpack.c.bf16 %v299_v42, %v298_v32 }
 0x1a4   :  { %v713_v24 = vpop.permute.xlu1 %712 }
 0x1a5   :  { %v711_v27 = vpop.permute.xlu0 %710  ;;  %v874_v0 = vsel %vm814_vm4, %v807_v38, %v713_v24  ;;  %v2545_v24 = vpack.c.bf16 %v2512_v5, %v2511_v25 }
 0x1a6   :  { %v872_v11 = vsel %vm814_vm4, %v804_v21, %v711_v27  ;;  %2633 = vrot.lane.b32.xlu1 %v9052_v46, %s7997_s17 }
 0x1a7   :  { %2631 = vrot.lane.b32.xlu0 %v9056_v60, %s7997_s17  ;;  %7438 = vmatprep.mubr.msk.bf16.mxu0 %vm1535_vm5, %v872_v11 }
 0x1a8   :  { %7439 = vmatmul.mubr.msk.bf16.gmra.mrb[56].mxu0 %vm1535_vm5, %v874_v0  ;;  %v621_v8 = vpop.permute.xlu1 %620 }
 0x1a9   :  { %v619_v51 = vpop.permute.xlu0 %618  ;;  %v813_v46 = vsel %vm21_vm0, %v9344_v41, %v621_v8 }
 0x1aa   :  { %2729 = vrot.lane.b32.xlu1 %v9064_v52, %s7996_s16  ;;  %v810_v44 = vsel %vm21_vm0, %v9346_v55, %v619_v51  ;;  %v2417_v52 = vld [vmem:[#allocation2 + $0x349] sm:$0xff] }
 0x1ab   :  { %2727 = vrot.lane.b32.xlu0 %v9069_v50, %s7996_s16  ;;  %v2418_v50 = vld [vmem:[#allocation2 + $0x351] sm:$0xff] }
 0x1ac   :  { %v717_v60 = vpop.permute.xlu1 %716  ;;  %v2450_v3 = vpack.c.bf16 %v2418_v50, %v2417_v52 }
 0x1ad   :  { %v715_v31 = vpop.permute.xlu0 %714  ;;  %v878_v10 = vsel %vm814_vm4, %v813_v46, %v717_v60 }
 0x1ae   :  { %v876_v61 = vsel %vm814_vm4, %v810_v44, %v715_v31  ;;  %2637 = vrot.lane.b32.xlu1 %v9074_v28, %s7997_s17  ;;  %v2449_v28 = vpack.c.bf16 %v2416_v29, %v2415_v19 }
 0x1af   :  { %2635 = vrot.lane.b32.xlu0 %v9078_v39, %s7997_s17  ;;  %7442 = vmatprep.mubr.msk.bf16.mxu0 %vm1535_vm5, %v876_v61  ;;  %v2514_v39 = vld [vmem:[#allocation2 + $0x352] sm:$0xff] }
 0x1b0   :  { %7443 = vmatmul.mubr.msk.bf16.gmra.mrb[60].mxu0 %vm1535_vm5, %v878_v10  ;;  %v2582_v37 = vpop.permute.xlu1 %2581 }
 0x1b1   :  { %v2580_v43 = vpop.permute.xlu0 %2579  ;;  %v2744_v26 = vsel %vm21_vm0, %v9097_v33, %v2582_v37 }
 0x1b2   :  { %2733 = vrot.lane.b32.xlu1 %v9086_v35, %s7996_s16  ;;  %v2741_v2 = vsel %vm21_vm0, %v9100_v13, %v2580_v43 }
 0x1b3   :  { %2731 = vrot.lane.b32.xlu0 %v9094_v58, %s7996_s16  ;;  %v2546_v58 = vpack.c.bf16 %v2514_v39, %v2513_v23 }
 0x1b4   :  { %v2678_v7 = vpop.permute.xlu1 %2677 }
 0x1b5   :  { %v2676_v4 = vpop.permute.xlu0 %2675  ;;  %v2838_v38 = vsel %vm814_vm4, %v2744_v26, %v2678_v7 }
 0x1b6   :  { %v2836_v35 = vsel %vm814_vm4, %v2741_v2, %v2676_v4  ;;  %2641 = vrot.lane.b32.xlu1 %v2450_v3, %s7997_s17 }
 0x1b7   :  { %2639 = vrot.lane.b32.xlu0 %v2449_v28, %s7997_s17  ;;  %7450 = vmatprep.mubr.msk.bf16.mxu0 %vm1535_vm5, %v2836_v35 }
 0x1b8   :  { %7451 = vmatmul.mubr.msk.bf16.vlgmr.msra.gmra.mrb[0].mxu0 %vm1535_vm5, %v2838_v38  ;;  %v2586_v33 = vpop.permute.xlu1 %2585 }
 0x1b9   :  { %v2584_v21 = vpop.permute.xlu0 %2583  ;;  %v2750_v13 = vsel %vm21_vm0, %v9118_v14, %v2586_v33  ;;  %v2290_v33 = vld [vmem:[#allocation2 + $0x1a0] sm:$0xff] }
 0x1ba   :  { %2737 = vrot.lane.b32.xlu1 %v2546_v58, %s7996_s16  ;;  %v2747_v0 = vsel %vm21_vm0, %v9120_v56, %v2584_v21 }
 0x1bb   :  { %2735 = vrot.lane.b32.xlu0 %v2545_v24, %s7996_s16  ;;  %v2289_v24 = vld [vmem:[#allocation2 + $0x198] sm:$0xff] }
 0x1bc   :  { %v2682_v27 = vpop.permute.xlu1 %2681 }
 0x1bd   :  { %v2680_v20 = vpop.permute.xlu0 %2679  ;;  %v2842_v12 = vsel %vm814_vm4, %v2750_v13, %v2682_v27  ;;  %v2287_v13 = vld [vmem:[#allocation2 + $0x180] sm:$0xff]  ;;  %v2288_v27 = vld [vmem:[#allocation2 + $0x188] sm:$0xff] }
 0x1be   :  { %v2840_v11 = vsel %vm814_vm4, %v2747_v0, %v2680_v20  ;;  %v2338_v0 = vpack.c.bf16 %v2290_v33, %v2289_v24 }
 0x1bf   :  { %7454 = vmatprep.mubr.msk.bf16.mxu0 %vm1535_vm5, %v2840_v11 }
 0x1c0   :  { %7455 = vmatmul.mubr.msk.bf16.gmra.mrb[4].mxu0 %vm1535_vm5, %v2842_v12  ;;  %v2590_v32 = vpop.permute.xlu1 %2589 }
 0x1c1   :  { %v2588_v42 = vpop.permute.xlu0 %2587  ;;  %v2756_v8 = vsel %vm21_vm0, %v9134_v40, %v2590_v32 }
 0x1c2   :  { %v2753_v14 = vsel %vm21_vm0, %v9136_v48, %v2588_v42 }
 0x1c4   :  { %v2686_v51 = vpop.permute.xlu1 %2685 }
 0x1c5   :  { %v2684_v46 = vpop.permute.xlu0 %2683  ;;  %v2846_v56 = vsel %vm814_vm4, %v2756_v8, %v2686_v51 }
 0x1c6   :  { %v2844_v60 = vsel %vm814_vm4, %v2753_v14, %v2684_v46 }
 0x1c7   :  { %7458 = vmatprep.mubr.msk.bf16.mxu0 %vm1535_vm5, %v2844_v60 }
 0x1c8   :  { %7459 = vmatmul.mubr.msk.bf16.gmra.mrb[8].mxu0 %vm1535_vm5, %v2846_v56  ;;  %v2594_v44 = vpop.permute.xlu1 %2593 }
 0x1c9   :  { %v2592_v31 = vpop.permute.xlu0 %2591  ;;  %v2762_v10 = vsel %vm21_vm0, %v9150_v45, %v2594_v44 }
 0x1ca   :  { %v2759_v40 = vsel %vm21_vm0, %v9152_v62, %v2592_v31 }
 0x1cc   :  { %v2690_v61 = vpop.permute.xlu1 %2689 }
 0x1cd   :  { %v2688_v52 = vpop.permute.xlu0 %2687  ;;  %v2850_v48 = vsel %vm814_vm4, %v2762_v10, %v2690_v61 }
 0x1ce   :  { %v2848_v50 = vsel %vm814_vm4, %v2759_v40, %v2688_v52 }
 0x1cf   :  { %7462 = vmatprep.mubr.msk.bf16.mxu0 %vm1535_vm5, %v2848_v50 }
 0x1d0   :  { %7463 = vmatmul.mubr.msk.bf16.gmra.mrb[12].mxu0 %vm1535_vm5, %v2850_v48  ;;  %v2598_v37 = vpop.permute.xlu1 %2597 }
 0x1d1   :  { %v2596_v19 = vpop.permute.xlu0 %2595  ;;  %v2768_v29 = vsel %vm21_vm0, %v9166_v22, %v2598_v37 }
 0x1d2   :  { %v2765_v45 = vsel %vm21_vm0, %v9168_v47, %v2596_v19 }
 0x1d4   :  { %v2694_v43 = vpop.permute.xlu1 %2693 }
 0x1d5   :  { %v2692_v3 = vpop.permute.xlu0 %2691  ;;  %v2854_v62 = vsel %vm814_vm4, %v2768_v29, %v2694_v43 }
 0x1d6   :  { %v2852_v28 = vsel %vm814_vm4, %v2765_v45, %v2692_v3 }
 0x1d7   :  { %7466 = vmatprep.mubr.msk.bf16.mxu0 %vm1535_vm5, %v2852_v28 }
 0x1d8   :  { %7467 = vmatmul.mubr.msk.bf16.gmra.mrb[16].mxu0 %vm1535_vm5, %v2854_v62  ;;  %v2602_v23 = vpop.permute.xlu1 %2601 }
 0x1d9   :  { %v2600_v39 = vpop.permute.xlu0 %2599  ;;  %v2774_v26 = vsel %vm21_vm0, %v9182_v18, %v2602_v23 }
 0x1da   :  { %v2771_v22 = vsel %vm21_vm0, %v9184_v54, %v2600_v39 }
 0x1dc   :  { %v2698_v7 = vpop.permute.xlu1 %2697 }
 0x1dd   :  { %v2696_v25 = vpop.permute.xlu0 %2695  ;;  %v2858_v47 = vsel %vm814_vm4, %v2774_v26, %v2698_v7 }
 0x1de   :  { %v2856_v5 = vsel %vm814_vm4, %v2771_v22, %v2696_v25 }
 0x1df   :  { %7470 = vmatprep.mubr.msk.bf16.mxu0 %vm1535_vm5, %v2856_v5 }
 0x1e0   :  { %7471 = vmatmul.mubr.msk.bf16.gmra.mrb[20].mxu0 %vm1535_vm5, %v2858_v47  ;;  %v2606_v2 = vpop.permute.xlu1 %2605 }
 0x1e1   :  { %v2604_v4 = vpop.permute.xlu0 %2603  ;;  %v2780_v38 = vsel %vm21_vm0, %v9198_v59, %v2606_v2  ;;  %v2337_v59 = vpack.c.bf16 %v2288_v27, %v2287_v13 }
 0x1e2   :  { %v2777_v18 = vsel %vm21_vm0, %v9200_v53, %v2604_v4 }
 0x1e4   :  { %v2702_v35 = vpop.permute.xlu1 %2701 }
 0x1e5   :  { %v2700_v58 = vpop.permute.xlu0 %2699  ;;  %v2862_v54 = vsel %vm814_vm4, %v2780_v38, %v2702_v35 }
 0x1e6   :  { %v2860_v21 = vsel %vm814_vm4, %v2777_v18, %v2700_v58 }
 0x1e7   :  { %7474 = vmatprep.mubr.msk.bf16.mxu0 %vm1535_vm5, %v2860_v21 }
 0x1e8   :  { %7475 = vmatmul.mubr.msk.bf16.gmra.mrb[24].mxu0 %vm1535_vm5, %v2862_v54  ;;  %v2610_v20 = vpop.permute.xlu1 %2609 }
 0x1e9   :  { %v2608_v12 = vpop.permute.xlu0 %2607  ;;  %v2786_v11 = vsel %vm21_vm0, %v2338_v0, %v2610_v20 }
 0x1ea   :  { %v2783_v32 = vsel %vm21_vm0, %v2337_v59, %v2608_v12  ;;  %v2321_v12 = vld [vmem:[#allocation2 + $0x348] sm:$0xff] }
 0x1ec   :  { %v2706_v53 = vpop.permute.xlu1 %2705 }
 0x1ed   :  { %v2704_v42 = vpop.permute.xlu0 %2703  ;;  %v2866_v8 = vsel %vm814_vm4, %v2786_v11, %v2706_v53  ;;  %v2322_v11 = vld [vmem:[#allocation2 + $0x350] sm:$0xff] }
 0x1ee   :  { %v2864_v51 = vsel %vm814_vm4, %v2783_v32, %v2704_v42  ;;  %v2319_v32 = vld [vmem:[#allocation2 + $0x330] sm:$0xff]  ;;  %v2320_v42 = vld [vmem:[#allocation2 + $0x338] sm:$0xff] }
 0x1ef   :  { %7478 = vmatprep.mubr.msk.bf16.mxu0 %vm1535_vm5, %v2864_v51 }
 0x1f0   :  { %7479 = vmatmul.mubr.msk.bf16.gmra.mrb[28].mxu0 %vm1535_vm5, %v2866_v8  ;;  %v2614_v14 = vpop.permute.xlu1 %2613  ;;  %v2354_v8 = vpack.c.bf16 %v2322_v11, %v2321_v12 }
 0x1f1   :  { %v2612_v46 = vpop.permute.xlu0 %2611  ;;  %v2792_v56 = vsel %vm21_vm0, %v9227_v9, %v2614_v14 }
 0x1f2   :  { %v2789_v44 = vsel %vm21_vm0, %v9229_v6, %v2612_v46 }
 0x1f4   :  { %v2710_v60 = vpop.permute.xlu1 %2709 }
 0x1f5   :  { %v2708_v31 = vpop.permute.xlu0 %2707  ;;  %v2870_v10 = vsel %vm814_vm4, %v2792_v56, %v2710_v60 }
 0x1f6   :  { %v2868_v61 = vsel %vm814_vm4, %v2789_v44, %v2708_v31 }
 0x1f7   :  { %7482 = vmatprep.mubr.msk.bf16.mxu0 %vm1535_vm5, %v2868_v61 }
 0x1f8   :  { %7483 = vmatmul.mubr.msk.bf16.gmra.mrb[32].mxu0 %vm1535_vm5, %v2870_v10  ;;  %v2618_v40 = vpop.permute.xlu1 %2617  ;;  %v9499_v10 = vld [vmem:[%s10868_s2] ss:$0 sm:$0xff] }
 0x1f9   :  { %v2616_v52 = vpop.permute.xlu0 %2615  ;;  %v2798_v48 = vsel %vm21_vm0, %v9244_v49, %v2618_v40 }
 0x1fa   :  { %v2795_v9 = vsel %vm21_vm0, %v9246_v36, %v2616_v52 }
 0x1fc   :  { %v2714_v50 = vpop.permute.xlu1 %2713 }
 0x1fd   :  { %v2712_v37 = vpop.permute.xlu0 %2711  ;;  %v2874_v6 = vsel %vm814_vm4, %v2798_v48, %v2714_v50  ;;  %v7989_v48 = vld [vmem:[%s10869_s3 + $0xc] sm:$0xff]  }
 0x1fe   :  { %v2872_v19 = vsel %vm814_vm4, %v2795_v9, %v2712_v37  ;;  %7514 = vmatprep.subr.bf16.mxu1 %v7989_v48 }
 0x1ff   :  { %7486 = vmatprep.mubr.msk.bf16.mxu0 %vm1535_vm5, %v2872_v19  ;;  %7515 = vmatpush3.bf16.msra.mxu1 %v7989_v48 }
 0x200   :  { %7487 = vmatmul.mubr.msk.bf16.gmra.mrb[36].mxu0 %vm1535_vm5, %v2874_v6  ;;  %v2622_v29 = vpop.permute.xlu1 %2621 }
 0x201   :  { %v2620_v43 = vpop.permute.xlu0 %2619  ;;  %v2804_v45 = vsel %vm21_vm0, %v9264_v30, %v2622_v29 }
 0x202   :  { %v2801_v49 = vsel %vm21_vm0, %v9266_v1, %v2620_v43 }
 0x204   :  { %v2718_v3 = vpop.permute.xlu1 %2717 }
 0x205   :  { %v2716_v62 = vpop.permute.xlu0 %2715  ;;  %v2878_v36 = vsel %vm814_vm4, %v2804_v45, %v2718_v3  ;;  %v7990_v3 = vld [vmem:[%s10869_s3 + $0x14] ss:$0 sps:$4 sm:$0xff]  }
 0x206   :  { %v2876_v28 = vsel %vm814_vm4, %v2801_v49, %v2716_v62  ;;  %7977 = vmatprep.subr.msk.bf16.mxu1 %vm1600_vm3, %v7990_v3  ;;  %v4892_v62 = vsel %vm1600_vm3, %v7990_v3, 0 }
 0x207   :  { %7490 = vmatprep.mubr.msk.bf16.mxu0 %vm1535_vm5, %v2876_v28  ;;  %7517 = vmatpush3.bf16.msra.mxu1 %v4892_v62 }
 0x208   :  { %7491 = vmatmul.mubr.msk.bf16.gmra.mrb[40].mxu0 %vm1535_vm5, %v2878_v36  ;;  %v2626_v23 = vpop.permute.xlu1 %2625 }
 0x209   :  { %v2624_v39 = vpop.permute.xlu0 %2623  ;;  %v2810_v26 = vsel %vm21_vm0, %v9284_v63, %v2626_v23 }
 0x20a   :  { %v2807_v30 = vsel %vm21_vm0, %v9286_v15, %v2624_v39 }
 0x20c   :  { %v2722_v7 = vpop.permute.xlu1 %2721 }
 0x20d   :  { %v2720_v22 = vpop.permute.xlu0 %2719  ;;  %v2882_v1 = vsel %vm814_vm4, %v2810_v26, %v2722_v7  ;;  %v9522_v7 = vld [vmem:[%s10869_s3] sm:$0xff]  }
 0x20e   :  { %v2880_v25 = vsel %vm814_vm4, %v2807_v30, %v2720_v22  ;;  %7582 = vmatprep.subr.bf16.mxu1 %v9522_v7 }
 0x20f   :  { %7494 = vmatprep.mubr.msk.bf16.mxu0 %vm1535_vm5, %v2880_v25 }
 0x210   :  { %7495 = vmatmul.mubr.msk.bf16.gmra.mrb[44].mxu0 %vm1535_vm5, %v2882_v1  ;;  %v2630_v47 = vpop.permute.xlu1 %2629 }
 0x211   :  { %v2628_v5 = vpop.permute.xlu0 %2627  ;;  %v2816_v2 = vsel %vm21_vm0, %v9304_v16, %v2630_v47 }
 0x212   :  { %v2813_v63 = vsel %vm21_vm0, %v9306_v34, %v2628_v5 }
 0x214   :  { %v2726_v4 = vpop.permute.xlu1 %2725 }
 0x215   :  { %v2724_v38 = vpop.permute.xlu0 %2723  ;;  %v2886_v15 = vsel %vm814_vm4, %v2816_v2, %v2726_v4 }
 0x216   :  { %v2884_v35 = vsel %vm814_vm4, %v2813_v63, %v2724_v38 }
 0x217   :  { %7498 = vmatprep.mubr.msk.bf16.mxu0 %vm1535_vm5, %v2884_v35 }
 0x218   :  { %7499 = vmatmul.mubr.msk.bf16.gmra.mrb[48].mxu0 %vm1535_vm5, %v2886_v15  ;;  %v2634_v18 = vpop.permute.xlu1 %2633 }
 0x219   :  { %v2632_v58 = vpop.permute.xlu0 %2631  ;;  %v2822_v54 = vsel %vm21_vm0, %v9324_v17, %v2634_v18 }
 0x21a   :  { %v2819_v16 = vsel %vm21_vm0, %v9326_v57, %v2632_v58 }
 0x21c   :  { %v2730_v24 = vpop.permute.xlu1 %2729 }
 0x21d   :  { %v2728_v33 = vpop.permute.xlu0 %2727  ;;  %v2890_v34 = vsel %vm814_vm4, %v2822_v54, %v2730_v24 }
 0x21e   :  { %v2888_v21 = vsel %vm814_vm4, %v2819_v16, %v2728_v33 }
 0x21f   :  { %7502 = vmatprep.mubr.msk.bf16.mxu0 %vm1535_vm5, %v2888_v21 }
 0x220   :  { %7503 = vmatmul.mubr.msk.bf16.gmra.mrb[52].mxu0 %vm1535_vm5, %v2890_v34  ;;  %v2638_v13 = vpop.permute.xlu1 %2637 }
 0x221   :  { %v2636_v27 = vpop.permute.xlu0 %2635  ;;  %v2828_v0 = vsel %vm21_vm0, %v9344_v41, %v2638_v13  ;;  %v2353_v41 = vpack.c.bf16 %v2320_v42, %v2319_v32 }
 0x222   :  { %v2825_v17 = vsel %vm21_vm0, %v9346_v55, %v2636_v27 }
 0x224   :  { %v2734_v20 = vpop.permute.xlu1 %2733 }
 0x225   :  { %v2732_v59 = vpop.permute.xlu0 %2731  ;;  %v2894_v57 = vsel %vm814_vm4, %v2828_v0, %v2734_v20 }
 0x226   :  { %v2892_v53 = vsel %vm814_vm4, %v2825_v17, %v2732_v59 }
 0x227   :  { %7506 = vmatprep.mubr.msk.bf16.mxu0 %vm1535_vm5, %v2892_v53 }
 0x228   :  { %7507 = vmatmul.mubr.msk.bf16.gmra.mrb[56].mxu0 %vm1535_vm5, %v2894_v57  ;;  %v2642_v51 = vpop.permute.xlu1 %2641 }
 0x229   :  { %v2640_v14 = vpop.permute.xlu0 %2639  ;;  %v2834_v46 = vsel %vm21_vm0, %v2354_v8, %v2642_v51 }
 0x22a   :  { %v2831_v56 = vsel %vm21_vm0, %v2353_v41, %v2640_v14 }
 0x22c   :  { %v2738_v55 = vpop.permute.xlu1 %2737 }
 0x22d   :  { %v2736_v60 = vpop.permute.xlu0 %2735  ;;  %v2898_v44 = vsel %vm814_vm4, %v2834_v46, %v2738_v55 }
 0x22e   :  { %v2896_v31 = vsel %vm814_vm4, %v2831_v56, %v2736_v60 }
 0x22f   :  { %7510 = vmatprep.mubr.msk.bf16.mxu0 %vm1535_vm5, %v2896_v31 }
 0x230   :  { %7511 = vmatmul.mubr.msk.bf16.gmra.mrb[60].mxu0 %vm1535_vm5, %v2898_v44 }
 0x28b   :  { %v7452_v61 = vpop.f32.mrb[0].mxu0 }
 0x28c   :  { %v3341_v40 = vadd.f32 %v7452_v61, %v9499_v10  ;;  %v3013_v52 = vpop.f32.mrb[1].mxu0 }
 0x28d   :  { %v3339_v50 = vadd.f32 %v9499_v10, %v3013_v52  ;;  %v7453_v9 = vpop.f32.mrb[2].mxu0 }
 0x28e   :  { %v3405_v37 = vmax.f32 %v3341_v40, 0.0  ;;  %v3342_v6 = vadd.f32 %v7453_v9, %v9499_v10  ;;  %v3016_v19 = vpop.f32.mrb[3].mxu0 }
 0x28f   :  { %v3403_v29 = vmax.f32 %v3339_v50, 0.0  ;;  %v3340_v43 = vadd.f32 %v9499_v10, %v3016_v19 }
 0x290   :  { %3469 = vst.msk [vmem:[#allocation2 + $0x31] sm:$0xff] %vm21_vm0, %v3405_v37  ;;  %v3406_v45 = vmax.f32 %v3342_v6, 0.0 }
 0x291   :  { %3467 = vst.msk [vmem:[#allocation2 + $0x19] sm:$0xff] %vm21_vm0, %v3403_v29  ;;  %v3404_v49 = vmax.f32 %v3340_v43, 0.0 }
 0x292   :  { %3470 = vst.msk [vmem:[#allocation2 + $0x39] sm:$0xff] %vm21_vm0, %v3406_v45 }
 0x293   :  { %3468 = vst.msk [vmem:[#allocation2 + $0x21] sm:$0xff] %vm21_vm0, %v3404_v49  ;;  %v7456_v36 = vpop.f32.mrb[4].mxu0 }
 0x294   :  { %v3345_v28 = vadd.f32 %v7456_v36, %v9499_v10  ;;  %v3029_v23 = vpop.f32.mrb[5].mxu0 }
 0x295   :  { %v3343_v39 = vadd.f32 %v9499_v10, %v3029_v23  ;;  %v7457_v26 = vpop.f32.mrb[6].mxu0 }
 0x296   :  { %v3409_v30 = vmax.f32 %v3345_v28, 0.0  ;;  %v3346_v22 = vadd.f32 %v7457_v26, %v9499_v10  ;;  %v3032_v1 = vpop.f32.mrb[7].mxu0 }
 0x297   :  { %v3407_v25 = vmax.f32 %v3343_v39, 0.0  ;;  %v3344_v47 = vadd.f32 %v9499_v10, %v3032_v1  ;;  %v4272_v4 = vld [vmem:[#allocation2 + $0x31] sm:$0xff] }
 0x298   :  { %3473 = vst.msk [vmem:[#allocation2 + $0x61] sm:$0xff] %vm21_vm0, %v3409_v30  ;;  %v3410_v5 = vmax.f32 %v3346_v22, 0.0  ;;  %v4270_v15 = vld [vmem:[#allocation2 + $0x19] sm:$0xff] }
 0x299   :  { %3471 = vst.msk [vmem:[#allocation2 + $0x49] sm:$0xff] %vm21_vm0, %v3407_v25  ;;  %v3408_v2 = vmax.f32 %v3344_v47, 0.0  ;;  %v4273_v63 = vld [vmem:[#allocation2 + $0x39] sm:$0xff] }
 0x29a   :  { %3474 = vst.msk [vmem:[#allocation2 + $0x69] sm:$0xff] %vm21_vm0, %v3410_v5  ;;  %v4335_v38 = vpack.c.bf16 %v4273_v63, %v4272_v4  ;;  %v4271_v35 = vld [vmem:[#allocation2 + $0x21] sm:$0xff]  ;;  %v4368_v54 = vld [vmem:[#allocation2 + $0x32] sm:$0xff] }
 0x29b   :  { %3472 = vst.msk [vmem:[#allocation2 + $0x51] sm:$0xff] %vm21_vm0, %v3408_v2  ;;  %v7460_v18 = vpop.f32.mrb[8].mxu0  ;;  %v4334_v58 = vpack.c.bf16 %v4271_v35, %v4270_v15  ;;  %v4369_v24 = vld [vmem:[#allocation2 + $0x3a] sm:$0xff]  ;;  %v4367_v21 = vld [vmem:[#allocation2 + $0x22] sm:$0xff] }
 0x29c   :  { %v3349_v16 = vadd.f32 %v7460_v18, %v9499_v10  ;;  %4496 = vrot.lane.b32.xlu1 %v4335_v38, %s7997_s17  ;;  %v3045_v33 = vpop.f32.mrb[9].mxu0  ;;  %v4366_v34 = vld [vmem:[#allocation2 + $0x1a] sm:$0xff]  ;;  %v4431_v59 = vpack.c.bf16 %v4369_v24, %v4368_v54 }
 0x29d   :  { %v3347_v13 = vadd.f32 %v9499_v10, %v3045_v33  ;;  %4494 = vrot.lane.b32.xlu0 %v4334_v58, %s7997_s17  ;;  %v7461_v27 = vpop.f32.mrb[10].mxu0  ;;  %v4430_v11 = vpack.c.bf16 %v4367_v21, %v4366_v34 }
 0x29e   :  { %v3413_v0 = vmax.f32 %v3349_v16, 0.0  ;;  %v3350_v20 = vadd.f32 %v7461_v27, %v9499_v10  ;;  %v3048_v17 = vpop.f32.mrb[11].mxu0 }
 0x29f   :  { %v3411_v57 = vmax.f32 %v3347_v13, 0.0  ;;  %v3348_v12 = vadd.f32 %v9499_v10, %v3048_v17  ;;  %v4276_v42 = vld [vmem:[#allocation2 + $0x61] sm:$0xff] }
 0x2a0   :  { %3477 = vst.msk [vmem:[#allocation2 + $0x91] sm:$0xff] %vm21_vm0, %v3413_v0  ;;  %v3414_v53 = vmax.f32 %v3350_v20, 0.0  ;;  %4592 = vrot.lane.b32.xlu1 %v4431_v59, %s7996_s16  ;;  %v4274_v41 = vld [vmem:[#allocation2 + $0x49] sm:$0xff] }
 0x2a1   :  { %3475 = vst.msk [vmem:[#allocation2 + $0x79] sm:$0xff] %vm21_vm0, %v3411_v57  ;;  %v3412_v32 = vmax.f32 %v3348_v12, 0.0  ;;  %4590 = vrot.lane.b32.xlu0 %v4430_v11, %s7996_s16  ;;  %v4277_v8 = vld [vmem:[#allocation2 + $0x69] sm:$0xff] }
 0x2a2   :  { %3478 = vst.msk [vmem:[#allocation2 + $0x99] sm:$0xff] %vm21_vm0, %v3414_v53  ;;  %v4337_v51 = vpack.c.bf16 %v4277_v8, %v4276_v42  ;;  %v4275_v14 = vld [vmem:[#allocation2 + $0x51] sm:$0xff]  ;;  %v4372_v56 = vld [vmem:[#allocation2 + $0x62] sm:$0xff] }
 0x2a3   :  { %3476 = vst.msk [vmem:[#allocation2 + $0x81] sm:$0xff] %vm21_vm0, %v3412_v32  ;;  %v7464_v46 = vpop.f32.mrb[12].mxu0  ;;  %v4336_v55 = vpack.c.bf16 %v4275_v14, %v4274_v41  ;;  %v4373_v60 = vld [vmem:[#allocation2 + $0x6a] sm:$0xff]  ;;  %v4371_v40 = vld [vmem:[#allocation2 + $0x52] sm:$0xff] }
 0x2a4   :  { %v3353_v44 = vadd.f32 %v7464_v46, %v9499_v10  ;;  %4500 = vrot.lane.b32.xlu1 %v4337_v51, %s7997_s17  ;;  %v3061_v31 = vpop.f32.mrb[13].mxu0  ;;  %v4370_v61 = vld [vmem:[#allocation2 + $0x4a] sm:$0xff]  ;;  %v4433_v6 = vpack.c.bf16 %v4373_v60, %v4372_v56 }
 0x2a5   :  { %v3351_v52 = vadd.f32 %v9499_v10, %v3061_v31  ;;  %4498 = vrot.lane.b32.xlu0 %v4336_v55, %s7997_s17  ;;  %v7465_v48 = vpop.f32.mrb[14].mxu0  ;;  %v4432_v43 = vpack.c.bf16 %v4371_v40, %v4370_v61 }
 0x2a6   :  { %v3417_v50 = vmax.f32 %v3353_v44, 0.0  ;;  %v3354_v9 = vadd.f32 %v7465_v48, %v9499_v10  ;;  %v3064_v37 = vpop.f32.mrb[15].mxu0 }
 0x2a7   :  { %v3415_v19 = vmax.f32 %v3351_v52, 0.0  ;;  %v3352_v29 = vadd.f32 %v9499_v10, %v3064_v37  ;;  %v4280_v49 = vld [vmem:[#allocation2 + $0x91] sm:$0xff] }
 0x2a8   :  { %3481 = vst.msk [vmem:[#allocation2 + $0xc1] sm:$0xff] %vm21_vm0, %v3417_v50  ;;  %v3418_v45 = vmax.f32 %v3354_v9, 0.0  ;;  %4596 = vrot.lane.b32.xlu1 %v4433_v6, %s7996_s16  ;;  %v4278_v28 = vld [vmem:[#allocation2 + $0x79] sm:$0xff] }
 0x2a9   :  { %3479 = vst.msk [vmem:[#allocation2 + $0xa9] sm:$0xff] %vm21_vm0, %v3415_v19  ;;  %v3416_v3 = vmax.f32 %v3352_v29, 0.0  ;;  %4594 = vrot.lane.b32.xlu0 %v4432_v43, %s7996_s16  ;;  %v4281_v62 = vld [vmem:[#allocation2 + $0x99] sm:$0xff] }
 0x2aa   :  { %3482 = vst.msk [vmem:[#allocation2 + $0xc9] sm:$0xff] %vm21_vm0, %v3418_v45  ;;  %v4339_v36 = vpack.c.bf16 %v4281_v62, %v4280_v49  ;;  %v4279_v23 = vld [vmem:[#allocation2 + $0x81] sm:$0xff]  ;;  %v4376_v30 = vld [vmem:[#allocation2 + $0x92] sm:$0xff] }
 0x2ab   :  { %3480 = vst.msk [vmem:[#allocation2 + $0xb1] sm:$0xff] %vm21_vm0, %v3416_v3  ;;  %v7468_v39 = vpop.f32.mrb[16].mxu0  ;;  %v4338_v26 = vpack.c.bf16 %v4279_v23, %v4278_v28  ;;  %v4377_v22 = vld [vmem:[#allocation2 + $0x9a] sm:$0xff]  ;;  %v4375_v5 = vld [vmem:[#allocation2 + $0x82] sm:$0xff] }
 0x2ac   :  { %v3357_v1 = vadd.f32 %v7468_v39, %v9499_v10  ;;  %4504 = vrot.lane.b32.xlu1 %v4339_v36, %s7997_s17  ;;  %v3077_v25 = vpop.f32.mrb[17].mxu0  ;;  %v4374_v47 = vld [vmem:[#allocation2 + $0x7a] sm:$0xff]  ;;  %v4435_v35 = vpack.c.bf16 %v4377_v22, %v4376_v30 }
 0x2ad   :  { %v3355_v2 = vadd.f32 %v9499_v10, %v3077_v25  ;;  %4502 = vrot.lane.b32.xlu0 %v4338_v26, %s7997_s17  ;;  %v7469_v4 = vpop.f32.mrb[18].mxu0  ;;  %v4434_v54 = vpack.c.bf16 %v4375_v5, %v4374_v47 }
 0x2ae   :  { %v3421_v63 = vmax.f32 %v3357_v1, 0.0  ;;  %v3358_v38 = vadd.f32 %v7469_v4, %v9499_v10  ;;  %v3080_v15 = vpop.f32.mrb[19].mxu0 }
 0x2af   :  { %v3419_v18 = vmax.f32 %v3355_v2, 0.0  ;;  %v3356_v58 = vadd.f32 %v9499_v10, %v3080_v15  ;;  %v4284_v33 = vld [vmem:[#allocation2 + $0xc1] sm:$0xff] }
 0x2b0   :  { %3485 = vst.msk [vmem:[#allocation2 + $0xf1] sm:$0xff] %vm21_vm0, %v3421_v63  ;;  %v3422_v24 = vmax.f32 %v3358_v38, 0.0  ;;  %4600 = vrot.lane.b32.xlu1 %v4435_v35, %s7996_s16  ;;  %v4282_v13 = vld [vmem:[#allocation2 + $0xa9] sm:$0xff] }
 0x2b1   :  { %3483 = vst.msk [vmem:[#allocation2 + $0xd9] sm:$0xff] %vm21_vm0, %v3419_v18  ;;  %v3420_v16 = vmax.f32 %v3356_v58, 0.0  ;;  %4598 = vrot.lane.b32.xlu0 %v4434_v54, %s7996_s16  ;;  %v4285_v34 = vld [vmem:[#allocation2 + $0xc9] sm:$0xff] }
 0x2b2   :  { %3486 = vst.msk [vmem:[#allocation2 + $0xf9] sm:$0xff] %vm21_vm0, %v3422_v24  ;;  %v4341_v21 = vpack.c.bf16 %v4285_v34, %v4284_v33  ;;  %v4283_v27 = vld [vmem:[#allocation2 + $0xb1] sm:$0xff]  ;;  %v4380_v17 = vld [vmem:[#allocation2 + $0xc2] sm:$0xff] }
 0x2b3   :  { %3484 = vst.msk [vmem:[#allocation2 + $0xe1] sm:$0xff] %vm21_vm0, %v3420_v16  ;;  %v7472_v0 = vpop.f32.mrb[20].mxu0  ;;  %v4340_v20 = vpack.c.bf16 %v4283_v27, %v4282_v13  ;;  %v4381_v59 = vld [vmem:[#allocation2 + $0xca] sm:$0xff]  ;;  %v4379_v53 = vld [vmem:[#allocation2 + $0xb2] sm:$0xff] }
 0x2b4   :  { %v3361_v57 = vadd.f32 %v7472_v0, %v9499_v10  ;;  %4508 = vrot.lane.b32.xlu1 %v4341_v21, %s7997_s17  ;;  %v3093_v12 = vpop.f32.mrb[21].mxu0  ;;  %v4378_v11 = vld [vmem:[#allocation2 + $0xaa] sm:$0xff]  ;;  %v4437_v14 = vpack.c.bf16 %v4381_v59, %v4380_v17 }
 0x2b5   :  { %v3359_v32 = vadd.f32 %v9499_v10, %v3093_v12  ;;  %4506 = vrot.lane.b32.xlu0 %v4340_v20, %s7997_s17  ;;  %v7473_v42 = vpop.f32.mrb[22].mxu0  ;;  %v4436_v56 = vpack.c.bf16 %v4379_v53, %v4378_v11 }
 0x2b6   :  { %v3425_v8 = vmax.f32 %v3361_v57, 0.0  ;;  %v3362_v51 = vadd.f32 %v7473_v42, %v9499_v10  ;;  %v3096_v41 = vpop.f32.mrb[23].mxu0 }
 0x2b7   :  { %v3423_v46 = vmax.f32 %v3359_v32, 0.0  ;;  %v3360_v55 = vadd.f32 %v9499_v10, %v3096_v41  ;;  %v4288_v31 = vld [vmem:[#allocation2 + $0xf1] sm:$0xff] }
 0x2b8   :  { %3489 = vst.msk [vmem:[#allocation2 + $0x121] sm:$0xff] %vm21_vm0, %v3425_v8  ;;  %v3426_v60 = vmax.f32 %v3362_v51, 0.0  ;;  %4604 = vrot.lane.b32.xlu1 %v4437_v14, %s7996_s16  ;;  %v4286_v52 = vld [vmem:[#allocation2 + $0xd9] sm:$0xff] }
 0x2b9   :  { %3487 = vst.msk [vmem:[#allocation2 + $0x109] sm:$0xff] %vm21_vm0, %v3423_v46  ;;  %v3424_v44 = vmax.f32 %v3360_v55, 0.0  ;;  %4602 = vrot.lane.b32.xlu0 %v4436_v56, %s7996_s16  ;;  %v4289_v61 = vld [vmem:[#allocation2 + $0xf9] sm:$0xff] }
 0x2ba   :  { %3490 = vst.msk [vmem:[#allocation2 + $0x129] sm:$0xff] %vm21_vm0, %v3426_v60  ;;  %v4343_v40 = vpack.c.bf16 %v4289_v61, %v4288_v31  ;;  %v4287_v48 = vld [vmem:[#allocation2 + $0xe1] sm:$0xff]  ;;  %v4384_v37 = vld [vmem:[#allocation2 + $0xf2] sm:$0xff] }
 0x2bb   :  { %3488 = vst.msk [vmem:[#allocation2 + $0x111] sm:$0xff] %vm21_vm0, %v3424_v44  ;;  %v7476_v50 = vpop.f32.mrb[24].mxu0  ;;  %v4342_v9 = vpack.c.bf16 %v4287_v48, %v4286_v52  ;;  %v4385_v6 = vld [vmem:[#allocation2 + $0xfa] sm:$0xff]  ;;  %v4383_v45 = vld [vmem:[#allocation2 + $0xe2] sm:$0xff] }
 0x2bc   :  { %v3365_v19 = vadd.f32 %v7476_v50, %v9499_v10  ;;  %4512 = vrot.lane.b32.xlu1 %v4343_v40, %s7997_s17  ;;  %v3109_v29 = vpop.f32.mrb[25].mxu0  ;;  %v4382_v43 = vld [vmem:[#allocation2 + $0xda] sm:$0xff]  ;;  %v4439_v23 = vpack.c.bf16 %v4385_v6, %v4384_v37 }
 0x2bd   :  { %v3363_v3 = vadd.f32 %v9499_v10, %v3109_v29  ;;  %4510 = vrot.lane.b32.xlu0 %v4342_v9, %s7997_s17  ;;  %v7477_v49 = vpop.f32.mrb[26].mxu0  ;;  %v4438_v30 = vpack.c.bf16 %v4383_v45, %v4382_v43 }
 0x2be   :  { %v3429_v62 = vmax.f32 %v3365_v19, 0.0  ;;  %v3366_v36 = vadd.f32 %v7477_v49, %v9499_v10  ;;  %v3112_v28 = vpop.f32.mrb[27].mxu0 }
 0x2bf   :  { %v3427_v39 = vmax.f32 %v3363_v3, 0.0  ;;  %v3364_v26 = vadd.f32 %v9499_v10, %v3112_v28  ;;  %v4292_v25 = vld [vmem:[#allocation2 + $0x121] sm:$0xff] }
 0x2c0   :  { %3493 = vst.msk [vmem:[#allocation2 + $0x151] sm:$0xff] %vm21_vm0, %v3429_v62  ;;  %v3430_v22 = vmax.f32 %v3366_v36, 0.0  ;;  %4608 = vrot.lane.b32.xlu1 %v4439_v23, %s7996_s16  ;;  %v4290_v2 = vld [vmem:[#allocation2 + $0x109] sm:$0xff] }
 0x2c1   :  { %3491 = vst.msk [vmem:[#allocation2 + $0x139] sm:$0xff] %vm21_vm0, %v3427_v39  ;;  %v3428_v1 = vmax.f32 %v3364_v26, 0.0  ;;  %4606 = vrot.lane.b32.xlu0 %v4438_v30, %s7996_s16  ;;  %v4293_v47 = vld [vmem:[#allocation2 + $0x129] sm:$0xff] }
 0x2c2   :  { %3494 = vst.msk [vmem:[#allocation2 + $0x159] sm:$0xff] %vm21_vm0, %v3430_v22  ;;  %v4345_v5 = vpack.c.bf16 %v4293_v47, %v4292_v25  ;;  %v4291_v4 = vld [vmem:[#allocation2 + $0x111] sm:$0xff]  ;;  %v4388_v15 = vld [vmem:[#allocation2 + $0x122] sm:$0xff] }
 0x2c3   :  { %3492 = vst.msk [vmem:[#allocation2 + $0x141] sm:$0xff] %vm21_vm0, %v3428_v1  ;;  %v7480_v63 = vpop.f32.mrb[28].mxu0  ;;  %v4344_v38 = vpack.c.bf16 %v4291_v4, %v4290_v2  ;;  %v4389_v35 = vld [vmem:[#allocation2 + $0x12a] sm:$0xff]  ;;  %v4387_v24 = vld [vmem:[#allocation2 + $0x112] sm:$0xff] }
 0x2c4   :  { %v3369_v18 = vadd.f32 %v7480_v63, %v9499_v10  ;;  %4516 = vrot.lane.b32.xlu1 %v4345_v5, %s7997_s17  ;;  %v3125_v58 = vpop.f32.mrb[29].mxu0  ;;  %v4386_v54 = vld [vmem:[#allocation2 + $0x10a] sm:$0xff]  ;;  %v4441_v27 = vpack.c.bf16 %v4389_v35, %v4388_v15 }
 0x2c5   :  { %v3367_v16 = vadd.f32 %v9499_v10, %v3125_v58  ;;  %4514 = vrot.lane.b32.xlu0 %v4344_v38, %s7997_s17  ;;  %v7481_v33 = vpop.f32.mrb[30].mxu0  ;;  %v4440_v17 = vpack.c.bf16 %v4387_v24, %v4386_v54 }
 0x2c6   :  { %v3433_v34 = vmax.f32 %v3369_v18, 0.0  ;;  %v3370_v21 = vadd.f32 %v7481_v33, %v9499_v10  ;;  %v3128_v13 = vpop.f32.mrb[31].mxu0 }
 0x2c7   :  { %v3431_v0 = vmax.f32 %v3367_v16, 0.0  ;;  %v3368_v20 = vadd.f32 %v9499_v10, %v3128_v13  ;;  %v4296_v12 = vld [vmem:[#allocation2 + $0x151] sm:$0xff] }
 0x2c8   :  { %3497 = vst.msk [vmem:[#allocation2 + $0x181] sm:$0xff] %vm21_vm0, %v3433_v34  ;;  %v3434_v59 = vmax.f32 %v3370_v21, 0.0  ;;  %4612 = vrot.lane.b32.xlu1 %v4441_v27, %s7996_s16  ;;  %v4294_v32 = vld [vmem:[#allocation2 + $0x139] sm:$0xff] }
 0x2c9   :  { %3495 = vst.msk [vmem:[#allocation2 + $0x169] sm:$0xff] %vm21_vm0, %v3431_v0  ;;  %v3432_v57 = vmax.f32 %v3368_v20, 0.0  ;;  %4610 = vrot.lane.b32.xlu0 %v4440_v17, %s7996_s16  ;;  %v4297_v11 = vld [vmem:[#allocation2 + $0x159] sm:$0xff] }
 0x2ca   :  { %3498 = vst.msk [vmem:[#allocation2 + $0x189] sm:$0xff] %vm21_vm0, %v3434_v59  ;;  %v4347_v53 = vpack.c.bf16 %v4297_v11, %v4296_v12  ;;  %v4295_v42 = vld [vmem:[#allocation2 + $0x141] sm:$0xff]  ;;  %v4392_v41 = vld [vmem:[#allocation2 + $0x152] sm:$0xff] }
 0x2cb   :  { %3496 = vst.msk [vmem:[#allocation2 + $0x171] sm:$0xff] %vm21_vm0, %v3432_v57  ;;  %v7484_v8 = vpop.f32.mrb[32].mxu0  ;;  %v4346_v51 = vpack.c.bf16 %v4295_v42, %v4294_v32  ;;  %v4393_v14 = vld [vmem:[#allocation2 + $0x15a] sm:$0xff]  ;;  %v4391_v60 = vld [vmem:[#allocation2 + $0x142] sm:$0xff] }
 0x2cc   :  { %v3373_v46 = vadd.f32 %v7484_v8, %v9499_v10  ;;  %4520 = vrot.lane.b32.xlu1 %v4347_v53, %s7997_s17  ;;  %v3141_v55 = vpop.f32.mrb[33].mxu0  ;;  %v4390_v56 = vld [vmem:[#allocation2 + $0x13a] sm:$0xff]  ;;  %v4443_v48 = vpack.c.bf16 %v4393_v14, %v4392_v41 }
 0x2cd   :  { %v3371_v44 = vadd.f32 %v9499_v10, %v3141_v55  ;;  %4518 = vrot.lane.b32.xlu0 %v4346_v51, %s7997_s17  ;;  %v7485_v31 = vpop.f32.mrb[34].mxu0  ;;  %v4442_v37 = vpack.c.bf16 %v4391_v60, %v4390_v56 }
 0x2ce   :  { %v3437_v61 = vmax.f32 %v3373_v46, 0.0  ;;  %v3374_v40 = vadd.f32 %v7485_v31, %v9499_v10  ;;  %v3144_v52 = vpop.f32.mrb[35].mxu0 }
 0x2cf   :  { %v3435_v50 = vmax.f32 %v3371_v44, 0.0  ;;  %v3372_v9 = vadd.f32 %v9499_v10, %v3144_v52  ;;  %v4300_v29 = vld [vmem:[#allocation2 + $0x181] sm:$0xff] }
 0x2d0   :  { %3501 = vst.msk [vmem:[#allocation2 + $0x1e1] sm:$0xff] %vm21_vm0, %v3437_v61  ;;  %v3438_v6 = vmax.f32 %v3374_v40, 0.0  ;;  %4616 = vrot.lane.b32.xlu1 %v4443_v48, %s7996_s16  ;;  %v4298_v3 = vld [vmem:[#allocation2 + $0x169] sm:$0xff] }
 0x2d1   :  { %3499 = vst.msk [vmem:[#allocation2 + $0x1c9] sm:$0xff] %vm21_vm0, %v3435_v50  ;;  %v3436_v19 = vmax.f32 %v3372_v9, 0.0  ;;  %4614 = vrot.lane.b32.xlu0 %v4442_v37, %s7996_s16  ;;  %v4301_v43 = vld [vmem:[#allocation2 + $0x189] sm:$0xff] }
 0x2d2   :  { %3502 = vst.msk [vmem:[#allocation2 + $0x1e9] sm:$0xff] %vm21_vm0, %v3438_v6  ;;  %v4349_v45 = vpack.c.bf16 %v4301_v43, %v4300_v29  ;;  %v4299_v49 = vld [vmem:[#allocation2 + $0x171] sm:$0xff]  ;;  %v4396_v28 = vld [vmem:[#allocation2 + $0x182] sm:$0xff] }
 0x2d3   :  { %3500 = vst.msk [vmem:[#allocation2 + $0x1d1] sm:$0xff] %vm21_vm0, %v3436_v19  ;;  %v7488_v62 = vpop.f32.mrb[36].mxu0  ;;  %v4348_v36 = vpack.c.bf16 %v4299_v49, %v4298_v3  ;;  %v4397_v23 = vld [vmem:[#allocation2 + $0x18a] sm:$0xff]  ;;  %v4395_v22 = vld [vmem:[#allocation2 + $0x172] sm:$0xff] }
 0x2d4   :  { %v3377_v39 = vadd.f32 %v7488_v62, %v9499_v10  ;;  %4524 = vrot.lane.b32.xlu1 %v4349_v45, %s7997_s17  ;;  %v3157_v26 = vpop.f32.mrb[37].mxu0  ;;  %v4394_v30 = vld [vmem:[#allocation2 + $0x16a] sm:$0xff]  ;;  %v4445_v4 = vpack.c.bf16 %v4397_v23, %v4396_v28 }
 0x2d5   :  { %v3375_v1 = vadd.f32 %v9499_v10, %v3157_v26  ;;  %4522 = vrot.lane.b32.xlu0 %v4348_v36, %s7997_s17  ;;  %v7489_v25 = vpop.f32.mrb[38].mxu0  ;;  %v4444_v15 = vpack.c.bf16 %v4395_v22, %v4394_v30 }
 0x2d6   :  { %v3441_v47 = vmax.f32 %v3377_v39, 0.0  ;;  %v3378_v5 = vadd.f32 %v7489_v25, %v9499_v10  ;;  %v3160_v2 = vpop.f32.mrb[39].mxu0 }
 0x2d7   :  { %v3439_v63 = vmax.f32 %v3375_v1, 0.0  ;;  %v3376_v38 = vadd.f32 %v9499_v10, %v3160_v2  ;;  %v4304_v58 = vld [vmem:[#allocation2 + $0x1e1] sm:$0xff] }
 0x2d8   :  { %3505 = vst.msk [vmem:[#allocation2 + $0x211] sm:$0xff] %vm21_vm0, %v3441_v47  ;;  %v3442_v35 = vmax.f32 %v3378_v5, 0.0  ;;  %4620 = vrot.lane.b32.xlu1 %v4445_v4, %s7996_s16  ;;  %v4302_v16 = vld [vmem:[#allocation2 + $0x1c9] sm:$0xff] }
 0x2d9   :  { %3503 = vst.msk [vmem:[#allocation2 + $0x1f9] sm:$0xff] %vm21_vm0, %v3439_v63  ;;  %v3440_v18 = vmax.f32 %v3376_v38, 0.0  ;;  %4618 = vrot.lane.b32.xlu0 %v4444_v15, %s7996_s16  ;;  %v4305_v54 = vld [vmem:[#allocation2 + $0x1e9] sm:$0xff] }
 0x2da   :  { %3506 = vst.msk [vmem:[#allocation2 + $0x219] sm:$0xff] %vm21_vm0, %v3442_v35  ;;  %v4351_v24 = vpack.c.bf16 %v4305_v54, %v4304_v58  ;;  %v4303_v33 = vld [vmem:[#allocation2 + $0x1d1] sm:$0xff]  ;;  %v4400_v13 = vld [vmem:[#allocation2 + $0x1e2] sm:$0xff] }
 0x2db   :  { %3504 = vst.msk [vmem:[#allocation2 + $0x201] sm:$0xff] %vm21_vm0, %v3440_v18  ;;  %v7492_v34 = vpop.f32.mrb[40].mxu0  ;;  %v4350_v21 = vpack.c.bf16 %v4303_v33, %v4302_v16  ;;  %v4401_v27 = vld [vmem:[#allocation2 + $0x1ea] sm:$0xff]  ;;  %v4399_v59 = vld [vmem:[#allocation2 + $0x1d2] sm:$0xff] }
 0x2dc   :  { %v3381_v0 = vadd.f32 %v7492_v34, %v9499_v10  ;;  %4528 = vrot.lane.b32.xlu1 %v4351_v24, %s7997_s17  ;;  %v3173_v20 = vpop.f32.mrb[41].mxu0  ;;  %v4398_v17 = vld [vmem:[#allocation2 + $0x1ca] sm:$0xff]  ;;  %v4447_v42 = vpack.c.bf16 %v4401_v27, %v4400_v13 }
 0x2dd   :  { %v3379_v57 = vadd.f32 %v9499_v10, %v3173_v20  ;;  %4526 = vrot.lane.b32.xlu0 %v4350_v21, %s7997_s17  ;;  %v7493_v12 = vpop.f32.mrb[42].mxu0  ;;  %v4446_v41 = vpack.c.bf16 %v4399_v59, %v4398_v17 }
 0x2de   :  { %v3445_v11 = vmax.f32 %v3381_v0, 0.0  ;;  %v3382_v53 = vadd.f32 %v7493_v12, %v9499_v10  ;;  %v3176_v32 = vpop.f32.mrb[43].mxu0 }
 0x2df   :  { %v3443_v8 = vmax.f32 %v3379_v57, 0.0  ;;  %v3380_v51 = vadd.f32 %v9499_v10, %v3176_v32  ;;  %v4308_v55 = vld [vmem:[#allocation2 + $0x211] sm:$0xff] }
 0x2e0   :  { %3509 = vst.msk [vmem:[#allocation2 + $0x241] sm:$0xff] %vm21_vm0, %v3445_v11  ;;  %v3446_v14 = vmax.f32 %v3382_v53, 0.0  ;;  %4624 = vrot.lane.b32.xlu1 %v4447_v42, %s7996_s16  ;;  %v4306_v44 = vld [vmem:[#allocation2 + $0x1f9] sm:$0xff] }
 0x2e1   :  { %3507 = vst.msk [vmem:[#allocation2 + $0x229] sm:$0xff] %vm21_vm0, %v3443_v8  ;;  %v3444_v46 = vmax.f32 %v3380_v51, 0.0  ;;  %4622 = vrot.lane.b32.xlu0 %v4446_v41, %s7996_s16  ;;  %v4309_v56 = vld [vmem:[#allocation2 + $0x219] sm:$0xff] }
 0x2e2   :  { %3510 = vst.msk [vmem:[#allocation2 + $0x249] sm:$0xff] %vm21_vm0, %v3446_v14  ;;  %v4353_v60 = vpack.c.bf16 %v4309_v56, %v4308_v55  ;;  %v4307_v31 = vld [vmem:[#allocation2 + $0x201] sm:$0xff]  ;;  %v4404_v52 = vld [vmem:[#allocation2 + $0x212] sm:$0xff] }
 0x2e3   :  { %3508 = vst.msk [vmem:[#allocation2 + $0x231] sm:$0xff] %vm21_vm0, %v3444_v46  ;;  %v7496_v61 = vpop.f32.mrb[44].mxu0  ;;  %v4352_v40 = vpack.c.bf16 %v4307_v31, %v4306_v44  ;;  %v4405_v48 = vld [vmem:[#allocation2 + $0x21a] sm:$0xff]  ;;  %v4403_v6 = vld [vmem:[#allocation2 + $0x202] sm:$0xff] }
 0x2e4   :  { %v3385_v50 = vadd.f32 %v7496_v61, %v9499_v10  ;;  %4532 = vrot.lane.b32.xlu1 %v4353_v60, %s7997_s17  ;;  %v3189_v9 = vpop.f32.mrb[45].mxu0  ;;  %v4402_v37 = vld [vmem:[#allocation2 + $0x1fa] sm:$0xff]  ;;  %v4449_v49 = vpack.c.bf16 %v4405_v48, %v4404_v52 }
 0x2e5   :  { %v3383_v19 = vadd.f32 %v9499_v10, %v3189_v9  ;;  %4530 = vrot.lane.b32.xlu0 %v4352_v40, %s7997_s17  ;;  %v7497_v29 = vpop.f32.mrb[46].mxu0  ;;  %v4448_v28 = vpack.c.bf16 %v4403_v6, %v4402_v37 }
 0x2e6   :  { %v3449_v43 = vmax.f32 %v3385_v50, 0.0  ;;  %v3386_v45 = vadd.f32 %v7497_v29, %v9499_v10  ;;  %v3192_v3 = vpop.f32.mrb[47].mxu0 }
 0x2e7   :  { %v3447_v62 = vmax.f32 %v3383_v19, 0.0  ;;  %v3384_v36 = vadd.f32 %v9499_v10, %v3192_v3  ;;  %v4312_v26 = vld [vmem:[#allocation2 + $0x241] sm:$0xff] }
 0x2e8   :  { %3513 = vst.msk [vmem:[#allocation2 + $0x271] sm:$0xff] %vm21_vm0, %v3449_v43  ;;  %v3450_v23 = vmax.f32 %v3386_v45, 0.0  ;;  %4628 = vrot.lane.b32.xlu1 %v4449_v49, %s7996_s16  ;;  %v4310_v1 = vld [vmem:[#allocation2 + $0x229] sm:$0xff] }
 0x2e9   :  { %3511 = vst.msk [vmem:[#allocation2 + $0x259] sm:$0xff] %vm21_vm0, %v3447_v62  ;;  %v3448_v39 = vmax.f32 %v3384_v36, 0.0  ;;  %4626 = vrot.lane.b32.xlu0 %v4448_v28, %s7996_s16  ;;  %v4313_v30 = vld [vmem:[#allocation2 + $0x249] sm:$0xff] }
 0x2ea   :  { %3514 = vst.msk [vmem:[#allocation2 + $0x279] sm:$0xff] %vm21_vm0, %v3450_v23  ;;  %v4355_v22 = vpack.c.bf16 %v4313_v30, %v4312_v26  ;;  %v4311_v25 = vld [vmem:[#allocation2 + $0x231] sm:$0xff]  ;;  %v4408_v2 = vld [vmem:[#allocation2 + $0x242] sm:$0xff] }
 0x2eb   :  { %3512 = vst.msk [vmem:[#allocation2 + $0x261] sm:$0xff] %vm21_vm0, %v3448_v39  ;;  %v7500_v47 = vpop.f32.mrb[48].mxu0  ;;  %v4354_v5 = vpack.c.bf16 %v4311_v25, %v4310_v1  ;;  %v4409_v4 = vld [vmem:[#allocation2 + $0x24a] sm:$0xff]  ;;  %v4407_v35 = vld [vmem:[#allocation2 + $0x232] sm:$0xff] }
 0x2ec   :  { %v3389_v63 = vadd.f32 %v7500_v47, %v9499_v10  ;;  %4536 = vrot.lane.b32.xlu1 %v4355_v22, %s7997_s17  ;;  %v3205_v38 = vpop.f32.mrb[49].mxu0  ;;  %v4406_v15 = vld [vmem:[#allocation2 + $0x22a] sm:$0xff]  ;;  %v4451_v33 = vpack.c.bf16 %v4409_v4, %v4408_v2 }
 0x2ed   :  { %v3387_v18 = vadd.f32 %v9499_v10, %v3205_v38  ;;  %4534 = vrot.lane.b32.xlu0 %v4354_v5, %s7997_s17  ;;  %v7501_v58 = vpop.f32.mrb[50].mxu0  ;;  %v4450_v13 = vpack.c.bf16 %v4407_v35, %v4406_v15 }
 0x2ee   :  { %v3453_v54 = vmax.f32 %v3389_v63, 0.0  ;;  %v3390_v24 = vadd.f32 %v7501_v58, %v9499_v10  ;;  %v3208_v16 = vpop.f32.mrb[51].mxu0 }
 0x2ef   :  { %v3451_v34 = vmax.f32 %v3387_v18, 0.0  ;;  %v3388_v21 = vadd.f32 %v9499_v10, %v3208_v16  ;;  %v4316_v20 = vld [vmem:[#allocation2 + $0x271] sm:$0xff] }
 0x2f0   :  { %3517 = vst.msk [vmem:[#allocation2 + $0x2a1] sm:$0xff] %vm21_vm0, %v3453_v54  ;;  %v3454_v27 = vmax.f32 %v3390_v24, 0.0  ;;  %4632 = vrot.lane.b32.xlu1 %v4451_v33, %s7996_s16  ;;  %v4314_v57 = vld [vmem:[#allocation2 + $0x259] sm:$0xff] }
 0x2f1   :  { %3515 = vst.msk [vmem:[#allocation2 + $0x289] sm:$0xff] %vm21_vm0, %v3451_v34  ;;  %v3452_v0 = vmax.f32 %v3388_v21, 0.0  ;;  %4630 = vrot.lane.b32.xlu0 %v4450_v13, %s7996_s16  ;;  %v4317_v17 = vld [vmem:[#allocation2 + $0x279] sm:$0xff] }
 0x2f2   :  { %3518 = vst.msk [vmem:[#allocation2 + $0x2a9] sm:$0xff] %vm21_vm0, %v3454_v27  ;;  %v4357_v59 = vpack.c.bf16 %v4317_v17, %v4316_v20  ;;  %v4315_v12 = vld [vmem:[#allocation2 + $0x261] sm:$0xff]  ;;  %v4412_v32 = vld [vmem:[#allocation2 + $0x272] sm:$0xff] }
 0x2f3   :  { %3516 = vst.msk [vmem:[#allocation2 + $0x291] sm:$0xff] %vm21_vm0, %v3452_v0  ;;  %v7504_v11 = vpop.f32.mrb[52].mxu0  ;;  %v4356_v53 = vpack.c.bf16 %v4315_v12, %v4314_v57  ;;  %v4413_v42 = vld [vmem:[#allocation2 + $0x27a] sm:$0xff]  ;;  %v4411_v14 = vld [vmem:[#allocation2 + $0x262] sm:$0xff] }
 0x2f4   :  { %v3393_v8 = vadd.f32 %v7504_v11, %v9499_v10  ;;  %4540 = vrot.lane.b32.xlu1 %v4357_v59, %s7997_s17  ;;  %v3221_v51 = vpop.f32.mrb[53].mxu0  ;;  %v4410_v41 = vld [vmem:[#allocation2 + $0x25a] sm:$0xff]  ;;  %v4453_v31 = vpack.c.bf16 %v4413_v42, %v4412_v32 }
 0x2f5   :  { %v3391_v46 = vadd.f32 %v9499_v10, %v3221_v51  ;;  %4538 = vrot.lane.b32.xlu0 %v4356_v53, %s7997_s17  ;;  %v7505_v55 = vpop.f32.mrb[54].mxu0  ;;  %v4452_v52 = vpack.c.bf16 %v4411_v14, %v4410_v41 }
 0x2f6   :  { %v3457_v56 = vmax.f32 %v3393_v8, 0.0  ;;  %v3394_v60 = vadd.f32 %v7505_v55, %v9499_v10  ;;  %v3224_v44 = vpop.f32.mrb[55].mxu0 }
 0x2f7   :  { %v3455_v61 = vmax.f32 %v3391_v46, 0.0  ;;  %v3392_v40 = vadd.f32 %v9499_v10, %v3224_v44  ;;  %v4320_v9 = vld [vmem:[#allocation2 + $0x2a1] sm:$0xff] }
 0x2f8   :  { %3521 = vst.msk [vmem:[#allocation2 + $0x2d1] sm:$0xff] %vm21_vm0, %v3457_v56  ;;  %v3458_v48 = vmax.f32 %v3394_v60, 0.0  ;;  %4636 = vrot.lane.b32.xlu1 %v4453_v31, %s7996_s16  ;;  %v4318_v19 = vld [vmem:[#allocation2 + $0x289] sm:$0xff] }
 0x2f9   :  { %3519 = vst.msk [vmem:[#allocation2 + $0x2b9] sm:$0xff] %vm21_vm0, %v3455_v61  ;;  %v3456_v50 = vmax.f32 %v3392_v40, 0.0  ;;  %4634 = vrot.lane.b32.xlu0 %v4452_v52, %s7996_s16  ;;  %v4321_v37 = vld [vmem:[#allocation2 + $0x2a9] sm:$0xff]  ;;  %v4175_v40 = vld [vmem:[#allocation2 + $0x20] sm:$0xff] }
 0x2fa   :  { %3522 = vst.msk [vmem:[#allocation2 + $0x2d9] sm:$0xff] %vm21_vm0, %v3458_v48  ;;  %v4359_v6 = vpack.c.bf16 %v4321_v37, %v4320_v9  ;;  %v4319_v29 = vld [vmem:[#allocation2 + $0x291] sm:$0xff]  ;;  %v4416_v3 = vld [vmem:[#allocation2 + $0x2a2] sm:$0xff] }
 0x2fb   :  { %3520 = vst.msk [vmem:[#allocation2 + $0x2c1] sm:$0xff] %vm21_vm0, %v3456_v50  ;;  %v7508_v43 = vpop.f32.mrb[56].mxu0  ;;  %v4358_v45 = vpack.c.bf16 %v4319_v29, %v4318_v19  ;;  %v4417_v49 = vld [vmem:[#allocation2 + $0x2aa] sm:$0xff]  ;;  %v4415_v23 = vld [vmem:[#allocation2 + $0x292] sm:$0xff] }
 0x2fc   :  { %v3397_v62 = vadd.f32 %v7508_v43, %v9499_v10  ;;  %4544 = vrot.lane.b32.xlu1 %v4359_v6, %s7997_s17  ;;  %v3237_v36 = vpop.f32.mrb[57].mxu0  ;;  %v4414_v28 = vld [vmem:[#allocation2 + $0x28a] sm:$0xff]  ;;  %v4455_v25 = vpack.c.bf16 %v4417_v49, %v4416_v3  ;;  %v4177_v48 = vld [vmem:[#allocation2 + $0x38] sm:$0xff] }
 0x2fd   :  { %v3395_v39 = vadd.f32 %v9499_v10, %v3237_v36  ;;  %4542 = vrot.lane.b32.xlu0 %v4358_v45, %s7997_s17  ;;  %v7509_v26 = vpop.f32.mrb[58].mxu0  ;;  %v4454_v2 = vpack.c.bf16 %v4415_v23, %v4414_v28  ;;  %v4174_v37 = vld [vmem:[#allocation2 + $0x18] sm:$0xff]  ;;  %v4176_v6 = vld [vmem:[#allocation2 + $0x30] sm:$0xff] }
 0x2fe   :  { %v3461_v30 = vmax.f32 %v3397_v62, 0.0  ;;  %v3398_v22 = vadd.f32 %v7509_v26, %v9499_v10  ;;  %v3240_v1 = vpop.f32.mrb[59].mxu0  ;;  %v4238_v19 = vpack.c.bf16 %v4175_v40, %v4174_v37  ;;  %v4239_v45 = vpack.c.bf16 %v4177_v48, %v4176_v6  ;;  %v3631_v37 = vld [vmem:[#allocation2 + $0x31] sm:$0xff] }
 0x2ff   :  { %v3459_v47 = vmax.f32 %v3395_v39, 0.0  ;;  %v3396_v5 = vadd.f32 %v9499_v10, %v3240_v1  ;;  %v4324_v38 = vld [vmem:[#allocation2 + $0x2d1] sm:$0xff] }
 0x300   :  { %3525 = vst.msk [vmem:[#allocation2 + $0x301] sm:$0xff] %vm21_vm0, %v3461_v30  ;;  %v3462_v4 = vmax.f32 %v3398_v22, 0.0  ;;  %4640 = vrot.lane.b32.xlu1 %v4455_v25, %s7996_s16  ;;  %v4322_v18 = vld [vmem:[#allocation2 + $0x2b9] sm:$0xff] }
 0x301   :  { %3523 = vst.msk [vmem:[#allocation2 + $0x2e9] sm:$0xff] %vm21_vm0, %v3459_v47  ;;  %v3460_v63 = vmax.f32 %v3396_v5, 0.0  ;;  %4638 = vrot.lane.b32.xlu0 %v4454_v2, %s7996_s16  ;;  %v4325_v15 = vld [vmem:[#allocation2 + $0x2d9] sm:$0xff]  ;;  %v7992_v5 = vld [vmem:[%s10869_s3 + $0x8] ss:$0 sps:$4 sm:$0xff]  }
 0x302   :  { %3526 = vst.msk [vmem:[#allocation2 + $0x309] sm:$0xff] %vm21_vm0, %v3462_v4  ;;  %v4361_v35 = vpack.c.bf16 %v4325_v15, %v4324_v38  ;;  %v4323_v58 = vld [vmem:[#allocation2 + $0x2c1] sm:$0xff]  ;;  %v4420_v16 = vld [vmem:[#allocation2 + $0x2d2] sm:$0xff] }
 0x303   :  { %3524 = vst.msk [vmem:[#allocation2 + $0x2f1] sm:$0xff] %vm21_vm0, %v3460_v63  ;;  %v7512_v54 = vpop.f32.mrb[60].mxu0  ;;  %v4360_v24 = vpack.c.bf16 %v4323_v58, %v4322_v18  ;;  %v4421_v33 = vld [vmem:[#allocation2 + $0x2da] sm:$0xff]  ;;  %v4419_v27 = vld [vmem:[#allocation2 + $0x2c2] sm:$0xff]  ;;  %v4179_v63 = vld [vmem:[#allocation2 + $0x50] sm:$0xff] }
 0x304   :  { %v3401_v34 = vadd.f32 %v7512_v54, %v9499_v10  ;;  %4548 = vrot.lane.b32.xlu1 %v4361_v35, %s7997_s17  ;;  %v3253_v21 = vpop.f32.mrb[61].mxu0  ;;  %v4418_v13 = vld [vmem:[#allocation2 + $0x2ba] sm:$0xff]  ;;  %v4457_v12 = vpack.c.bf16 %v4421_v33, %v4420_v16  ;;  %v3628_v35 = vld [vmem:[#allocation2 + $0x9] sm:$0xff]  ;;  %v5257_v33 = vsel %vm1600_vm3, %v7992_v5, 0 }
 0x305   :  { %v3399_v0 = vadd.f32 %v9499_v10, %v3253_v21  ;;  %4546 = vrot.lane.b32.xlu0 %v4360_v24, %s7997_s17  ;;  %v7513_v20 = vpop.f32.mrb[62].mxu0  ;;  %v4456_v32 = vpack.c.bf16 %v4419_v27, %v4418_v13  ;;  %v3627_v15 = vld [vmem:[#allocation2 + $0x1] sm:$0xff] }
 0x306   :  { %v3465_v17 = vmax.f32 %v3401_v34, 0.0  ;;  %v3402_v59 = vadd.f32 %v7513_v20, %v9499_v10  ;;  %v3256_v57 = vpop.f32.mrb[63].mxu0  ;;  %v4181_v18 = vld [vmem:[#allocation2 + $0x68] sm:$0xff]  ;;  %v9721_v34 = vld [vmem:[%s10869_s3 + $0x18] sm:$0xff]   ;;  %v4180_v21 = vld [vmem:[#allocation2 + $0x60] sm:$0xff]  ;;  %v3691_v27 = vpack.c.bf16 %v3628_v35, %v3627_v15 }
 0x307   :  { %v3463_v11 = vmax.f32 %v3399_v0, 0.0  ;;  %v3400_v53 = vadd.f32 %v9499_v10, %v3256_v57  ;;  %v4328_v51 = vld [vmem:[#allocation2 + $0x301] sm:$0xff]  ;;  %v4241_v0 = vpack.c.bf16 %v4181_v18, %v4180_v21  ;;  %v3724_v57 = vld [vmem:[#allocation2 + $0xa] sm:$0xff] }
 0x308   :  { %3529 = vst.msk [vmem:[#allocation2 + $0x331] sm:$0xff] %vm21_vm0, %v3465_v17  ;;  %v3466_v42 = vmax.f32 %v3402_v59, 0.0  ;;  %4644 = vrot.lane.b32.xlu1 %v4457_v12, %s7996_s16  ;;  %v4326_v46 = vld [vmem:[#allocation2 + $0x2e9] sm:$0xff]  ;;  %v3630_v24 = vld [vmem:[#allocation2 + $0x21] sm:$0xff] }
 0x309   :  { %3527 = vst.msk [vmem:[#allocation2 + $0x319] sm:$0xff] %vm21_vm0, %v3463_v11  ;;  %v3464_v8 = vmax.f32 %v3400_v53, 0.0  ;;  %4642 = vrot.lane.b32.xlu0 %v4456_v32, %s7996_s16  ;;  %v4329_v41 = vld [vmem:[#allocation2 + $0x309] sm:$0xff]  ;;  %v3725_v53 = vld [vmem:[#allocation2 + $0x1a] sm:$0xff] }
 0x30a   :  { %3530 = vst.msk [vmem:[#allocation2 + $0x339] sm:$0xff] %vm21_vm0, %v3466_v42  ;;  %v4363_v14 = vpack.c.bf16 %v4329_v41, %v4328_v51  ;;  %v4327_v55 = vld [vmem:[#allocation2 + $0x2f1] sm:$0xff]  ;;  %v4424_v56 = vld [vmem:[#allocation2 + $0x302] sm:$0xff] }
 0x30b   :  { %3528 = vst.msk [vmem:[#allocation2 + $0x321] sm:$0xff] %vm21_vm0, %v3464_v8  ;;  %v4362_v10 = vpack.c.bf16 %v4327_v55, %v4326_v46  ;;  %v4425_v60 = vld [vmem:[#allocation2 + $0x30a] sm:$0xff]  ;;  %v4423_v31 = vld [vmem:[#allocation2 + $0x2f2] sm:$0xff]  ;;  %v3723_v59 = vld [vmem:[#allocation2 + $0x2] sm:$0xff] }
 0x30c   :  { %4552 = vrot.lane.b32.xlu1 %v4363_v14, %s7997_s17  ;;  %v4422_v44 = vld [vmem:[#allocation2 + $0x2ea] sm:$0xff]  ;;  %v4459_v52 = vpack.c.bf16 %v4425_v60, %v4424_v56  ;;  %v3726_v32 = vld [vmem:[#allocation2 + $0x22] sm:$0xff]  ;;  %v3787_v41 = vpack.c.bf16 %v3724_v57, %v3723_v59  ;;  %v4193_v57 = vld [vmem:[#allocation2 + $0xf8] sm:$0xff] }
 0x30d   :  { %4550 = vrot.lane.b32.xlu0 %v4362_v10, %s7997_s17  ;;  %v4458_v9 = vpack.c.bf16 %v4423_v31, %v4422_v44  ;;  %v4178_v16 = vld [vmem:[#allocation2 + $0x48] sm:$0xff]  ;;  %v4183_v46 = vld [vmem:[#allocation2 + $0x80] sm:$0xff]  ;;  %v3788_v55 = vpack.c.bf16 %v3726_v32, %v3725_v53  ;;  %v4185_v10 = vld [vmem:[#allocation2 + $0x98] sm:$0xff] }
 0x30e   :  { %v4497_v61 = vpop.permute.xlu1 %4496  ;;  %v4240_v13 = vpack.c.bf16 %v4179_v63, %v4178_v16  ;;  %v3634_v60 = vld [vmem:[#allocation2 + $0x51] sm:$0xff]  ;;  %v3632_v31 = vld [vmem:[#allocation2 + $0x39] sm:$0xff]  ;;  %v3635_v18 = vld [vmem:[#allocation2 + $0x61] sm:$0xff] }
 0x30f   :  { %v4495_v50 = vpop.permute.xlu0 %4494  ;;  %v4332_v29 = vld [vmem:[#allocation2 + $0x331] sm:$0xff]  ;;  %v4659_v22 = vsel %vm21_vm0, %v4239_v45, %v4497_v61  ;;  %v3637_v63 = vld [vmem:[#allocation2 + $0x79] sm:$0xff] }
 0x310   :  { %4648 = vrot.lane.b32.xlu1 %v4459_v52, %s7996_s16  ;;  %v4330_v62 = vld [vmem:[#allocation2 + $0x319] sm:$0xff]  ;;  %v4656_v28 = vsel %vm21_vm0, %v4238_v19, %v4495_v50  ;;  %v4184_v61 = vld [vmem:[#allocation2 + $0x90] sm:$0xff] }
 0x311   :  { %4646 = vrot.lane.b32.xlu0 %v4458_v9, %s7996_s16  ;;  %v4333_v43 = vld [vmem:[#allocation2 + $0x339] sm:$0xff]  ;;  %v3633_v52 = vld [vmem:[#allocation2 + $0x49] sm:$0xff]  ;;  %v4243_v48 = vpack.c.bf16 %v4185_v10, %v4184_v61  ;;  %v3642_v53 = vld [vmem:[#allocation2 + $0xb1] sm:$0xff] }
 0x312   :  { %v4593_v3 = vpop.permute.xlu1 %4592  ;;  %v4365_v49 = vpack.c.bf16 %v4333_v43, %v4332_v29  ;;  %v4331_v36 = vld [vmem:[#allocation2 + $0x321] sm:$0xff]  ;;  %v4428_v26 = vld [vmem:[#allocation2 + $0x332] sm:$0xff]  ;;  %v9735_v9 = vpack.c.bf16 %v3634_v60, %v3633_v52  ;;  %v9738_v29 = vpack.c.bf16 %v3632_v31, %v3631_v37  ;;  %v3729_v43 = vld [vmem:[#allocation2 + $0x4a] sm:$0xff] }
 0x313   :  { %v4591_v23 = vpop.permute.xlu0 %4590  ;;  %v4364_v39 = vpack.c.bf16 %v4331_v36, %v4330_v62  ;;  %v4429_v30 = vld [vmem:[#allocation2 + $0x33a] sm:$0xff]  ;;  %v4427_v47 = vld [vmem:[#allocation2 + $0x322] sm:$0xff]  ;;  %v4753_v2 = vsel %vm814_vm4, %v4659_v22, %v4593_v3  ;;  %v3730_v45 = vld [vmem:[#allocation2 + $0x52] sm:$0xff] }
 0x314   :  { %4556 = vrot.lane.b32.xlu1 %v4365_v49, %s7997_s17  ;;  %v4751_v1 = vsel %vm814_vm4, %v4656_v28, %v4591_v23  ;;  %v4426_v25 = vld [vmem:[#allocation2 + $0x31a] sm:$0xff]  ;;  %v4461_v38 = vpack.c.bf16 %v4429_v30, %v4428_v26  ;;  %v3727_v62 = vld [vmem:[#allocation2 + $0x32] sm:$0xff]  ;;  %v9749_v26 = vpack.c.bf16 %v3730_v45, %v3729_v43  ;;  %v4189_v30 = vld [vmem:[#allocation2 + $0xc8] sm:$0xff] }
 0x315   :  { %7518 = vmatprep.mubr.msk.bf16.mxu1 %vm1535_vm5, %v4751_v1  ;;  %4554 = vrot.lane.b32.xlu0 %v4364_v39, %s7997_s17  ;;  %v4460_v54 = vpack.c.bf16 %v4427_v47, %v4426_v25  ;;  %v4182_v44 = vld [vmem:[#allocation2 + $0x78] sm:$0xff]  ;;  %v4187_v39 = vld [vmem:[#allocation2 + $0xb0] sm:$0xff]  ;;  %v3638_v25 = vld [vmem:[#allocation2 + $0x81] sm:$0xff] }
 0x316   :  { %7519 = vmatmul.mubr.msk.bf16.vlgmr.msra.gmra.mrb[0].mxu1 %vm1535_vm5, %v4753_v2  ;;  %v4501_v4 = vpop.permute.xlu1 %4500  ;;  %v4242_v40 = vpack.c.bf16 %v4183_v46, %v4182_v44  ;;  %v3728_v36 = vld [vmem:[#allocation2 + $0x3a] sm:$0xff]  ;;  %v4186_v47 = vld [vmem:[#allocation2 + $0xa8] sm:$0xff]  ;;  %v9757_v35 = vpack.c.bf16 %v3638_v25, %v3637_v63  ;;  %v3639_v10 = vld [vmem:[#allocation2 + $0x91] sm:$0xff] }
 0x317   :  { %7583 = vmatpush3.bf16.msra.mxu1 %v9522_v7  ;;  %v4499_v58 = vpop.permute.xlu0 %4498  ;;  %v3629_v7 = vld [vmem:[#allocation2 + $0x19] sm:$0xff]  ;;  %v4665_v42 = vsel %vm21_vm0, %v4241_v0, %v4501_v4  ;;  %v9751_v1 = vpack.c.bf16 %v3728_v36, %v3727_v62  ;;  %v4244_v4 = vpack.c.bf16 %v4187_v39, %v4186_v47  ;;  %v3737_v31 = vld [vmem:[#allocation2 + $0xaa] sm:$0xff]  ;;  %v3646_v62 = vld [vmem:[#allocation2 + $0xe1] sm:$0xff] }
 0x318   :  { %4652 = vrot.lane.b32.xlu1 %v4461_v38, %s7996_s16  ;;  %7978 = vmatprep.subr.msk.bf16.mxu1 %vm1600_vm3, %v7992_v5  ;;  %v3692_v17 = vpack.c.bf16 %v3630_v24, %v3629_v7  ;;  %v4662_v12 = vsel %vm21_vm0, %v4240_v13, %v4499_v58  ;;  %v3636_v5 = vld [vmem:[#allocation2 + $0x69] sm:$0xff]  ;;  %v4188_v2 = vld [vmem:[#allocation2 + $0xc0] sm:$0xff]  ;;  %v4190_v32 = vld [vmem:[#allocation2 + $0xd8] sm:$0xff] }
 0x319   :  { %4650 = vrot.lane.b32.xlu0 %v4460_v54, %s7996_s16  ;;  %v4245_v38 = vpack.c.bf16 %v4189_v30, %v4188_v2  ;;  %v9760_v24 = vpack.c.bf16 %v3636_v5, %v3635_v18  ;;  %v3733_v16 = vld [vmem:[#allocation2 + $0x7a] sm:$0xff]  ;;  %v3731_v7 = vld [vmem:[#allocation2 + $0x62] sm:$0xff]  ;;  %v3738_v61 = vld [vmem:[#allocation2 + $0xb2] sm:$0xff] }
 0x31a   :  { %v4597_v20 = vpop.permute.xlu1 %4596  ;;  %v9793_v43 = vpack.c.bf16 %v3738_v61, %v3737_v31  ;;  %v4197_v45 = vld [vmem:[#allocation2 + $0x128] sm:$0xff]  ;;  %v3645_v30 = vld [vmem:[#allocation2 + $0xd9] sm:$0xff] }
 0x31b   :  { %v4595_v11 = vpop.permute.xlu0 %4594  ;;  %7585 = vmatpush3.bf16.msra.mxu1 %v5257_v33  ;;  %v4757_v51 = vsel %vm814_vm4, %v4665_v42, %v4597_v20  ;;  %v3734_v33 = vld [vmem:[#allocation2 + $0x82] sm:$0xff]  ;;  %v3640_v42 = vld [vmem:[#allocation2 + $0x99] sm:$0xff]  ;;  %v9801_v47 = vpack.c.bf16 %v3646_v62, %v3645_v30 }
 0x31c   :  { %v4755_v8 = vsel %vm814_vm4, %v4662_v12, %v4595_v11  ;;  %3853 = vrot.lane.b32.xlu1 %v3692_v17, %s7997_s17  ;;  %7650 = vmatprep.subr.bf16.mxu1 %v9721_v34  ;;  %v4191_v17 = vld [vmem:[#allocation2 + $0xe0] sm:$0xff]  ;;  %v9771_v59 = vpack.c.bf16 %v3734_v33, %v3733_v16  ;;  %v9782_v44 = vpack.c.bf16 %v3640_v42, %v3639_v10  ;;  %v4194_v36 = vld [vmem:[#allocation2 + $0x108] sm:$0xff]  ;;  %v3746_v31 = vld [vmem:[#allocation2 + $0x112] sm:$0xff] }
 0x31d   :  { %7522 = vmatprep.mubr.msk.bf16.mxu1 %vm1535_vm5, %v4755_v8  ;;  %3851 = vrot.lane.b32.xlu0 %v3691_v27, %s7997_s17  ;;  %v3732_v27 = vld [vmem:[#allocation2 + $0x6a] sm:$0xff]  ;;  %v3643_v5 = vld [vmem:[#allocation2 + $0xc1] sm:$0xff] }
 0x31e   :  { %7523 = vmatmul.mubr.msk.bf16.gmra.mrb[4].mxu1 %vm1535_vm5, %v4757_v51  ;;  %v4505_v14 = vpop.permute.xlu1 %4504  ;;  %v9773_v11 = vpack.c.bf16 %v3732_v27, %v3731_v7  ;;  %v4192_v8 = vld [vmem:[#allocation2 + $0xf0] sm:$0xff]  ;;  %v4246_v51 = vpack.c.bf16 %v4191_v17, %v4190_v32  ;;  %v4201_v27 = vld [vmem:[#allocation2 + $0x158] sm:$0xff] }
 0x31f   :  { %v4503_v56 = vpop.permute.xlu0 %4502  ;;  %v4671_v3 = vsel %vm21_vm0, %v4243_v48, %v4505_v14  ;;  %v4247_v14 = vpack.c.bf16 %v4193_v57, %v4192_v8  ;;  %v3735_v48 = vld [vmem:[#allocation2 + $0x92] sm:$0xff]  ;;  %v3740_v16 = vld [vmem:[#allocation2 + $0xca] sm:$0xff] }
 0x320   :  { %3949 = vrot.lane.b32.xlu1 %v3788_v55, %s7996_s16  ;;  %v4668_v6 = vsel %vm21_vm0, %v4242_v40, %v4503_v56  ;;  %v3650_v17 = vld [vmem:[#allocation2 + $0x111] sm:$0xff]  ;;  %v3649_v42 = vld [vmem:[#allocation2 + $0x109] sm:$0xff] }
 0x321   :  { %3947 = vrot.lane.b32.xlu0 %v3787_v41, %s7996_s16  ;;  %v3641_v41 = vld [vmem:[#allocation2 + $0xa9] sm:$0xff]  ;;  %v4198_v57 = vld [vmem:[#allocation2 + $0x138] sm:$0xff] }
 0x322   :  { %v4601_v50 = vpop.permute.xlu1 %4600  ;;  %v9779_v55 = vpack.c.bf16 %v3642_v53, %v3641_v41  ;;  %v4200_v53 = vld [vmem:[#allocation2 + $0x150] sm:$0xff]  ;;  %v9823_v41 = vpack.c.bf16 %v3650_v17, %v3649_v42 }
 0x323   :  { %v4599_v19 = vpop.permute.xlu0 %4598  ;;  %v4761_v28 = vsel %vm814_vm4, %v4671_v3, %v4601_v50  ;;  %v3736_v50 = vld [vmem:[#allocation2 + $0x9a] sm:$0xff]  ;;  %v4251_v8 = vpack.c.bf16 %v4201_v27, %v4200_v53  ;;  %v4207_v17 = vld [vmem:[#allocation2 + $0x1d0] sm:$0xff] }
 0x324   :  { %v4759_v49 = vsel %vm814_vm4, %v4668_v6, %v4599_v19  ;;  %3857 = vrot.lane.b32.xlu1 %v9735_v9, %s7997_s17  ;;  %v4195_v19 = vld [vmem:[#allocation2 + $0x110] sm:$0xff] }
 0x325   :  { %7526 = vmatprep.mubr.msk.bf16.mxu1 %vm1535_vm5, %v4759_v49  ;;  %3855 = vrot.lane.b32.xlu0 %v9738_v29, %s7997_s17  ;;  %v9795_v49 = vpack.c.bf16 %v3736_v50, %v3735_v48  ;;  %v4248_v39 = vpack.c.bf16 %v4195_v19, %v4194_v36  ;;  %v3744_v48 = vld [vmem:[#allocation2 + $0xfa] sm:$0xff]  ;;  %v3658_v42 = vld [vmem:[#allocation2 + $0x171] sm:$0xff] }
 0x326   :  { %7527 = vmatmul.mubr.msk.bf16.gmra.mrb[8].mxu1 %vm1535_vm5, %v4761_v28  ;;  %v4509_v23 = vpop.permute.xlu1 %4508  ;;  %v3644_v28 = vld [vmem:[#allocation2 + $0xc9] sm:$0xff]  ;;  %v3654_v36 = vld [vmem:[#allocation2 + $0x141] sm:$0xff] }
 0x327   :  { %v4507_v22 = vpop.permute.xlu0 %4506  ;;  %v4677_v21 = vsel %vm21_vm0, %v4245_v38, %v4509_v23  ;;  %v4196_v23 = vld [vmem:[#allocation2 + $0x120] sm:$0xff]  ;;  %v9804_v63 = vpack.c.bf16 %v3644_v28, %v3643_v5  ;;  %v4202_v28 = vld [vmem:[#allocation2 + $0x168] sm:$0xff] }
 0x328   :  { %3953 = vrot.lane.b32.xlu1 %v9749_v26, %s7996_s16  ;;  %v4674_v58 = vsel %vm21_vm0, %v4244_v4, %v4507_v22  ;;  %v4249_v22 = vpack.c.bf16 %v4197_v45, %v4196_v23  ;;  %v3741_v38 = vld [vmem:[#allocation2 + $0xda] sm:$0xff]  ;;  %v4205_v45 = vld [vmem:[#allocation2 + $0x188] sm:$0xff] }
 0x329   :  { %3951 = vrot.lane.b32.xlu0 %v9751_v1, %s7996_s16  ;;  %v3652_v23 = vld [vmem:[#allocation2 + $0x129] sm:$0xff] }
 0x32a   :  { %v4605_v15 = vpop.permute.xlu1 %4604 }
 0x32b   :  { %v4603_v54 = vpop.permute.xlu0 %4602  ;;  %v4765_v0 = vsel %vm814_vm4, %v4677_v21, %v4605_v15  ;;  %v3742_v15 = vld [vmem:[#allocation2 + $0xe2] sm:$0xff] }
 0x32c   :  { %v4763_v13 = vsel %vm814_vm4, %v4674_v58, %v4603_v54  ;;  %3861 = vrot.lane.b32.xlu1 %v9757_v35, %s7997_s17  ;;  %v3739_v54 = vld [vmem:[#allocation2 + $0xc2] sm:$0xff]  ;;  %v9815_v7 = vpack.c.bf16 %v3742_v15, %v3741_v38 }
 0x32d   :  { %7530 = vmatprep.mubr.msk.bf16.mxu1 %vm1535_vm5, %v4763_v13  ;;  %3859 = vrot.lane.b32.xlu0 %v9760_v24, %s7997_s17  ;;  %v4199_v13 = vld [vmem:[#allocation2 + $0x140] sm:$0xff] }
 0x32e   :  { %7531 = vmatmul.mubr.msk.bf16.gmra.mrb[12].mxu1 %vm1535_vm5, %v4765_v0  ;;  %v4513_v20 = vpop.permute.xlu1 %4512  ;;  %v4250_v32 = vpack.c.bf16 %v4199_v13, %v4198_v57  ;;  %v3748_v13 = vld [vmem:[#allocation2 + $0x12a] sm:$0xff] }
 0x32f   :  { %v4511_v12 = vpop.permute.xlu0 %4510  ;;  %v4683_v40 = vsel %vm21_vm0, %v4247_v14, %v4513_v20  ;;  %v9817_v20 = vpack.c.bf16 %v3740_v16, %v3739_v54  ;;  %v3647_v14 = vld [vmem:[#allocation2 + $0xf1] sm:$0xff]  ;;  %v3750_v54 = vld [vmem:[#allocation2 + $0x142] sm:$0xff] }
 0x330   :  { %3957 = vrot.lane.b32.xlu1 %v9771_v59, %s7996_s16  ;;  %v4680_v56 = vsel %vm21_vm0, %v4246_v51, %v4511_v12  ;;  %v3648_v12 = vld [vmem:[#allocation2 + $0xf9] sm:$0xff] }
 0x331   :  { %3955 = vrot.lane.b32.xlu0 %v9773_v11, %s7996_s16 }
 0x332   :  { %v4609_v46 = vpop.permute.xlu1 %4608 }
 0x333   :  { %v4607_v60 = vpop.permute.xlu0 %4606  ;;  %v4769_v37 = vsel %vm814_vm4, %v4683_v40, %v4609_v46 }
 0x334   :  { %v4767_v52 = vsel %vm814_vm4, %v4680_v56, %v4607_v60  ;;  %3865 = vrot.lane.b32.xlu1 %v9779_v55, %s7997_s17  ;;  %v9826_v56 = vpack.c.bf16 %v3648_v12, %v3647_v14  ;;  %v3745_v60 = vld [vmem:[#allocation2 + $0x10a] sm:$0xff]  ;;  %v4208_v14 = vld [vmem:[#allocation2 + $0x1e0] sm:$0xff] }
 0x335   :  { %7534 = vmatprep.mubr.msk.bf16.mxu1 %vm1535_vm5, %v4767_v52  ;;  %3863 = vrot.lane.b32.xlu0 %v9782_v44, %s7997_s17  ;;  %v3743_v52 = vld [vmem:[#allocation2 + $0xf2] sm:$0xff]  ;;  %v9837_v19 = vpack.c.bf16 %v3746_v31, %v3745_v60  ;;  %v4209_v12 = vld [vmem:[#allocation2 + $0x1e8] sm:$0xff] }
 0x336   :  { %7535 = vmatmul.mubr.msk.bf16.gmra.mrb[16].mxu1 %vm1535_vm5, %v4769_v37  ;;  %v4517_v6 = vpop.permute.xlu1 %4516  ;;  %v9839_v62 = vpack.c.bf16 %v3744_v48, %v3743_v52  ;;  %v4255_v60 = vpack.c.bf16 %v4209_v12, %v4208_v14  ;;  %v3755_v12 = vld [vmem:[#allocation2 + $0x1b2] sm:$0xff] }
 0x337   :  { %v4515_v3 = vpop.permute.xlu0 %4514  ;;  %v4689_v18 = vsel %vm21_vm0, %v4249_v22, %v4517_v6  ;;  %v4203_v6 = vld [vmem:[#allocation2 + $0x170] sm:$0xff]  ;;  %v3653_v22 = vld [vmem:[#allocation2 + $0x139] sm:$0xff] }
 0x338   :  { %3961 = vrot.lane.b32.xlu1 %v9793_v43, %s7996_s16  ;;  %v4686_v2 = vsel %vm21_vm0, %v4248_v39, %v4515_v3  ;;  %v4204_v39 = vld [vmem:[#allocation2 + $0x180] sm:$0xff]  ;;  %v4252_v30 = vpack.c.bf16 %v4203_v6, %v4202_v28  ;;  %v3754_v6 = vld [vmem:[#allocation2 + $0x172] sm:$0xff] }
 0x339   :  { %3959 = vrot.lane.b32.xlu0 %v9795_v49, %s7996_s16  ;;  %v3752_v28 = vld [vmem:[#allocation2 + $0x15a] sm:$0xff]  ;;  %v3758_v14 = vld [vmem:[#allocation2 + $0x1d2] sm:$0xff] }
 0x33a   :  { %v4613_v25 = vpop.permute.xlu1 %4612 }
 0x33b   :  { %v4611_v4 = vpop.permute.xlu0 %4610  ;;  %v4773_v33 = vsel %vm814_vm4, %v4689_v18, %v4613_v25  ;;  %v4253_v25 = vpack.c.bf16 %v4205_v45, %v4204_v39 }
 0x33c   :  { %v4771_v58 = vsel %vm814_vm4, %v4686_v2, %v4611_v4  ;;  %3869 = vrot.lane.b32.xlu1 %v9801_v47, %s7997_s17  ;;  %v9845_v2 = vpack.c.bf16 %v3654_v36, %v3653_v22  ;;  %v3651_v4 = vld [vmem:[#allocation2 + $0x121] sm:$0xff]  ;;  %v3751_v36 = vld [vmem:[#allocation2 + $0x152] sm:$0xff] }
 0x33d   :  { %7538 = vmatprep.mubr.msk.bf16.mxu1 %vm1535_vm5, %v4771_v58  ;;  %3867 = vrot.lane.b32.xlu0 %v9804_v63, %s7997_s17  ;;  %v9848_v18 = vpack.c.bf16 %v3652_v23, %v3651_v4  ;;  %v3749_v58 = vld [vmem:[#allocation2 + $0x13a] sm:$0xff] }
 0x33e   :  { %7539 = vmatmul.mubr.msk.bf16.gmra.mrb[20].mxu1 %vm1535_vm5, %v4773_v33  ;;  %v4521_v21 = vpop.permute.xlu1 %4520  ;;  %v9859_v57 = vpack.c.bf16 %v3750_v54, %v3749_v58  ;;  %v4213_v4 = vld [vmem:[#allocation2 + $0x218] sm:$0xff] }
 0x33f   :  { %v4519_v0 = vpop.permute.xlu0 %4518  ;;  %v4695_v61 = vsel %vm21_vm0, %v4251_v8, %v4521_v21  ;;  %v3747_v21 = vld [vmem:[#allocation2 + $0x122] sm:$0xff]  ;;  %v3662_v58 = vld [vmem:[#allocation2 + $0x1d1] sm:$0xff] }
 0x340   :  { %3965 = vrot.lane.b32.xlu1 %v9815_v7, %s7996_s16  ;;  %v4692_v46 = vsel %vm21_vm0, %v4250_v32, %v4519_v0  ;;  %v9861_v32 = vpack.c.bf16 %v3748_v13, %v3747_v21  ;;  %v4206_v8 = vld [vmem:[#allocation2 + $0x1c8] sm:$0xff]  ;;  %v4210_v54 = vld [vmem:[#allocation2 + $0x1f8] sm:$0xff] }
 0x341   :  { %3963 = vrot.lane.b32.xlu0 %v9817_v20, %s7996_s16  ;;  %v3661_v21 = vld [vmem:[#allocation2 + $0x1c9] sm:$0xff] }
 0x342   :  { %v4617_v51 = vpop.permute.xlu1 %4616 }
 0x343   :  { %v4615_v10 = vpop.permute.xlu0 %4614  ;;  %v4777_v50 = vsel %vm814_vm4, %v4695_v61, %v4617_v51  ;;  %v3656_v51 = vld [vmem:[#allocation2 + $0x159] sm:$0xff] }
 0x344   :  { %v4775_v40 = vsel %vm814_vm4, %v4692_v46, %v4615_v10  ;;  %3873 = vrot.lane.b32.xlu1 %v9823_v41, %s7997_s17  ;;  %v4254_v46 = vpack.c.bf16 %v4207_v17, %v4206_v8  ;;  %v3657_v10 = vld [vmem:[#allocation2 + $0x169] sm:$0xff]  ;;  %v3708_v17 = vpack.c.bf16 %v3662_v58, %v3661_v21 }
 0x345   :  { %7542 = vmatprep.mubr.msk.bf16.mxu1 %vm1535_vm5, %v4775_v40  ;;  %3871 = vrot.lane.b32.xlu0 %v9826_v56, %s7997_s17  ;;  %v9867_v61 = vpack.c.bf16 %v3658_v42, %v3657_v10  ;;  %v3655_v40 = vld [vmem:[#allocation2 + $0x151] sm:$0xff] }
 0x346   :  { %7543 = vmatmul.mubr.msk.bf16.gmra.mrb[24].mxu1 %vm1535_vm5, %v4777_v50  ;;  %v4525_v37 = vpop.permute.xlu1 %4524  ;;  %v9870_v50 = vpack.c.bf16 %v3656_v51, %v3655_v40  ;;  %v3757_v51 = vld [vmem:[#allocation2 + $0x1ca] sm:$0xff] }
 0x347   :  { %v4523_v3 = vpop.permute.xlu0 %4522  ;;  %v4701_v16 = vsel %vm21_vm0, %v4253_v25, %v4525_v37  ;;  %v3753_v37 = vld [vmem:[#allocation2 + $0x16a] sm:$0xff] }
 0x348   :  { %3969 = vrot.lane.b32.xlu1 %v9837_v19, %s7996_s16  ;;  %v4698_v38 = vsel %vm21_vm0, %v4252_v30, %v4523_v3  ;;  %v4211_v30 = vld [vmem:[#allocation2 + $0x200] sm:$0xff]  ;;  %v9881_v22 = vpack.c.bf16 %v3754_v6, %v3753_v37  ;;  %v3659_v25 = vld [vmem:[#allocation2 + $0x1b1] sm:$0xff]  ;;  %v4217_v37 = vld [vmem:[#allocation2 + $0x248] sm:$0xff] }
 0x349   :  { %3967 = vrot.lane.b32.xlu0 %v9839_v62, %s7996_s16 }
 0x34a   :  { %v4621_v5 = vpop.permute.xlu1 %4620 }
 0x34b   :  { %v4619_v15 = vpop.permute.xlu0 %4618  ;;  %v4781_v27 = vsel %vm814_vm4, %v4701_v16, %v4621_v5  ;;  %v3660_v5 = vld [vmem:[#allocation2 + $0x1b9] sm:$0xff]  ;;  %v4212_v16 = vld [vmem:[#allocation2 + $0x210] sm:$0xff] }
 0x34c   :  { %v4779_v33 = vsel %vm814_vm4, %v4698_v38, %v4619_v15  ;;  %3877 = vrot.lane.b32.xlu1 %v9845_v2, %s7997_s17  ;;  %v9883_v15 = vpack.c.bf16 %v3752_v28, %v3751_v36  ;;  %v3707_v13 = vpack.c.bf16 %v3660_v5, %v3659_v25  ;;  %v3664_v36 = vld [vmem:[#allocation2 + $0x1e9] sm:$0xff]  ;;  %v4216_v28 = vld [vmem:[#allocation2 + $0x240] sm:$0xff] }
 0x34d   :  { %7546 = vmatprep.mubr.msk.bf16.mxu1 %vm1535_vm5, %v4779_v33  ;;  %3875 = vrot.lane.b32.xlu0 %v9848_v18, %s7997_s17  ;;  %v4256_v33 = vpack.c.bf16 %v4211_v30, %v4210_v54  ;;  %v4259_v30 = vpack.c.bf16 %v4217_v37, %v4216_v28 }
 0x34e   :  { %7547 = vmatmul.mubr.msk.bf16.gmra.mrb[28].mxu1 %vm1535_vm5, %v4781_v27  ;;  %v4529_v0 = vpop.permute.xlu1 %4528  ;;  %v4257_v27 = vpack.c.bf16 %v4213_v4, %v4212_v16  ;;  %v3663_v4 = vld [vmem:[#allocation2 + $0x1e1] sm:$0xff] }
 0x34f   :  { %v4527_v53 = vpop.permute.xlu0 %4526  ;;  %v4707_v45 = vsel %vm21_vm0, %v4255_v60, %v4529_v0  ;;  %v9902_v54 = vpack.c.bf16 %v3664_v36, %v3663_v4  ;;  %v3761_v16 = vld [vmem:[#allocation2 + $0x1fa] sm:$0xff]  ;;  %v3763_v4 = vld [vmem:[#allocation2 + $0x212] sm:$0xff] }
 0x350   :  { %3973 = vrot.lane.b32.xlu1 %v9859_v57, %s7996_s16  ;;  %v4704_v52 = vsel %vm21_vm0, %v4254_v46, %v4527_v53  ;;  %v3756_v53 = vld [vmem:[#allocation2 + $0x1ba] sm:$0xff] }
 0x351   :  { %3971 = vrot.lane.b32.xlu0 %v9861_v32, %s7996_s16 }
 0x352   :  { %v4625_v31 = vpop.permute.xlu1 %4624 }
 0x353   :  { %v4623_v48 = vpop.permute.xlu0 %4622  ;;  %v4785_v23 = vsel %vm814_vm4, %v4707_v45, %v4625_v31  ;;  %v3803_v31 = vpack.c.bf16 %v3756_v53, %v3755_v12  ;;  %v3666_v45 = vld [vmem:[#allocation2 + $0x201] sm:$0xff] }
 0x354   :  { %v4783_v3 = vsel %vm814_vm4, %v4704_v52, %v4623_v48  ;;  %3881 = vrot.lane.b32.xlu1 %v9867_v61, %s7997_s17  ;;  %v4215_v52 = vld [vmem:[#allocation2 + $0x230] sm:$0xff]  ;;  %v3804_v48 = vpack.c.bf16 %v3758_v14, %v3757_v51  ;;  %v4219_v53 = vld [vmem:[#allocation2 + $0x260] sm:$0xff] }
 0x355   :  { %7550 = vmatprep.mubr.msk.bf16.mxu1 %vm1535_vm5, %v4783_v3  ;;  %3879 = vrot.lane.b32.xlu0 %v9870_v50, %s7997_s17  ;;  %v4214_v3 = vld [vmem:[#allocation2 + $0x228] sm:$0xff] }
 0x356   :  { %7551 = vmatmul.mubr.msk.bf16.gmra.mrb[32].mxu1 %vm1535_vm5, %v4785_v23  ;;  %v4533_v39 = vpop.permute.xlu1 %4532  ;;  %v4258_v23 = vpack.c.bf16 %v4215_v52, %v4214_v3  ;;  %v3669_v52 = vld [vmem:[#allocation2 + $0x229] sm:$0xff] }
 0x357   :  { %v4531_v38 = vpop.permute.xlu0 %4530  ;;  %v4713_v46 = vsel %vm21_vm0, %v4257_v27, %v4533_v39  ;;  %v3665_v39 = vld [vmem:[#allocation2 + $0x1f9] sm:$0xff]  ;;  %v3759_v27 = vld [vmem:[#allocation2 + $0x1e2] sm:$0xff] }
 0x358   :  { %3977 = vrot.lane.b32.xlu1 %v9881_v22, %s7996_s16  ;;  %v4710_v42 = vsel %vm21_vm0, %v4256_v33, %v4531_v38  ;;  %v9899_v5 = vpack.c.bf16 %v3666_v45, %v3665_v39  ;;  %v3762_v33 = vld [vmem:[#allocation2 + $0x202] sm:$0xff]  ;;  %v3667_v45 = vld [vmem:[#allocation2 + $0x211] sm:$0xff] }
 0x359   :  { %3975 = vrot.lane.b32.xlu0 %v9883_v15, %s7996_s16  ;;  %v3766_v39 = vld [vmem:[#allocation2 + $0x232] sm:$0xff] }
 0x35a   :  { %v4629_v0 = vpop.permute.xlu1 %4628 }
 0x35b   :  { %v4627_v8 = vpop.permute.xlu0 %4626  ;;  %v4789_v60 = vsel %vm814_vm4, %v4713_v46, %v4629_v0  ;;  %v3760_v0 = vld [vmem:[#allocation2 + $0x1ea] sm:$0xff] }
 0x35c   :  { %v4787_v10 = vsel %vm814_vm4, %v4710_v42, %v4627_v8  ;;  %3885 = vrot.lane.b32.xlu1 %v3708_v17, %s7997_s17  ;;  %v9913_v42 = vpack.c.bf16 %v3762_v33, %v3761_v16  ;;  %v4221_v8 = vld [vmem:[#allocation2 + $0x278] sm:$0xff]  ;;  %v9915_v14 = vpack.c.bf16 %v3760_v0, %v3759_v27  ;;  %v4223_v33 = vld [vmem:[#allocation2 + $0x290] sm:$0xff] }
 0x35d   :  { %7554 = vmatprep.mubr.msk.bf16.mxu1 %vm1535_vm5, %v4787_v10  ;;  %3883 = vrot.lane.b32.xlu0 %v3707_v13, %s7997_s17  ;;  %v3670_v46 = vld [vmem:[#allocation2 + $0x231] sm:$0xff] }
 0x35e   :  { %7555 = vmatmul.mubr.msk.bf16.gmra.mrb[36].mxu1 %vm1535_vm5, %v4789_v60  ;;  %v4537_v40 = vpop.permute.xlu1 %4536  ;;  %v4218_v10 = vld [vmem:[#allocation2 + $0x258] sm:$0xff] }
 0x35f   :  { %v4535_v6 = vpop.permute.xlu0 %4534  ;;  %v4719_v21 = vsel %vm21_vm0, %v4259_v30, %v4537_v40  ;;  %v3668_v60 = vld [vmem:[#allocation2 + $0x219] sm:$0xff]  ;;  %v4260_v40 = vpack.c.bf16 %v4219_v53, %v4218_v10  ;;  %v3672_v53 = vld [vmem:[#allocation2 + $0x249] sm:$0xff] }
 0x360   :  { %3981 = vrot.lane.b32.xlu1 %v3804_v48, %s7996_s16  ;;  %v4716_v38 = vsel %vm21_vm0, %v4258_v23, %v4535_v6  ;;  %v9921_v6 = vpack.c.bf16 %v3670_v46, %v3669_v52  ;;  %v9924_v28 = vpack.c.bf16 %v3668_v60, %v3667_v45  ;;  %v3765_v23 = vld [vmem:[#allocation2 + $0x22a] sm:$0xff]  ;;  %v3673_v46 = vld [vmem:[#allocation2 + $0x259] sm:$0xff] }
 0x361   :  { %3979 = vrot.lane.b32.xlu0 %v3803_v31, %s7996_s16  ;;  %v4220_v31 = vld [vmem:[#allocation2 + $0x270] sm:$0xff]  ;;  %v3769_v45 = vld [vmem:[#allocation2 + $0x25a] sm:$0xff] }
 0x362   :  { %v4633_v25 = vpop.permute.xlu1 %4632  ;;  %v4261_v48 = vpack.c.bf16 %v4221_v8, %v4220_v31  ;;  %v4224_v8 = vld [vmem:[#allocation2 + $0x2a0] sm:$0xff] }
 0x363   :  { %v4631_v58 = vpop.permute.xlu0 %4630  ;;  %v4793_v17 = vsel %vm814_vm4, %v4719_v21, %v4633_v25  ;;  %v9935_v21 = vpack.c.bf16 %v3766_v39, %v3765_v23  ;;  %v3767_v39 = vld [vmem:[#allocation2 + $0x242] sm:$0xff] }
 0x364   :  { %v4791_v13 = vsel %vm814_vm4, %v4716_v38, %v4631_v58  ;;  %3889 = vrot.lane.b32.xlu1 %v9899_v5, %s7997_s17  ;;  %v3764_v38 = vld [vmem:[#allocation2 + $0x21a] sm:$0xff] }
 0x365   :  { %7558 = vmatprep.mubr.msk.bf16.mxu1 %vm1535_vm5, %v4791_v13  ;;  %3887 = vrot.lane.b32.xlu0 %v9902_v54, %s7997_s17  ;;  %v4225_v13 = vld [vmem:[#allocation2 + $0x2a8] sm:$0xff]  ;;  %v9937_v0 = vpack.c.bf16 %v3764_v38, %v3763_v4  ;;  %v4227_v38 = vld [vmem:[#allocation2 + $0x2c0] sm:$0xff] }
 0x366   :  { %7559 = vmatmul.mubr.msk.bf16.gmra.mrb[40].mxu1 %vm1535_vm5, %v4793_v17  ;;  %v4541_v12 = vpop.permute.xlu1 %4540  ;;  %v3674_v17 = vld [vmem:[#allocation2 + $0x261] sm:$0xff]  ;;  %v4263_v10 = vpack.c.bf16 %v4225_v13, %v4224_v8 }
 0x367   :  { %v4539_v51 = vpop.permute.xlu0 %4538  ;;  %v4725_v30 = vsel %vm21_vm0, %v4261_v48, %v4541_v12  ;;  %v4222_v12 = vld [vmem:[#allocation2 + $0x288] sm:$0xff]  ;;  %v9943_v31 = vpack.c.bf16 %v3674_v17, %v3673_v46  ;;  %v4226_v17 = vld [vmem:[#allocation2 + $0x2b8] sm:$0xff] }
 0x368   :  { %3985 = vrot.lane.b32.xlu1 %v9913_v42, %s7996_s16  ;;  %v4722_v3 = vsel %vm21_vm0, %v4260_v40, %v4539_v51  ;;  %v4262_v51 = vpack.c.bf16 %v4223_v33, %v4222_v12  ;;  %v3671_v40 = vld [vmem:[#allocation2 + $0x241] sm:$0xff]  ;;  %v3676_v12 = vld [vmem:[#allocation2 + $0x279] sm:$0xff]  ;;  %v4264_v8 = vpack.c.bf16 %v4227_v38, %v4226_v17 }
 0x369   :  { %3983 = vrot.lane.b32.xlu0 %v9915_v14, %s7996_s16 }
 0x36a   :  { %v4637_v37 = vpop.permute.xlu1 %4636 }
 0x36b   :  { %v4635_v36 = vpop.permute.xlu0 %4634  ;;  %v4797_v58 = vsel %vm814_vm4, %v4725_v30, %v4637_v37  ;;  %v9946_v37 = vpack.c.bf16 %v3672_v53, %v3671_v40  ;;  %v3768_v30 = vld [vmem:[#allocation2 + $0x24a] sm:$0xff] }
 0x36c   :  { %v4795_v25 = vsel %vm814_vm4, %v4722_v3, %v4635_v36  ;;  %3893 = vrot.lane.b32.xlu1 %v9921_v6, %s7997_s17  ;;  %v3770_v3 = vld [vmem:[#allocation2 + $0x262] sm:$0xff]  ;;  %v9959_v13 = vpack.c.bf16 %v3768_v30, %v3767_v39  ;;  %v4228_v53 = vld [vmem:[#allocation2 + $0x2d0] sm:$0xff] }
 0x36d   :  { %7562 = vmatprep.mubr.msk.bf16.mxu1 %vm1535_vm5, %v4795_v25  ;;  %3891 = vrot.lane.b32.xlu0 %v9924_v28, %s7997_s17  ;;  %v3675_v40 = vld [vmem:[#allocation2 + $0x271] sm:$0xff] }
 0x36e   :  { %7563 = vmatmul.mubr.msk.bf16.gmra.mrb[44].mxu1 %vm1535_vm5, %v4797_v58  ;;  %v4545_v16 = vpop.permute.xlu1 %4544  ;;  %v9957_v58 = vpack.c.bf16 %v3770_v3, %v3769_v45  ;;  %v9968_v45 = vpack.c.bf16 %v3676_v12, %v3675_v40  ;;  %v3773_v3 = vld [vmem:[#allocation2 + $0x28a] sm:$0xff]  ;;  %v3771_v30 = vld [vmem:[#allocation2 + $0x272] sm:$0xff] }
 0x36f   :  { %v4543_v27 = vpop.permute.xlu0 %4542  ;;  %v4731_v36 = vsel %vm21_vm0, %v4263_v10, %v4545_v16  ;;  %v4229_v16 = vld [vmem:[#allocation2 + $0x2d8] sm:$0xff] }
 0x370   :  { %3989 = vrot.lane.b32.xlu1 %v9935_v21, %s7996_s16  ;;  %v4728_v52 = vsel %vm21_vm0, %v4262_v51, %v4543_v27  ;;  %v3678_v27 = vld [vmem:[#allocation2 + $0x291] sm:$0xff]  ;;  %v3677_v51 = vld [vmem:[#allocation2 + $0x289] sm:$0xff]  ;;  %v4265_v46 = vpack.c.bf16 %v4229_v16, %v4228_v53  ;;  %11009 = vst [vmem:[#allocation67_spill] sm:$0xff] %v9968_v45  ;;  %v3682_v53 = vld [vmem:[#allocation2 + $0x2c1] sm:$0xff] }
 0x371   :  { %3987 = vrot.lane.b32.xlu0 %v9937_v0, %s7996_s16  ;;  %v3681_v40 = vld [vmem:[#allocation2 + $0x2b9] sm:$0xff] }
 0x372   :  { %v4641_v60 = vpop.permute.xlu1 %4640 }
 0x373   :  { %v4639_v48 = vpop.permute.xlu0 %4638  ;;  %v4801_v25 = vsel %vm814_vm4, %v4731_v36, %v4641_v60  ;;  %v9965_v60 = vpack.c.bf16 %v3678_v27, %v3677_v51  ;;  %v3774_v36 = vld [vmem:[#allocation2 + $0x292] sm:$0xff]  ;;  %v3680_v51 = vld [vmem:[#allocation2 + $0x2a9] sm:$0xff] }
 0x374   :  { %v4799_v23 = vsel %vm814_vm4, %v4728_v52, %v4639_v48  ;;  %3897 = vrot.lane.b32.xlu1 %v9943_v31, %s7997_s17  ;;  %v9979_v27 = vpack.c.bf16 %v3774_v36, %v3773_v3  ;;  %v9987_v3 = vpack.c.bf16 %v3682_v53, %v3681_v40  ;;  %v3679_v36 = vld [vmem:[#allocation2 + $0x2a1] sm:$0xff] }
 0x375   :  { %7566 = vmatprep.mubr.msk.bf16.mxu1 %vm1535_vm5, %v4799_v23  ;;  %3895 = vrot.lane.b32.xlu0 %v9946_v37, %s7997_s17 }
 0x376   :  { %7567 = vmatmul.mubr.msk.bf16.gmra.mrb[48].mxu1 %vm1535_vm5, %v4801_v25  ;;  %v4549_v4 = vpop.permute.xlu1 %4548  ;;  %v3772_v25 = vld [vmem:[#allocation2 + $0x27a] sm:$0xff]  ;;  %11010 = vst [vmem:[#allocation68_spill] sm:$0xff] %v9979_v27  ;;  %11012 = vst [vmem:[#allocation70_spill] sm:$0xff] %v9987_v3 }
 0x377   :  { %v4547_v33 = vpop.permute.xlu0 %4546  ;;  %v4737_v23 = vsel %vm21_vm0, %v4265_v46, %v4549_v4  ;;  %v4233_v4 = vld [vmem:[#allocation2 + $0x308] sm:$0xff]  ;;  %v9981_v12 = vpack.c.bf16 %v3772_v25, %v3771_v30  ;;  %v4232_v46 = vld [vmem:[#allocation2 + $0x300] sm:$0xff]  ;;  %v9990_v30 = vpack.c.bf16 %v3680_v51, %v3679_v36  ;;  %v4234_v36 = vld [vmem:[#allocation2 + $0x318] sm:$0xff] }
 0x378   :  { %3993 = vrot.lane.b32.xlu1 %v9957_v58, %s7996_s16  ;;  %v4734_v52 = vsel %vm21_vm0, %v4264_v8, %v4547_v33  ;;  %v4231_v33 = vld [vmem:[#allocation2 + $0x2f0] sm:$0xff]  ;;  %v4230_v8 = vld [vmem:[#allocation2 + $0x2e8] sm:$0xff]  ;;  %v3777_v25 = vld [vmem:[#allocation2 + $0x2ba] sm:$0xff] }
 0x379   :  { %3991 = vrot.lane.b32.xlu0 %v9959_v13, %s7996_s16  ;;  %11011 = vst [vmem:[#allocation69_spill] sm:$0xff] %v9981_v12  ;;  %11013 = vst [vmem:[#allocation71_spill] sm:$0xff] %v9990_v30  ;;  %v4235_v51 = vld [vmem:[#allocation2 + $0x320] sm:$0xff] }
 0x37a   :  { %v4645_v10 = vpop.permute.xlu1 %4644 }
 0x37b   :  { %v4643_v48 = vpop.permute.xlu0 %4642  ;;  %v4805_v38 = vsel %vm814_vm4, %v4737_v23, %v4645_v10  ;;  %v4266_v10 = vpack.c.bf16 %v4231_v33, %v4230_v8  ;;  %v3775_v8 = vld [vmem:[#allocation2 + $0x2a2] sm:$0xff] }
 0x37c   :  { %v4803_v39 = vsel %vm814_vm4, %v4734_v52, %v4643_v48  ;;  %3901 = vrot.lane.b32.xlu1 %v9965_v60, %s7997_s17  ;;  %v4267_v52 = vpack.c.bf16 %v4233_v4, %v4232_v46  ;;  %v3776_v4 = vld [vmem:[#allocation2 + $0x2aa] sm:$0xff] }
 0x37d   :  { %7570 = vmatprep.mubr.msk.bf16.mxu1 %vm1535_vm5, %v4803_v39  ;;  %3899 = vrot.lane.b32.xlu0 %v9968_v45, %s7997_s17  ;;  %v10003_v40 = vpack.c.bf16 %v3776_v4, %v3775_v8 }
 0x37e   :  { %7571 = vmatmul.mubr.msk.bf16.gmra.mrb[52].mxu1 %vm1535_vm5, %v4805_v38  ;;  %v4553_v16 = vpop.permute.xlu1 %4552  ;;  %v3778_v38 = vld [vmem:[#allocation2 + $0x2c2] sm:$0xff] }
 0x37f   :  { %v4551_v17 = vpop.permute.xlu0 %4550  ;;  %v10001_v46 = vpack.c.bf16 %v3778_v38, %v3777_v25  ;;  %v3683_v38 = vld [vmem:[#allocation2 + $0x2d1] sm:$0xff] }
 0x380   :  { %3997 = vrot.lane.b32.xlu1 %v9979_v27, %s7996_s16  ;;  %v4740_v23 = vsel %vm21_vm0, %v4266_v10, %v4551_v17  ;;  %v4743_v27 = vsel %vm21_vm0, %v4267_v52, %v4553_v16  ;;  %v4237_v16 = vld [vmem:[#allocation2 + $0x338] sm:$0xff] }
 0x381   :  { %3995 = vrot.lane.b32.xlu0 %v9981_v12, %s7996_s16  ;;  %11014 = vst [vmem:[#allocation72_spill] sm:$0xff] %v10001_v46  ;;  %v3686_v52 = vld [vmem:[#allocation2 + $0x2f1] sm:$0xff] }
 0x382   :  { %v4649_v48 = vpop.permute.xlu1 %4648  ;;  %v3782_v12 = vld [vmem:[#allocation2 + $0x2f2] sm:$0xff] }
 0x383   :  { %v4647_v39 = vpop.permute.xlu0 %4646  ;;  %v4809_v53 = vsel %vm814_vm4, %v4743_v27, %v4649_v48  ;;  %v3684_v27 = vld [vmem:[#allocation2 + $0x2d9] sm:$0xff]  ;;  %v4236_v48 = vld [vmem:[#allocation2 + $0x330] sm:$0xff] }
 0x384   :  { %v4807_v33 = vsel %vm814_vm4, %v4740_v23, %v4647_v39  ;;  %3905 = vrot.lane.b32.xlu1 %v9987_v3, %s7997_s17  ;;  %v4268_v23 = vpack.c.bf16 %v4235_v51, %v4234_v36  ;;  %v3685_v39 = vld [vmem:[#allocation2 + $0x2e9] sm:$0xff] }
 0x385   :  { %7574 = vmatprep.mubr.msk.bf16.mxu1 %vm1535_vm5, %v4807_v33  ;;  %3903 = vrot.lane.b32.xlu0 %v9990_v30, %s7997_s17  ;;  %v4269_v33 = vpack.c.bf16 %v4237_v16, %v4236_v48  ;;  %v10009_v25 = vpack.c.bf16 %v3686_v52, %v3685_v39  ;;  %v10012_v30 = vpack.c.bf16 %v3684_v27, %v3683_v38  ;;  %v3781_v3 = vld [vmem:[#allocation2 + $0x2ea] sm:$0xff]  ;;  %v3531_v16 = vld [vmem:[#allocation2] sm:$0xff] }
 0x386   :  { %7575 = vmatmul.mubr.msk.bf16.gmra.mrb[56].mxu1 %vm1535_vm5, %v4809_v53  ;;  %v4557_v17 = vpop.permute.xlu1 %4556  ;;  %v3532_v36 = vld [vmem:[#allocation2 + $0x8] sm:$0xff]  ;;  %v3780_v52 = vld [vmem:[#allocation2 + $0x2da] sm:$0xff]  ;;  %v10023_v27 = vpack.c.bf16 %v3782_v12, %v3781_v3 }
 0x387   :  { %v4555_v10 = vpop.permute.xlu0 %4554  ;;  %11015 = vst [vmem:[#allocation73_spill] sm:$0xff] %v10012_v30  ;;  %v4749_v45 = vsel %vm21_vm0, %v4269_v33, %v4557_v17  ;;  %v3534_v17 = vld [vmem:[#allocation2 + $0x20] sm:$0xff] }
 0x388   :  { %4001 = vrot.lane.b32.xlu1 %v10001_v46, %s7996_s16  ;;  %v4746_v8 = vsel %vm21_vm0, %v4268_v23, %v4555_v10  ;;  %v3779_v46 = vld [vmem:[#allocation2 + $0x2d2] sm:$0xff]  ;;  %11016 = vst [vmem:[#allocation74_spill] sm:$0xff] %v10023_v27  ;;  %v3595_v23 = vpack.c.bf16 %v3532_v36, %v3531_v16  ;;  %v3690_v38 = vld [vmem:[#allocation2 + $0x321] sm:$0xff] }
 0x389   :  { %3999 = vrot.lane.b32.xlu0 %v10003_v40, %s7996_s16  ;;  %v10025_v33 = vpack.c.bf16 %v3780_v52, %v3779_v46  ;;  %v3687_v12 = vld [vmem:[#allocation2 + $0x301] sm:$0xff] }
 0x38a   :  { %v4653_v53 = vpop.permute.xlu1 %4652  ;;  %v3785_v36 = vld [vmem:[#allocation2 + $0x31a] sm:$0xff]  ;;  %v3786_v52 = vld [vmem:[#allocation2 + $0x322] sm:$0xff] }
 0x38b   :  { %v4651_v4 = vpop.permute.xlu0 %4650  ;;  %v4813_v48 = vsel %vm814_vm4, %v4749_v45, %v4653_v53  ;;  %11017 = vst [vmem:[#allocation75_spill] sm:$0xff] %v10025_v33  ;;  %v3688_v45 = vld [vmem:[#allocation2 + $0x309] sm:$0xff]  ;;  %v3533_v53 = vld [vmem:[#allocation2 + $0x18] sm:$0xff] }
 0x38c   :  { %v4811_v51 = vsel %vm814_vm4, %v4746_v8, %v4651_v4  ;;  %3909 = vrot.lane.b32.xlu1 %v10009_v25, %s7997_s17  ;;  %v3689_v8 = vld [vmem:[#allocation2 + $0x319] sm:$0xff]  ;;  %v3596_v4 = vpack.c.bf16 %v3534_v17, %v3533_v53  ;;  %v10034_v46 = vpack.c.bf16 %v3688_v45, %v3687_v12  ;;  %v3784_v17 = vld [vmem:[#allocation2 + $0x30a] sm:$0xff]  ;;  %v10048_v45 = vpack.c.bf16 %v3786_v52, %v3785_v36 }
 0x38d   :  { %3907 = vrot.lane.b32.xlu0 %v10012_v30, %s7997_s17  ;;  %7578 = vmatprep.mubr.msk.bf16.mxu1 %vm1535_vm5, %v4811_v51  ;;  %v3538_v53 = vld [vmem:[#allocation2 + $0x50] sm:$0xff] }
 0x38e   :  { %v3854_v10 = vpop.permute.xlu1 %3853  ;;  %7579 = vmatmul.mubr.msk.bf16.gmra.mrb[60].mxu1 %vm1535_vm5, %v4813_v48  ;;  %v10031_v48 = vpack.c.bf16 %v3690_v38, %v3689_v8  ;;  %v7994_v38 = vld [vmem:[%s10869_s3 + $0x20] ss:$0 sps:$4 sm:$0xff]   ;;  %v3535_v12 = vld [vmem:[#allocation2 + $0x30] sm:$0xff] }
 0x38f   :  { %v3852_v39 = vpop.permute.xlu0 %3851 }
 0x390   :  { %4005 = vrot.lane.b32.xlu1 %v10023_v27, %s7996_s16  ;;  %v4013_v3 = vsel %vm21_vm0, %v3595_v23, %v3852_v39  ;;  %v4016_v27 = vsel %vm21_vm0, %v3596_v4, %v3854_v10  ;;  %v3536_v10 = vld [vmem:[#allocation2 + $0x38] sm:$0xff] }
 0x391   :  { %4003 = vrot.lane.b32.xlu0 %v10025_v33, %s7996_s16  ;;  %v3783_v33 = vld [vmem:[#allocation2 + $0x302] sm:$0xff] }
 0x392   :  { %v3950_v51 = vpop.permute.xlu1 %3949  ;;  %v10051_v4 = vpack.c.bf16 %v3784_v17, %v3783_v33 }
 0x393   :  { %v3948_v16 = vpop.permute.xlu0 %3947  ;;  %v4110_v23 = vsel %vm814_vm4, %v4016_v27, %v3950_v51  ;;  %v3537_v27 = vld [vmem:[#allocation2 + $0x48] sm:$0xff]  ;;  %v10057_v51 = vpack.c.bf16 %v3536_v10, %v3535_v12  ;;  %v3542_v10 = vld [vmem:[#allocation2 + $0x80] sm:$0xff] }
 0x394   :  { %v4108_v30 = vsel %vm814_vm4, %v4013_v3, %v3948_v16  ;;  %3913 = vrot.lane.b32.xlu1 %v10031_v48, %s7997_s17  ;;  %v10061_v3 = vpack.c.bf16 %v3538_v53, %v3537_v27 }
 0x395   :  { %3911 = vrot.lane.b32.xlu0 %v10034_v46, %s7997_s17  ;;  %7586 = vmatprep.mubr.msk.bf16.mxu1 %vm1535_vm5, %v4108_v30  ;;  %v6266_v30 = vsel %vm1600_vm3, %v7994_v38, 0 }
 0x396   :  { %v3858_v39 = vpop.permute.xlu1 %3857  ;;  %7587 = vmatmul.mubr.msk.bf16.vlgmr.msra.gmra.mrb[0].mxu1 %vm1535_vm5, %v4110_v23  ;;  %v3540_v23 = vld [vmem:[#allocation2 + $0x68] sm:$0xff] }
 0x397   :  { %7651 = vmatpush3.bf16.msra.mxu1 %v9721_v34  ;;  %v3856_v8 = vpop.permute.xlu0 %3855  ;;  %v4022_v36 = vsel %vm21_vm0, %v10061_v3, %v3858_v39  ;;  %v3541_v39 = vld [vmem:[#allocation2 + $0x78] sm:$0xff] }
 0x398   :  { %4009 = vrot.lane.b32.xlu1 %v10048_v45, %s7996_s16  ;;  %7979 = vmatprep.subr.msk.bf16.mxu1 %vm1600_vm3, %v7994_v38  ;;  %v4019_v33 = vsel %vm21_vm0, %v10057_v51, %v3856_v8  ;;  %v3539_v8 = vld [vmem:[#allocation2 + $0x60] sm:$0xff] }
 0x399   :  { %4007 = vrot.lane.b32.xlu0 %v10051_v4, %s7996_s16  ;;  %v10077_v12 = vpack.c.bf16 %v3540_v23, %v3539_v8 }
 0x39a   :  { %v3954_v34 = vpop.permute.xlu1 %3953 }
 0x39b   :  { %v3952_v16 = vpop.permute.xlu0 %3951  ;;  %7653 = vmatpush3.bf16.msra.mxu1 %v6266_v30  ;;  %v4114_v17 = vsel %vm814_vm4, %v4022_v36, %v3954_v34  ;;  %v3546_v36 = vld [vmem:[#allocation2 + $0xb0] sm:$0xff] }
 0x39c   :  { %v4112_v52 = vsel %vm814_vm4, %v4019_v33, %v3952_v16  ;;  %5870 = vrot.lane.b32.xlu1 %v9735_v9, %s7997_s17  ;;  %v10081_v9 = vpack.c.bf16 %v3542_v10, %v3541_v39  ;;  %v3544_v16 = vld [vmem:[#allocation2 + $0x98] sm:$0xff] }
 0x39d   :  { %5868 = vrot.lane.b32.xlu0 %v9738_v29, %s7997_s17  ;;  %7590 = vmatprep.mubr.msk.bf16.mxu1 %vm1535_vm5, %v4112_v52 }
 0x39e   :  { %v3862_v38 = vpop.permute.xlu1 %3861  ;;  %7591 = vmatmul.mubr.msk.bf16.gmra.mrb[4].mxu1 %vm1535_vm5, %v4114_v17  ;;  %v3543_v17 = vld [vmem:[#allocation2 + $0x90] sm:$0xff] }
 0x39f   :  { %v3860_v53 = vpop.permute.xlu0 %3859  ;;  %v4028_v34 = vsel %vm21_vm0, %v10081_v9, %v3862_v38  ;;  %v3545_v38 = vld [vmem:[#allocation2 + $0xa8] sm:$0xff]  ;;  %v10097_v23 = vpack.c.bf16 %v3544_v16, %v3543_v17  ;;  %v3552_v17 = vld [vmem:[#allocation2 + $0xf8] sm:$0xff] }
 0x3a0   :  { %5966 = vrot.lane.b32.xlu1 %v9749_v26, %s7996_s16  ;;  %v4025_v30 = vsel %vm21_vm0, %v10077_v12, %v3860_v53 }
 0x3a1   :  { %5964 = vrot.lane.b32.xlu0 %v9751_v1, %s7996_s16 }
 0x3a2   :  { %v3958_v29 = vpop.permute.xlu1 %3957 }
 0x3a3   :  { %v3956_v27 = vpop.permute.xlu0 %3955  ;;  %v4118_v26 = vsel %vm814_vm4, %v4028_v34, %v3958_v29  ;;  %v3548_v29 = vld [vmem:[#allocation2 + $0xc8] sm:$0xff]  ;;  %v3547_v34 = vld [vmem:[#allocation2 + $0xc0] sm:$0xff] }
 0x3a4   :  { %v4116_v33 = vsel %vm814_vm4, %v4025_v30, %v3956_v27  ;;  %5874 = vrot.lane.b32.xlu1 %v9757_v35, %s7997_s17  ;;  %v10101_v35 = vpack.c.bf16 %v3546_v36, %v3545_v38  ;;  %v3550_v30 = vld [vmem:[#allocation2 + $0xe0] sm:$0xff]  ;;  %v3554_v38 = vld [vmem:[#allocation2 + $0x110] sm:$0xff] }
 0x3a5   :  { %5872 = vrot.lane.b32.xlu0 %v9760_v24, %s7997_s17  ;;  %7594 = vmatprep.mubr.msk.bf16.mxu1 %vm1535_vm5, %v4116_v33  ;;  %v3549_v33 = vld [vmem:[#allocation2 + $0xd8] sm:$0xff] }
 0x3a6   :  { %v3866_v1 = vpop.permute.xlu1 %3865  ;;  %7595 = vmatmul.mubr.msk.bf16.gmra.mrb[8].mxu1 %vm1535_vm5, %v4118_v26  ;;  %v10117_v26 = vpack.c.bf16 %v3548_v29, %v3547_v34 }
 0x3a7   :  { %v3864_v52 = vpop.permute.xlu0 %3863  ;;  %v4034_v8 = vsel %vm21_vm0, %v10101_v35, %v3866_v1 }
 0x3a8   :  { %5970 = vrot.lane.b32.xlu1 %v9771_v59, %s7996_s16  ;;  %v4031_v10 = vsel %vm21_vm0, %v10097_v23, %v3864_v52 }
 0x3a9   :  { %5968 = vrot.lane.b32.xlu0 %v9773_v11, %s7996_s16 }
 0x3aa   :  { %v3962_v24 = vpop.permute.xlu1 %3961 }
 0x3ab   :  { %v3960_v53 = vpop.permute.xlu0 %3959  ;;  %v4122_v59 = vsel %vm814_vm4, %v4034_v8, %v3962_v24 }
 0x3ac   :  { %v4120_v39 = vsel %vm814_vm4, %v4031_v10, %v3960_v53  ;;  %5878 = vrot.lane.b32.xlu1 %v9779_v55, %s7997_s17  ;;  %v10121_v55 = vpack.c.bf16 %v3550_v30, %v3549_v33  ;;  %v3551_v10 = vld [vmem:[#allocation2 + $0xf0] sm:$0xff]  ;;  %v3553_v53 = vld [vmem:[#allocation2 + $0x108] sm:$0xff]  ;;  %v3555_v33 = vld [vmem:[#allocation2 + $0x120] sm:$0xff] }
 0x3ad   :  { %5876 = vrot.lane.b32.xlu0 %v9782_v44, %s7997_s17  ;;  %7598 = vmatprep.mubr.msk.bf16.mxu1 %vm1535_vm5, %v4120_v39  ;;  %v10137_v8 = vpack.c.bf16 %v3552_v17, %v3551_v10  ;;  %v3556_v30 = vld [vmem:[#allocation2 + $0x128] sm:$0xff]  ;;  %v3562_v17 = vld [vmem:[#allocation2 + $0x170] sm:$0xff] }
 0x3ae   :  { %v3870_v11 = vpop.permute.xlu1 %3869  ;;  %7599 = vmatmul.mubr.msk.bf16.gmra.mrb[12].mxu1 %vm1535_vm5, %v4122_v59  ;;  %v3561_v10 = vld [vmem:[#allocation2 + $0x168] sm:$0xff] }
 0x3af   :  { %v3868_v27 = vpop.permute.xlu0 %3867  ;;  %v4040_v36 = vsel %vm21_vm0, %v10121_v55, %v3870_v11 }
 0x3b0   :  { %5974 = vrot.lane.b32.xlu1 %v9793_v43, %s7996_s16  ;;  %v4037_v1 = vsel %vm21_vm0, %v10117_v26, %v3868_v27  ;;  %v3558_v27 = vld [vmem:[#allocation2 + $0x140] sm:$0xff] }
 0x3b1   :  { %5972 = vrot.lane.b32.xlu0 %v9795_v49, %s7996_s16 }
 0x3b2   :  { %v3966_v44 = vpop.permute.xlu1 %3965 }
 0x3b3   :  { %v3964_v16 = vpop.permute.xlu0 %3963  ;;  %v4126_v43 = vsel %vm814_vm4, %v4040_v36, %v3966_v44  ;;  %v3557_v44 = vld [vmem:[#allocation2 + $0x138] sm:$0xff] }
 0x3b4   :  { %v4124_v52 = vsel %vm814_vm4, %v4037_v1, %v3964_v16  ;;  %5882 = vrot.lane.b32.xlu1 %v9801_v47, %s7997_s17  ;;  %v10141_v47 = vpack.c.bf16 %v3554_v38, %v3553_v53  ;;  %v10157_v1 = vpack.c.bf16 %v3556_v30, %v3555_v33 }
 0x3b5   :  { %5880 = vrot.lane.b32.xlu0 %v9804_v63, %s7997_s17  ;;  %7602 = vmatprep.mubr.msk.bf16.mxu1 %vm1535_vm5, %v4124_v52 }
 0x3b6   :  { %v3874_v49 = vpop.permute.xlu1 %3873  ;;  %7603 = vmatmul.mubr.msk.bf16.gmra.mrb[16].mxu1 %vm1535_vm5, %v4126_v43 }
 0x3b7   :  { %v3872_v24 = vpop.permute.xlu0 %3871  ;;  %v4046_v11 = vsel %vm21_vm0, %v10141_v47, %v3874_v49  ;;  %v3560_v49 = vld [vmem:[#allocation2 + $0x158] sm:$0xff] }
 0x3b8   :  { %5978 = vrot.lane.b32.xlu1 %v9815_v7, %s7996_s16  ;;  %v4043_v39 = vsel %vm21_vm0, %v10137_v8, %v3872_v24  ;;  %v3559_v24 = vld [vmem:[#allocation2 + $0x150] sm:$0xff] }
 0x3b9   :  { %5976 = vrot.lane.b32.xlu0 %v9817_v20, %s7996_s16  ;;  %v10177_v53 = vpack.c.bf16 %v3560_v49, %v3559_v24  ;;  %v5768_v24 = vld [vmem:[#allocation2 + $0x182] sm:$0xff] }
 0x3ba   :  { %v3970_v63 = vpop.permute.xlu1 %3969 }
 0x3bb   :  { %v3968_v59 = vpop.permute.xlu0 %3967  ;;  %v4130_v7 = vsel %vm814_vm4, %v4046_v11, %v3970_v63 }
 0x3bc   :  { %v4128_v29 = vsel %vm814_vm4, %v4043_v39, %v3968_v59  ;;  %5886 = vrot.lane.b32.xlu1 %v9823_v41, %s7997_s17  ;;  %v10161_v41 = vpack.c.bf16 %v3558_v27, %v3557_v44  ;;  %v3566_v27 = vld [vmem:[#allocation2 + $0x1d0] sm:$0xff] }
 0x3bd   :  { %5884 = vrot.lane.b32.xlu0 %v9826_v56, %s7997_s17  ;;  %7606 = vmatprep.mubr.msk.bf16.mxu1 %vm1535_vm5, %v4128_v29  ;;  %v3564_v29 = vld [vmem:[#allocation2 + $0x1b8] sm:$0xff]  ;;  %v5673_v44 = vld [vmem:[#allocation2 + $0x189] sm:$0xff] }
 0x3be   :  { %v3878_v20 = vpop.permute.xlu1 %3877  ;;  %7607 = vmatmul.mubr.msk.bf16.gmra.mrb[20].mxu1 %vm1535_vm5, %v4130_v7 }
 0x3bf   :  { %v3876_v34 = vpop.permute.xlu0 %3875  ;;  %v4052_v52 = vsel %vm21_vm0, %v10161_v41, %v3878_v20  ;;  %v5675_v20 = vld [vmem:[#allocation2 + $0x1a1] sm:$0xff] }
 0x3c0   :  { %5982 = vrot.lane.b32.xlu1 %v9837_v19, %s7996_s16  ;;  %v4049_v16 = vsel %vm21_vm0, %v10157_v1, %v3876_v34 }
 0x3c1   :  { %5980 = vrot.lane.b32.xlu0 %v9839_v62, %s7996_s16 }
 0x3c2   :  { %v3974_v56 = vpop.permute.xlu1 %3973 }
 0x3c3   :  { %v3972_v36 = vpop.permute.xlu0 %3971  ;;  %v4134_v19 = vsel %vm814_vm4, %v4052_v52, %v3974_v56  ;;  %v3565_v56 = vld [vmem:[#allocation2 + $0x1c8] sm:$0xff] }
 0x3c4   :  { %v4132_v43 = vsel %vm814_vm4, %v4049_v16, %v3972_v36  ;;  %5890 = vrot.lane.b32.xlu1 %v9845_v2, %s7997_s17  ;;  %v10181_v2 = vpack.c.bf16 %v3562_v17, %v3561_v10  ;;  %v5771_v16 = vld [vmem:[#allocation2 + $0x1a2] sm:$0xff]  ;;  %v3612_v36 = vpack.c.bf16 %v3566_v27, %v3565_v56  ;;  %v5769_v10 = vld [vmem:[#allocation2 + $0x18a] sm:$0xff]  ;;  %v3572_v56 = vld [vmem:[#allocation2 + $0x218] sm:$0xff] }
 0x3c5   :  { %5888 = vrot.lane.b32.xlu0 %v9848_v18, %s7997_s17  ;;  %7610 = vmatprep.mubr.msk.bf16.mxu1 %vm1535_vm5, %v4132_v43  ;;  %v5672_v43 = vld [vmem:[#allocation2 + $0x181] sm:$0xff] }
 0x3c6   :  { %v3882_v62 = vpop.permute.xlu1 %3881  ;;  %7611 = vmatmul.mubr.msk.bf16.gmra.mrb[24].mxu1 %vm1535_vm5, %v4134_v19  ;;  %v5722_v49 = vpack.c.bf16 %v5673_v44, %v5672_v43 }
 0x3c7   :  { %v3880_v38 = vpop.permute.xlu0 %3879  ;;  %v4058_v59 = vsel %vm21_vm0, %v10181_v2, %v3882_v62 }
 0x3c8   :  { %5986 = vrot.lane.b32.xlu1 %v9859_v57, %s7996_s16  ;;  %v4055_v63 = vsel %vm21_vm0, %v10177_v53, %v3880_v38  ;;  %v3563_v57 = vld [vmem:[#allocation2 + $0x1b0] sm:$0xff] }
 0x3c9   :  { %5984 = vrot.lane.b32.xlu0 %v9861_v32, %s7996_s16  ;;  %v5674_v32 = vld [vmem:[#allocation2 + $0x199] sm:$0xff]  ;;  %v3611_v34 = vpack.c.bf16 %v3564_v29, %v3563_v57 }
 0x3ca   :  { %v3978_v18 = vpop.permute.xlu1 %3977  ;;  %v3567_v57 = vld [vmem:[#allocation2 + $0x1e0] sm:$0xff]  ;;  %v3569_v29 = vld [vmem:[#allocation2 + $0x1f8] sm:$0xff] }
 0x3cb   :  { %v3976_v39 = vpop.permute.xlu0 %3975  ;;  %v4138_v7 = vsel %vm814_vm4, %v4058_v59, %v3978_v18 }
 0x3cc   :  { %v4136_v11 = vsel %vm814_vm4, %v4055_v63, %v3976_v39  ;;  %5894 = vrot.lane.b32.xlu1 %v9867_v61, %s7997_s17  ;;  %v5723_v61 = vpack.c.bf16 %v5675_v20, %v5674_v32  ;;  %v3568_v63 = vld [vmem:[#allocation2 + $0x1e8] sm:$0xff]  ;;  %v3570_v39 = vld [vmem:[#allocation2 + $0x200] sm:$0xff] }
 0x3cd   :  { %5892 = vrot.lane.b32.xlu0 %v9870_v50, %s7997_s17  ;;  %7614 = vmatprep.mubr.msk.bf16.mxu1 %vm1535_vm5, %v4136_v11  ;;  %v5770_v50 = vld [vmem:[#allocation2 + $0x19a] sm:$0xff]  ;;  %v5818_v11 = vpack.c.bf16 %v5769_v10, %v5768_v24  ;;  %v10211_v32 = vpack.c.bf16 %v3570_v39, %v3569_v29  ;;  %v3582_v29 = vld [vmem:[#allocation2 + $0x290] sm:$0xff] }
 0x3ce   :  { %v3886_v30 = vpop.permute.xlu1 %3885  ;;  %7615 = vmatmul.mubr.msk.bf16.gmra.mrb[28].mxu1 %vm1535_vm5, %v4138_v7  ;;  %v10208_v7 = vpack.c.bf16 %v3568_v63, %v3567_v57  ;;  %v3575_v10 = vld [vmem:[#allocation2 + $0x240] sm:$0xff]  ;;  %v3580_v57 = vld [vmem:[#allocation2 + $0x278] sm:$0xff] }
 0x3cf   :  { %v3884_v33 = vpop.permute.xlu0 %3883  ;;  %v4064_v17 = vsel %vm21_vm0, %v3612_v36, %v3886_v30  ;;  %v3571_v36 = vld [vmem:[#allocation2 + $0x210] sm:$0xff] }
 0x3d0   :  { %5990 = vrot.lane.b32.xlu1 %v9881_v22, %s7996_s16  ;;  %v4061_v19 = vsel %vm21_vm0, %v3611_v34, %v3884_v33  ;;  %v5819_v22 = vpack.c.bf16 %v5771_v16, %v5770_v50  ;;  %v3574_v50 = vld [vmem:[#allocation2 + $0x230] sm:$0xff]  ;;  %v10227_v43 = vpack.c.bf16 %v3572_v56, %v3571_v36  ;;  %v3586_v36 = vld [vmem:[#allocation2 + $0x2c0] sm:$0xff] }
 0x3d1   :  { %5988 = vrot.lane.b32.xlu0 %v9883_v15, %s7996_s16 }
 0x3d2   :  { %v3982_v52 = vpop.permute.xlu1 %3981 }
 0x3d3   :  { %v3980_v62 = vpop.permute.xlu0 %3979  ;;  %v4142_v15 = vsel %vm814_vm4, %v4064_v17, %v3982_v52  ;;  %v3573_v52 = vld [vmem:[#allocation2 + $0x228] sm:$0xff] }
 0x3d4   :  { %v4140_v38 = vsel %vm814_vm4, %v4061_v19, %v3980_v62  ;;  %5898 = vrot.lane.b32.xlu1 %v5723_v61, %s7997_s17 }
 0x3d5   :  { %5896 = vrot.lane.b32.xlu0 %v5722_v49, %s7997_s17  ;;  %7618 = vmatprep.mubr.msk.bf16.mxu1 %vm1535_vm5, %v4140_v38  ;;  %v3576_v38 = vld [vmem:[#allocation2 + $0x248] sm:$0xff] }
 0x3d6   :  { %v3890_v18 = vpop.permute.xlu1 %3889  ;;  %7619 = vmatmul.mubr.msk.bf16.gmra.mrb[32].mxu1 %vm1535_vm5, %v4142_v15  ;;  %v3577_v15 = vld [vmem:[#allocation2 + $0x258] sm:$0xff] }
 0x3d7   :  { %v3888_v59 = vpop.permute.xlu0 %3887  ;;  %v4070_v34 = vsel %vm21_vm0, %v10211_v32, %v3890_v18  ;;  %v10247_v18 = vpack.c.bf16 %v3576_v38, %v3575_v10  ;;  %v11021_v10 = vld [vmem:[#allocation70_spill] sm:$0xff] }
 0x3d8   :  { %5994 = vrot.lane.b32.xlu1 %v5819_v22, %s7996_s16  ;;  %v4067_v30 = vsel %vm21_vm0, %v10208_v7, %v3888_v59  ;;  %v3578_v22 = vld [vmem:[#allocation2 + $0x260] sm:$0xff] }
 0x3d9   :  { %5992 = vrot.lane.b32.xlu0 %v5818_v11, %s7996_s16 }
 0x3da   :  { %v3986_v20 = vpop.permute.xlu1 %3985 }
 0x3db   :  { %v3984_v27 = vpop.permute.xlu0 %3983  ;;  %v4146_v61 = vsel %vm814_vm4, %v4070_v34, %v3986_v20 }
 0x3dc   :  { %v4144_v33 = vsel %vm814_vm4, %v4067_v30, %v3984_v27  ;;  %5902 = vrot.lane.b32.xlu1 %v9899_v5, %s7997_s17  ;;  %v10231_v5 = vpack.c.bf16 %v3574_v50, %v3573_v52  ;;  %v3579_v30 = vld [vmem:[#allocation2 + $0x270] sm:$0xff]  ;;  %v3581_v27 = vld [vmem:[#allocation2 + $0x288] sm:$0xff]  ;;  %v11018_v50 = vld [vmem:[#allocation67_spill] sm:$0xff] }
 0x3dd   :  { %5900 = vrot.lane.b32.xlu0 %v9902_v54, %s7997_s17  ;;  %7622 = vmatprep.mubr.msk.bf16.mxu1 %vm1535_vm5, %v4144_v33  ;;  %v10267_v34 = vpack.c.bf16 %v3580_v57, %v3579_v30  ;;  %v3589_v57 = vld [vmem:[#allocation2 + $0x2e8] sm:$0xff] }
 0x3de   :  { %v3894_v44 = vpop.permute.xlu1 %3893  ;;  %7623 = vmatmul.mubr.msk.bf16.gmra.mrb[36].mxu1 %vm1535_vm5, %v4146_v61 }
 0x3df   :  { %v3892_v16 = vpop.permute.xlu0 %3891  ;;  %v4076_v49 = vsel %vm21_vm0, %v10231_v5, %v3894_v44 }
 0x3e0   :  { %5998 = vrot.lane.b32.xlu1 %v9913_v42, %s7996_s16  ;;  %v4073_v19 = vsel %vm21_vm0, %v10227_v43, %v3892_v16  ;;  %v3584_v16 = vld [vmem:[#allocation2 + $0x2a8] sm:$0xff] }
 0x3e1   :  { %5996 = vrot.lane.b32.xlu0 %v9915_v14, %s7996_s16 }
 0x3e2   :  { %v3990_v54 = vpop.permute.xlu1 %3989 }
 0x3e3   :  { %v3988_v62 = vpop.permute.xlu0 %3987  ;;  %v4150_v42 = vsel %vm814_vm4, %v4076_v49, %v3990_v54  ;;  %v3583_v54 = vld [vmem:[#allocation2 + $0x2a0] sm:$0xff] }
 0x3e4   :  { %v4148_v17 = vsel %vm814_vm4, %v4073_v19, %v3988_v62  ;;  %5906 = vrot.lane.b32.xlu1 %v9921_v6, %s7997_s17  ;;  %v10251_v6 = vpack.c.bf16 %v3578_v22, %v3577_v15  ;;  %v11019_v19 = vld [vmem:[#allocation68_spill] sm:$0xff]  ;;  %v3585_v62 = vld [vmem:[#allocation2 + $0x2b8] sm:$0xff]  ;;  %v10287_v49 = vpack.c.bf16 %v3584_v16, %v3583_v54  ;;  %v3591_v16 = vld [vmem:[#allocation2 + $0x300] sm:$0xff] }
 0x3e5   :  { %5904 = vrot.lane.b32.xlu0 %v9924_v28, %s7997_s17  ;;  %7626 = vmatprep.mubr.msk.bf16.mxu1 %vm1535_vm5, %v4148_v17  ;;  %v10291_v17 = vpack.c.bf16 %v3586_v36, %v3585_v62  ;;  %v11025_v36 = vld [vmem:[#allocation74_spill] sm:$0xff] }
 0x3e6   :  { %v3898_v14 = vpop.permute.xlu1 %3897  ;;  %7627 = vmatmul.mubr.msk.bf16.gmra.mrb[40].mxu1 %vm1535_vm5, %v4150_v42 }
 0x3e7   :  { %v3896_v24 = vpop.permute.xlu0 %3895  ;;  %v4082_v59 = vsel %vm21_vm0, %v10251_v6, %v3898_v14 }
 0x3e8   :  { %6002 = vrot.lane.b32.xlu1 %v9935_v21, %s7996_s16  ;;  %v4079_v63 = vsel %vm21_vm0, %v10247_v18, %v3896_v24 }
 0x3e9   :  { %6000 = vrot.lane.b32.xlu0 %v9937_v0, %s7996_s16 }
 0x3ea   :  { %v3994_v28 = vpop.permute.xlu1 %3993 }
 0x3eb   :  { %v3992_v39 = vpop.permute.xlu0 %3991  ;;  %v4154_v21 = vsel %vm814_vm4, %v4082_v59, %v3994_v28  ;;  %v11022_v28 = vld [vmem:[#allocation71_spill] sm:$0xff]  ;;  %v3590_v59 = vld [vmem:[#allocation2 + $0x2f0] sm:$0xff] }
 0x3ec   :  { %v4152_v11 = vsel %vm814_vm4, %v4079_v63, %v3992_v39  ;;  %5910 = vrot.lane.b32.xlu1 %v9943_v31, %s7997_s17  ;;  %v10271_v31 = vpack.c.bf16 %v3582_v29, %v3581_v27  ;;  %v3588_v39 = vld [vmem:[#allocation2 + $0x2d8] sm:$0xff] }
 0x3ed   :  { %5908 = vrot.lane.b32.xlu0 %v9946_v37, %s7997_s17  ;;  %7630 = vmatprep.mubr.msk.bf16.mxu1 %vm1535_vm5, %v4152_v11 }
 0x3ee   :  { %v3902_v0 = vpop.permute.xlu1 %3901  ;;  %7631 = vmatmul.mubr.msk.bf16.gmra.mrb[44].mxu1 %vm1535_vm5, %v4154_v21  ;;  %v3587_v21 = vld [vmem:[#allocation2 + $0x2d0] sm:$0xff] }
 0x3ef   :  { %v3900_v20 = vpop.permute.xlu0 %3899  ;;  %v4088_v44 = vsel %vm21_vm0, %v10271_v31, %v3902_v0  ;;  %v11023_v0 = vld [vmem:[#allocation72_spill] sm:$0xff]  ;;  %v10307_v29 = vpack.c.bf16 %v3588_v39, %v3587_v21  ;;  %v5705_v39 = vld [vmem:[#allocation2 + $0x339] sm:$0xff] }
 0x3f0   :  { %6006 = vrot.lane.b32.xlu1 %v9957_v58, %s7996_s16  ;;  %v4085_v33 = vsel %vm21_vm0, %v10267_v34, %v3900_v20  ;;  %v10311_v20 = vpack.c.bf16 %v3590_v59, %v3589_v57  ;;  %v5803_v59 = vld [vmem:[#allocation2 + $0x352] sm:$0xff] }
 0x3f1   :  { %6004 = vrot.lane.b32.xlu0 %v9959_v13, %s7996_s16 }
 0x3f2   :  { %v3998_v37 = vpop.permute.xlu1 %3997 }
 0x3f3   :  { %v3996_v61 = vpop.permute.xlu0 %3995  ;;  %v4158_v58 = vsel %vm814_vm4, %v4088_v44, %v3998_v37 }
 0x3f4   :  { %v4156_v56 = vsel %vm814_vm4, %v4085_v33, %v3996_v61  ;;  %5914 = vrot.lane.b32.xlu1 %v9965_v60, %s7997_s17  ;;  %v11020_v60 = vld [vmem:[#allocation69_spill] sm:$0xff] }
 0x3f5   :  { %5912 = vrot.lane.b32.xlu0 %v11018_v50, %s7997_s17  ;;  %7634 = vmatprep.mubr.msk.bf16.mxu1 %vm1535_vm5, %v4156_v56  ;;  %v11024_v56 = vld [vmem:[#allocation73_spill] sm:$0xff]  ;;  %v3594_v50 = vld [vmem:[#allocation2 + $0x320] sm:$0xff] }
 0x3f6   :  { %v3906_v13 = vpop.permute.xlu1 %3905  ;;  %7635 = vmatmul.mubr.msk.bf16.gmra.mrb[48].mxu1 %vm1535_vm5, %v4158_v58  ;;  %v3592_v58 = vld [vmem:[#allocation2 + $0x308] sm:$0xff] }
 0x3f7   :  { %v3904_v52 = vpop.permute.xlu0 %3903  ;;  %v4094_v22 = vsel %vm21_vm0, %v10291_v17, %v3906_v13  ;;  %v10327_v54 = vpack.c.bf16 %v3592_v58, %v3591_v16 }
 0x3f8   :  { %6010 = vrot.lane.b32.xlu1 %v11019_v19, %s7996_s16  ;;  %v4091_v14 = vsel %vm21_vm0, %v10287_v49, %v3904_v52  ;;  %v3593_v52 = vld [vmem:[#allocation2 + $0x318] sm:$0xff] }
 0x3f9   :  { %6008 = vrot.lane.b32.xlu0 %v11020_v60, %s7996_s16  ;;  %v10331_v19 = vpack.c.bf16 %v3594_v50, %v3593_v52 }
 0x3fa   :  { %v4002_v42 = vpop.permute.xlu1 %4001 }
 0x3fb   :  { %v4000_v38 = vpop.permute.xlu0 %3999  ;;  %v4162_v15 = vsel %vm814_vm4, %v4094_v22, %v4002_v42 }
 0x3fc   :  { %v4160_v24 = vsel %vm814_vm4, %v4091_v14, %v4000_v38  ;;  %5918 = vrot.lane.b32.xlu1 %v11021_v10, %s7997_s17  ;;  %v5707_v10 = vld [vmem:[#allocation2 + $0x351] sm:$0xff] }
 0x3fd   :  { %5916 = vrot.lane.b32.xlu0 %v11022_v28, %s7997_s17  ;;  %7638 = vmatprep.mubr.msk.bf16.mxu1 %vm1535_vm5, %v4160_v24  ;;  %v5706_v24 = vld [vmem:[#allocation2 + $0x349] sm:$0xff] }
 0x3fe   :  { %v3910_v63 = vpop.permute.xlu1 %3909  ;;  %7639 = vmatmul.mubr.msk.bf16.gmra.mrb[52].mxu1 %vm1535_vm5, %v4162_v15 }
 0x3ff   :  { %v3908_v11 = vpop.permute.xlu0 %3907  ;;  %v4100_v33 = vsel %vm21_vm0, %v10311_v20, %v3910_v63  ;;  %v5739_v63 = vpack.c.bf16 %v5707_v10, %v5706_v24 }
 0x400   :  { %6014 = vrot.lane.b32.xlu1 %v11023_v0, %s7996_s16  ;;  %v4097_v27 = vsel %vm21_vm0, %v10307_v29, %v3908_v11 }
 0x401   :  { %6012 = vrot.lane.b32.xlu0 %v10003_v40, %s7996_s16 }
 0x402   :  { %v4006_v30 = vpop.permute.xlu1 %4005 }
 0x403   :  { %v4004_v37 = vpop.permute.xlu0 %4003  ;;  %v4166_v44 = vsel %vm814_vm4, %v4100_v33, %v4006_v30  ;;  %v5801_v33 = vld [vmem:[#allocation2 + $0x33a] sm:$0xff] }
 0x404   :  { %v4164_v61 = vsel %vm814_vm4, %v4097_v27, %v4004_v37  ;;  %5922 = vrot.lane.b32.xlu1 %v10009_v25, %s7997_s17  ;;  %v11026_v25 = vld [vmem:[#allocation75_spill] sm:$0xff]  ;;  %v5800_v37 = vld [vmem:[#allocation2 + $0x332] sm:$0xff] }
 0x405   :  { %5920 = vrot.lane.b32.xlu0 %v11024_v56, %s7997_s17  ;;  %7642 = vmatprep.mubr.msk.bf16.mxu1 %vm1535_vm5, %v4164_v61 }
 0x406   :  { %7643 = vmatmul.mubr.msk.bf16.gmra.mrb[56].mxu1 %vm1535_vm5, %v4166_v44  ;;  %v3914_v40 = vpop.permute.xlu1 %3913  ;;  %v5834_v44 = vpack.c.bf16 %v5801_v33, %v5800_v37 }
 0x407   :  { %v3912_v13 = vpop.permute.xlu0 %3911  ;;  %v4106_v14 = vsel %vm21_vm0, %v10331_v19, %v3914_v40 }
 0x408   :  { %6018 = vrot.lane.b32.xlu1 %v11025_v36, %s7996_s16  ;;  %v4103_v60 = vsel %vm21_vm0, %v10327_v54, %v3912_v13 }
 0x409   :  { %6016 = vrot.lane.b32.xlu0 %v11026_v25, %s7996_s16 }
 0x40a   :  { %v4010_v62 = vpop.permute.xlu1 %4009 }
 0x40b   :  { %v4008_v42 = vpop.permute.xlu0 %4007  ;;  %v4170_v22 = vsel %vm814_vm4, %v4106_v14, %v4010_v62 }
 0x40c   :  { %v4168_v38 = vsel %vm814_vm4, %v4103_v60, %v4008_v42  ;;  %5926 = vrot.lane.b32.xlu1 %v10031_v48, %s7997_s17  ;;  %v5802_v48 = vld [vmem:[#allocation2 + $0x34a] sm:$0xff] }
 0x40d   :  { %5924 = vrot.lane.b32.xlu0 %v10034_v46, %s7997_s17  ;;  %7646 = vmatprep.mubr.msk.bf16.mxu1 %vm1535_vm5, %v4168_v38  ;;  %v5704_v46 = vld [vmem:[#allocation2 + $0x331] sm:$0xff] }
 0x40e   :  { %v5871_v15 = vpop.permute.xlu1 %5870  ;;  %7647 = vmatmul.mubr.msk.bf16.gmra.mrb[60].mxu1 %vm1535_vm5, %v4170_v22  ;;  %v5738_v57 = vpack.c.bf16 %v5705_v39, %v5704_v46 }
 0x40f   :  { %v5869_v28 = vpop.permute.xlu0 %5868  ;;  %v6033_v30 = vsel %vm21_vm0, %v10061_v3, %v5871_v15 }
 0x410   :  { %6022 = vrot.lane.b32.xlu1 %v10048_v45, %s7996_s16  ;;  %v6030_v21 = vsel %vm21_vm0, %v10057_v51, %v5869_v28  ;;  %v5835_v45 = vpack.c.bf16 %v5803_v59, %v5802_v48 }
 0x411   :  { %6020 = vrot.lane.b32.xlu0 %v10051_v4, %s7996_s16 }
 0x412   :  { %v5967_v11 = vpop.permute.xlu1 %5966 }
 0x413   :  { %v5965_v0 = vpop.permute.xlu0 %5964  ;;  %v6127_v4 = vsel %vm814_vm4, %v6033_v30, %v5967_v11 }
 0x414   :  { %v6125_v27 = vsel %vm814_vm4, %v6030_v21, %v5965_v0  ;;  %5930 = vrot.lane.b32.xlu1 %v5739_v63, %s7997_s17 }
 0x415   :  { %5928 = vrot.lane.b32.xlu0 %v5738_v57, %s7997_s17  ;;  %7654 = vmatprep.mubr.msk.bf16.mxu1 %vm1535_vm5, %v6125_v27 }
 0x416   :  { %v5875_v61 = vpop.permute.xlu1 %5874  ;;  %7655 = vmatmul.mubr.msk.bf16.vlgmr.msra.gmra.mrb[0].mxu1 %vm1535_vm5, %v6127_v4 }
 0x417   :  { %v5873_v51 = vpop.permute.xlu0 %5872  ;;  %v6039_v58 = vsel %vm21_vm0, %v10081_v9, %v5875_v61  ;;  %v5579_v61 = vld [vmem:[#allocation2 + $0x1a0] sm:$0xff] }
 0x418   :  { %6026 = vrot.lane.b32.xlu1 %v5835_v45, %s7996_s16  ;;  %v6036_v56 = vsel %vm21_vm0, %v10077_v12, %v5873_v51 }
 0x419   :  { %6024 = vrot.lane.b32.xlu0 %v5834_v44, %s7996_s16 }
 0x41a   :  { %v5971_v3 = vpop.permute.xlu1 %5970 }
 0x41b   :  { %v5969_v40 = vpop.permute.xlu0 %5968  ;;  %v6131_v13 = vsel %vm814_vm4, %v6039_v58, %v5971_v3 }
 0x41c   :  { %v6129_v50 = vsel %vm814_vm4, %v6036_v56, %v5969_v40  ;;  %v5577_v40 = vld [vmem:[#allocation2 + $0x188] sm:$0xff] }
 0x41d   :  { %7658 = vmatprep.mubr.msk.bf16.mxu1 %vm1535_vm5, %v6129_v50  ;;  %v5576_v50 = vld [vmem:[#allocation2 + $0x180] sm:$0xff] }
 0x41e   :  { %v5879_v16 = vpop.permute.xlu1 %5878  ;;  %7659 = vmatmul.mubr.msk.bf16.gmra.mrb[4].mxu1 %vm1535_vm5, %v6131_v13 }
 0x41f   :  { %v5877_v36 = vpop.permute.xlu0 %5876  ;;  %v6045_v12 = vsel %vm21_vm0, %v10101_v35, %v5879_v16 }
 0x420   :  { %v6042_v25 = vsel %vm21_vm0, %v10097_v23, %v5877_v36 }
 0x422   :  { %v5975_v52 = vpop.permute.xlu1 %5974 }
 0x423   :  { %v5973_v62 = vpop.permute.xlu0 %5972  ;;  %v6135_v60 = vsel %vm814_vm4, %v6045_v12, %v5975_v52 }
 0x424   :  { %v6133_v9 = vsel %vm814_vm4, %v6042_v25, %v5973_v62 }
 0x425   :  { %7662 = vmatprep.mubr.msk.bf16.mxu1 %vm1535_vm5, %v6133_v9 }
 0x426   :  { %v5883_v42 = vpop.permute.xlu1 %5882  ;;  %7663 = vmatmul.mubr.msk.bf16.gmra.mrb[8].mxu1 %vm1535_vm5, %v6135_v60 }
 0x427   :  { %v5881_v14 = vpop.permute.xlu0 %5880  ;;  %v6051_v23 = vsel %vm21_vm0, %v10121_v55, %v5883_v42 }
 0x428   :  { %v6048_v22 = vsel %vm21_vm0, %v10117_v26, %v5881_v14 }
 0x42a   :  { %v5979_v38 = vpop.permute.xlu1 %5978 }
 0x42b   :  { %v5977_v24 = vpop.permute.xlu0 %5976  ;;  %v6139_v10 = vsel %vm814_vm4, %v6051_v23, %v5979_v38 }
 0x42c   :  { %v6137_v35 = vsel %vm814_vm4, %v6048_v22, %v5977_v24 }
 0x42d   :  { %7666 = vmatprep.mubr.msk.bf16.mxu1 %vm1535_vm5, %v6137_v35 }
 0x42e   :  { %v5887_v15 = vpop.permute.xlu1 %5886  ;;  %7667 = vmatmul.mubr.msk.bf16.gmra.mrb[12].mxu1 %vm1535_vm5, %v6139_v10 }
 0x42f   :  { %v5885_v28 = vpop.permute.xlu0 %5884  ;;  %v6057_v26 = vsel %vm21_vm0, %v10141_v47, %v5887_v15 }
 0x430   :  { %v6054_v39 = vsel %vm21_vm0, %v10137_v8, %v5885_v28 }
 0x432   :  { %v5983_v63 = vpop.permute.xlu1 %5982 }
 0x433   :  { %v5981_v48 = vpop.permute.xlu0 %5980  ;;  %v6143_v59 = vsel %vm814_vm4, %v6057_v26, %v5983_v63 }
 0x434   :  { %v6141_v55 = vsel %vm814_vm4, %v6054_v39, %v5981_v48 }
 0x435   :  { %7670 = vmatprep.mubr.msk.bf16.mxu1 %vm1535_vm5, %v6141_v55 }
 0x436   :  { %v5891_v11 = vpop.permute.xlu1 %5890  ;;  %7671 = vmatmul.mubr.msk.bf16.gmra.mrb[16].mxu1 %vm1535_vm5, %v6143_v59 }
 0x437   :  { %v5889_v46 = vpop.permute.xlu0 %5888  ;;  %v6063_v8 = vsel %vm21_vm0, %v10161_v41, %v5891_v11 }
 0x438   :  { %v6060_v0 = vsel %vm21_vm0, %v10157_v1, %v5889_v46  ;;  %v5578_v1 = vld [vmem:[#allocation2 + $0x198] sm:$0xff] }
 0x439   :  { %v5627_v3 = vpack.c.bf16 %v5579_v61, %v5578_v1 }
 0x43a   :  { %v5987_v21 = vpop.permute.xlu1 %5986 }
 0x43b   :  { %v5985_v57 = vpop.permute.xlu0 %5984  ;;  %v6147_v30 = vsel %vm814_vm4, %v6063_v8, %v5987_v21 }
 0x43c   :  { %v6145_v47 = vsel %vm814_vm4, %v6060_v0, %v5985_v57 }
 0x43d   :  { %7674 = vmatprep.mubr.msk.bf16.mxu1 %vm1535_vm5, %v6145_v47 }
 0x43e   :  { %v5895_v27 = vpop.permute.xlu1 %5894  ;;  %7675 = vmatmul.mubr.msk.bf16.gmra.mrb[20].mxu1 %vm1535_vm5, %v6147_v30 }
 0x43f   :  { %v5893_v45 = vpop.permute.xlu0 %5892  ;;  %v6069_v41 = vsel %vm21_vm0, %v10181_v2, %v5895_v27 }
 0x440   :  { %v6066_v33 = vsel %vm21_vm0, %v10177_v53, %v5893_v45  ;;  %v5626_v53 = vpack.c.bf16 %v5577_v40, %v5576_v50 }
 0x442   :  { %v5991_v37 = vpop.permute.xlu1 %5990 }
 0x443   :  { %v5989_v4 = vpop.permute.xlu0 %5988  ;;  %v6151_v44 = vsel %vm814_vm4, %v6069_v41, %v5991_v37 }
 0x444   :  { %v6149_v51 = vsel %vm814_vm4, %v6066_v33, %v5989_v4 }
 0x445   :  { %7678 = vmatprep.mubr.msk.bf16.mxu1 %vm1535_vm5, %v6149_v51 }
 0x446   :  { %v5899_v56 = vpop.permute.xlu1 %5898  ;;  %7679 = vmatmul.mubr.msk.bf16.gmra.mrb[24].mxu1 %vm1535_vm5, %v6151_v44 }
 0x447   :  { %v5897_v58 = vpop.permute.xlu0 %5896  ;;  %v6075_v13 = vsel %vm21_vm0, %v5627_v3, %v5899_v56 }
 0x448   :  { %v6072_v36 = vsel %vm21_vm0, %v5626_v53, %v5897_v58  ;;  %v5611_v53 = vld [vmem:[#allocation2 + $0x350] sm:$0xff] }
 0x44a   :  { %v5995_v16 = vpop.permute.xlu1 %5994 }
 0x44b   :  { %v5993_v2 = vpop.permute.xlu0 %5992  ;;  %v6155_v25 = vsel %vm814_vm4, %v6075_v13, %v5995_v16 }
 0x44c   :  { %v6153_v52 = vsel %vm814_vm4, %v6072_v36, %v5993_v2 }
 0x44d   :  { %7682 = vmatprep.mubr.msk.bf16.mxu1 %vm1535_vm5, %v6153_v52  ;;  %v5609_v52 = vld [vmem:[#allocation2 + $0x338] sm:$0xff] }
 0x44e   :  { %v5903_v62 = vpop.permute.xlu1 %5902  ;;  %7683 = vmatmul.mubr.msk.bf16.gmra.mrb[28].mxu1 %vm1535_vm5, %v6155_v25 }
 0x44f   :  { %v5901_v12 = vpop.permute.xlu0 %5900  ;;  %v6081_v14 = vsel %vm21_vm0, %v10211_v32, %v5903_v62  ;;  %v5608_v62 = vld [vmem:[#allocation2 + $0x330] sm:$0xff] }
 0x450   :  { %v6078_v60 = vsel %vm21_vm0, %v10208_v7, %v5901_v12 }
 0x452   :  { %v5999_v9 = vpop.permute.xlu1 %5998 }
 0x453   :  { %v5997_v42 = vpop.permute.xlu0 %5996  ;;  %v6159_v22 = vsel %vm814_vm4, %v6081_v14, %v5999_v9 }
 0x454   :  { %v6157_v38 = vsel %vm814_vm4, %v6078_v60, %v5997_v42 }
 0x455   :  { %7686 = vmatprep.mubr.msk.bf16.mxu1 %vm1535_vm5, %v6157_v38  ;;  %v10480_v38 = vld [vmem:[%s10870_s4] ss:$0 sm:$0xff] }
 0x456   :  { %v5907_v24 = vpop.permute.xlu1 %5906  ;;  %7687 = vmatmul.mubr.msk.bf16.gmra.mrb[32].mxu1 %vm1535_vm5, %v6159_v22 }
 0x457   :  { %v5905_v23 = vpop.permute.xlu0 %5904  ;;  %v6087_v7 = vsel %vm21_vm0, %v10231_v5, %v5907_v24 }
 0x458   :  { %v6084_v10 = vsel %vm21_vm0, %v10227_v43, %v5905_v23 }
 0x45a   :  { %v6003_v35 = vpop.permute.xlu1 %6002 }
 0x45b   :  { %v6001_v15 = vpop.permute.xlu0 %6000  ;;  %v6163_v28 = vsel %vm814_vm4, %v6087_v7, %v6003_v35 }
 0x45c   :  { %v6161_v32 = vsel %vm814_vm4, %v6084_v10, %v6001_v15  ;;  %v11027_v15 = vld [vmem:[#allocation5_spill] sm:$0xff] }
 0x45d   :  { %7690 = vmatprep.mubr.msk.bf16.mxu1 %vm1535_vm5, %v6161_v32 }
 0x45e   :  { %v5911_v63 = vpop.permute.xlu1 %5910  ;;  %7691 = vmatmul.mubr.msk.bf16.gmra.mrb[36].mxu1 %vm1535_vm5, %v6163_v28 }
 0x45f   :  { %v5909_v39 = vpop.permute.xlu0 %5908  ;;  %v6093_v43 = vsel %vm21_vm0, %v10251_v6, %v5911_v63  ;;  %v11028_v63 = vld [vmem:[#allocation3_spill] sm:$0xff] }
 0x460   :  { %v6090_v26 = vsel %vm21_vm0, %v10247_v18, %v5909_v39 }
 0x462   :  { %v6007_v48 = vpop.permute.xlu1 %6006 }
 0x463   :  { %v6005_v55 = vpop.permute.xlu0 %6004  ;;  %v6167_v59 = vsel %vm814_vm4, %v6093_v43, %v6007_v48 }
 0x464   :  { %v6165_v5 = vsel %vm814_vm4, %v6090_v26, %v6005_v55  ;;  %v11029_v55 = vld [vmem:[#allocation6_spill] sm:$0xff] }
 0x465   :  { %7694 = vmatprep.mubr.msk.bf16.mxu1 %vm1535_vm5, %v6165_v5 }
 0x466   :  { %v5915_v11 = vpop.permute.xlu1 %5914  ;;  %7695 = vmatmul.mubr.msk.bf16.gmra.mrb[40].mxu1 %vm1535_vm5, %v6167_v59  ;;  %v11030_v59 = vld [vmem:[#allocation4_spill] sm:$0xff] }
 0x467   :  { %v5913_v46 = vpop.permute.xlu0 %5912  ;;  %v6099_v18 = vsel %vm21_vm0, %v10271_v31, %v5915_v11 }
 0x468   :  { %v6096_v0 = vsel %vm21_vm0, %v10267_v34, %v5913_v46 }
 0x46a   :  { %v6011_v21 = vpop.permute.xlu1 %6010 }
 0x46b   :  { %v6009_v57 = vpop.permute.xlu0 %6008  ;;  %v6171_v8 = vsel %vm814_vm4, %v6099_v18, %v6011_v21 }
 0x46c   :  { %v6169_v6 = vsel %vm814_vm4, %v6096_v0, %v6009_v57 }
 0x46d   :  { %7698 = vmatprep.mubr.msk.bf16.mxu1 %vm1535_vm5, %v6169_v6 }
 0x46e   :  { %v5919_v47 = vpop.permute.xlu1 %5918  ;;  %7699 = vmatmul.mubr.msk.bf16.gmra.mrb[44].mxu1 %vm1535_vm5, %v6171_v8 }
 0x46f   :  { %v5917_v30 = vpop.permute.xlu0 %5916  ;;  %v6105_v34 = vsel %vm21_vm0, %v10291_v17, %v5919_v47  ;;  %v11031_v47 = vld [vmem:[#allocation7_spill] sm:$0xff] }
 0x470   :  { %v6102_v45 = vsel %vm21_vm0, %v10287_v49, %v5917_v30 }
 0x472   :  { %v6015_v27 = vpop.permute.xlu1 %6014 }
 0x473   :  { %v6013_v37 = vpop.permute.xlu0 %6012  ;;  %v6175_v33 = vsel %vm814_vm4, %v6105_v34, %v6015_v27 }
 0x474   :  { %v6173_v31 = vsel %vm814_vm4, %v6102_v45, %v6013_v37  ;;  %v11032_v37 = vld [vmem:[#allocation9_spill] sm:$0xff] }
 0x475   :  { %7702 = vmatprep.mubr.msk.bf16.mxu1 %vm1535_vm5, %v6173_v31 }
 0x476   :  { %v5923_v4 = vpop.permute.xlu1 %5922  ;;  %7703 = vmatmul.mubr.msk.bf16.gmra.mrb[48].mxu1 %vm1535_vm5, %v6175_v33 }
 0x477   :  { %v5921_v1 = vpop.permute.xlu0 %5920  ;;  %v6111_v49 = vsel %vm21_vm0, %v10311_v20, %v5923_v4  ;;  %v11033_v4 = vld [vmem:[#allocation8_spill] sm:$0xff] }
 0x478   :  { %v6108_v41 = vsel %vm21_vm0, %v10307_v29, %v5921_v1  ;;  %v5610_v29 = vld [vmem:[#allocation2 + $0x348] sm:$0xff] }
 0x479   :  { %v5643_v36 = vpack.c.bf16 %v5611_v53, %v5610_v29 }
 0x47a   :  { %v6019_v61 = vpop.permute.xlu1 %6018 }
 0x47b   :  { %v6017_v51 = vpop.permute.xlu0 %6016  ;;  %v6179_v44 = vsel %vm814_vm4, %v6111_v49, %v6019_v61 }
 0x47c   :  { %v6177_v17 = vsel %vm814_vm4, %v6108_v41, %v6017_v51  ;;  %v11034_v41 = vld [vmem:[#allocation10_spill] sm:$0xff] }
 0x47d   :  { %7706 = vmatprep.mubr.msk.bf16.mxu1 %vm1535_vm5, %v6177_v17 }
 0x47e   :  { %v5927_v3 = vpop.permute.xlu1 %5926  ;;  %7707 = vmatmul.mubr.msk.bf16.gmra.mrb[52].mxu1 %vm1535_vm5, %v6179_v44 }
 0x47f   :  { %v5925_v56 = vpop.permute.xlu0 %5924  ;;  %v6117_v20 = vsel %vm21_vm0, %v10331_v19, %v5927_v3 }
 0x480   :  { %v6114_v58 = vsel %vm21_vm0, %v10327_v54, %v5925_v56  ;;  %v5642_v54 = vpack.c.bf16 %v5609_v52, %v5608_v62  ;;  %v11037_v52 = vld [vmem:[#allocation12_spill] sm:$0xff] }
 0x482   :  { %v6023_v40 = vpop.permute.xlu1 %6022 }
 0x483   :  { %v6021_v50 = vpop.permute.xlu0 %6020  ;;  %v6183_v16 = vsel %vm814_vm4, %v6117_v20, %v6023_v40 }
 0x484   :  { %v6181_v13 = vsel %vm814_vm4, %v6114_v58, %v6021_v50  ;;  %v11035_v50 = vld [vmem:[#allocation11_spill] sm:$0xff] }
 0x485   :  { %7710 = vmatprep.mubr.msk.bf16.mxu1 %vm1535_vm5, %v6181_v13  ;;  %v11036_v13 = vld [vmem:[#allocation13_spill] sm:$0xff] }
 0x486   :  { %v5931_v2 = vpop.permute.xlu1 %5930  ;;  %7711 = vmatmul.mubr.msk.bf16.gmra.mrb[56].mxu1 %vm1535_vm5, %v6183_v16 }
 0x487   :  { %v5929_v25 = vpop.permute.xlu0 %5928  ;;  %v6123_v12 = vsel %vm21_vm0, %v5643_v36, %v5931_v2 }
 0x488   :  { %v6120_v60 = vsel %vm21_vm0, %v5642_v54, %v5929_v25  ;;  %v11038_v54 = vld [vmem:[#allocation14_spill] sm:$0xff] }
 0x48a   :  { %v6027_v9 = vpop.permute.xlu1 %6026 }
 0x48b   :  { %v6025_v19 = vpop.permute.xlu0 %6024  ;;  %v6187_v14 = vsel %vm814_vm4, %v6123_v12, %v6027_v9 }
 0x48c   :  { %v6185_v42 = vsel %vm814_vm4, %v6120_v60, %v6025_v19 }
 0x48d   :  { %7714 = vmatprep.mubr.msk.bf16.mxu1 %vm1535_vm5, %v6185_v42 }
 0x48e   :  { %7715 = vmatmul.mubr.msk.bf16.gmra.mrb[60].mxu1 %vm1535_vm5, %v6187_v14 }
 0x4e9   :  { %v7656_v22 = vpop.f32.mrb[0].mxu1 }
 0x4ea   :  { %v6630_v24 = vadd.f32 %v7656_v22, %v10480_v38  ;;  %v6302_v23 = vpop.f32.mrb[1].mxu1 }
 0x4eb   :  { %v6628_v35 = vadd.f32 %v10480_v38, %v6302_v23  ;;  %v7657_v10 = vpop.f32.mrb[2].mxu1  ;;  %v11039_v23 = vld [vmem:[#allocation15_spill] sm:$0xff] }
 0x4ec   :  { %v6694_v7 = vadd.f32 %v6630_v24, %v11027_v15  ;;  %v6631_v32 = vadd.f32 %v7657_v10, %v10480_v38  ;;  %v6305_v28 = vpop.f32.mrb[3].mxu1 }
 0x4ed   :  { %v6692_v39 = vadd.f32 %v6628_v35, %v11028_v63  ;;  %v6629_v48 = vadd.f32 %v10480_v38, %v6305_v28 }
 0x4ee   :  { %v6758_v26 = vmax.f32 %v6694_v7, 0.0  ;;  %v6695_v43 = vadd.f32 %v6631_v32, %v11029_v55  ;;  %v11040_v7 = vld [vmem:[#allocation17_spill] sm:$0xff]  ;;  %v11042_v55 = vld [vmem:[#allocation18_spill] sm:$0xff] }
 0x4ef   :  { %v6756_v5 = vmax.f32 %v6692_v39, 0.0  ;;  %v6693_v11 = vadd.f32 %v6629_v48, %v11030_v59  ;;  %v11041_v39 = vld [vmem:[#allocation16_spill] sm:$0xff] }
 0x4f0   :  { %6822 = vst.msk [vmem:[%s10871_s5 + $0x10] sm:$0xff] %vm21_vm0, %v6758_v26  ;;  %v6759_v46 = vmax.f32 %v6695_v43, 0.0 }
 0x4f1   :  { %6820 = vst.msk [vmem:[%s10871_s5] sm:$0xff] %vm21_vm0, %v6756_v5  ;;  %v6757_v21 = vmax.f32 %v6693_v11, 0.0  ;;  %v7660_v0 = vpop.f32.mrb[4].mxu1 }
 0x4f2   :  { %6823 = vst.msk [vmem:[%s10871_s5 + $0x18] sm:$0xff] %vm21_vm0, %v6759_v46  ;;  %v6634_v57 = vadd.f32 %v7660_v0, %v10480_v38  ;;  %v6318_v18 = vpop.f32.mrb[5].mxu1 }
 0x4f3   :  { %6821 = vst.msk [vmem:[%s10871_s5 + $0x8] sm:$0xff] %vm21_vm0, %v6757_v21  ;;  %v6632_v6 = vadd.f32 %v10480_v38, %v6318_v18  ;;  %v7661_v8 = vpop.f32.mrb[6].mxu1  ;;  %v11043_v18 = vld [vmem:[#allocation19_spill] sm:$0xff] }
 0x4f4   :  { %v6698_v30 = vadd.f32 %v6634_v57, %v11031_v47  ;;  %v6635_v27 = vadd.f32 %v7661_v8, %v10480_v38  ;;  %v6321_v45 = vpop.f32.mrb[7].mxu1 }
 0x4f5   :  { %v6696_v34 = vadd.f32 %v6632_v6, %v11032_v37  ;;  %v6633_v31 = vadd.f32 %v10480_v38, %v6321_v45 }
 0x4f6   :  { %v6762_v33 = vmax.f32 %v6698_v30, 0.0  ;;  %v6699_v1 = vadd.f32 %v6635_v27, %v11033_v4  ;;  %v11044_v30 = vld [vmem:[#allocation21_spill] sm:$0xff]  ;;  %v11046_v4 = vld [vmem:[#allocation22_spill] sm:$0xff] }
 0x4f7   :  { %v6760_v61 = vmax.f32 %v6696_v34, 0.0  ;;  %v6697_v51 = vadd.f32 %v6633_v31, %v11034_v41  ;;  %v11045_v34 = vld [vmem:[#allocation20_spill] sm:$0xff] }
 0x4f8   :  { %6826 = vst.msk [vmem:[%s10871_s5 + $0x30] sm:$0xff] %vm21_vm0, %v6762_v33  ;;  %v6763_v49 = vmax.f32 %v6699_v1, 0.0 }
 0x4f9   :  { %6824 = vst.msk [vmem:[%s10871_s5 + $0x20] sm:$0xff] %vm21_vm0, %v6760_v61  ;;  %v6761_v17 = vmax.f32 %v6697_v51, 0.0  ;;  %v7664_v44 = vpop.f32.mrb[8].mxu1 }
 0x4fa   :  { %6827 = vst.msk [vmem:[%s10871_s5 + $0x38] sm:$0xff] %vm21_vm0, %v6763_v49  ;;  %v6638_v3 = vadd.f32 %v7664_v44, %v10480_v38  ;;  %v6334_v56 = vpop.f32.mrb[9].mxu1 }
 0x4fb   :  { %6825 = vst.msk [vmem:[%s10871_s5 + $0x28] sm:$0xff] %vm21_vm0, %v6761_v17  ;;  %v6636_v40 = vadd.f32 %v10480_v38, %v6334_v56  ;;  %v7665_v58 = vpop.f32.mrb[10].mxu1  ;;  %v11047_v56 = vld [vmem:[#allocation23_spill] sm:$0xff] }
 0x4fc   :  { %v6702_v29 = vadd.f32 %v6638_v3, %v11035_v50  ;;  %v6639_v53 = vadd.f32 %v7665_v58, %v10480_v38  ;;  %v6337_v20 = vpop.f32.mrb[11].mxu1 }
 0x4fd   :  { %v6700_v16 = vadd.f32 %v6636_v40, %v11036_v13  ;;  %v6637_v36 = vadd.f32 %v10480_v38, %v6337_v20 }
 0x4fe   :  { %v6766_v2 = vmax.f32 %v6702_v29, 0.0  ;;  %v6703_v25 = vadd.f32 %v6639_v53, %v11037_v52  ;;  %v11048_v29 = vld [vmem:[#allocation25_spill] sm:$0xff]  ;;  %v11050_v52 = vld [vmem:[#allocation26_spill] sm:$0xff] }
 0x4ff   :  { %v6764_v62 = vmax.f32 %v6700_v16, 0.0  ;;  %v6701_v12 = vadd.f32 %v6637_v36, %v11038_v54  ;;  %v11049_v16 = vld [vmem:[#allocation24_spill] sm:$0xff] }
 0x500   :  { %6830 = vst.msk [vmem:[%s10871_s5 + $0x50] sm:$0xff] %vm21_vm0, %v6766_v2  ;;  %v6767_v9 = vmax.f32 %v6703_v25, 0.0 }
 0x501   :  { %6828 = vst.msk [vmem:[%s10871_s5 + $0x40] sm:$0xff] %vm21_vm0, %v6764_v62  ;;  %v6765_v60 = vmax.f32 %v6701_v12, 0.0  ;;  %v7668_v19 = vpop.f32.mrb[12].mxu1 }
 0x502   :  { %6831 = vst.msk [vmem:[%s10871_s5 + $0x58] sm:$0xff] %vm21_vm0, %v6767_v9  ;;  %v6642_v42 = vadd.f32 %v7668_v19, %v10480_v38  ;;  %v6350_v14 = vpop.f32.mrb[13].mxu1 }
 0x503   :  { %6829 = vst.msk [vmem:[%s10871_s5 + $0x48] sm:$0xff] %vm21_vm0, %v6765_v60  ;;  %v6640_v22 = vadd.f32 %v10480_v38, %v6350_v14  ;;  %v7669_v24 = vpop.f32.mrb[14].mxu1  ;;  %v11051_v14 = vld [vmem:[#allocation27_spill] sm:$0xff] }
 0x504   :  { %v6706_v35 = vadd.f32 %v6642_v42, %v11039_v23  ;;  %v6643_v10 = vadd.f32 %v7669_v24, %v10480_v38  ;;  %v6353_v15 = vpop.f32.mrb[15].mxu1 }
 0x505   :  { %v6704_v32 = vadd.f32 %v6640_v22, %v11040_v7  ;;  %v6641_v28 = vadd.f32 %v10480_v38, %v6353_v15 }
 0x506   :  { %v6770_v63 = vmax.f32 %v6706_v35, 0.0  ;;  %v6707_v48 = vadd.f32 %v6643_v10, %v11041_v39  ;;  %v11052_v35 = vld [vmem:[#allocation29_spill] sm:$0xff]  ;;  %v11054_v39 = vld [vmem:[#allocation30_spill] sm:$0xff] }
 0x507   :  { %v6768_v26 = vmax.f32 %v6704_v32, 0.0  ;;  %v6705_v43 = vadd.f32 %v6641_v28, %v11042_v55  ;;  %v11053_v32 = vld [vmem:[#allocation28_spill] sm:$0xff] }
 0x508   :  { %6834 = vst.msk [vmem:[%s10871_s5 + $0x70] sm:$0xff] %vm21_vm0, %v6770_v63  ;;  %v6771_v5 = vmax.f32 %v6707_v48, 0.0 }
 0x509   :  { %6832 = vst.msk [vmem:[%s10871_s5 + $0x60] sm:$0xff] %vm21_vm0, %v6768_v26  ;;  %v6769_v59 = vmax.f32 %v6705_v43, 0.0  ;;  %v7672_v11 = vpop.f32.mrb[16].mxu1 }
 0x50a   :  { %6835 = vst.msk [vmem:[%s10871_s5 + $0x78] sm:$0xff] %vm21_vm0, %v6771_v5  ;;  %v6646_v46 = vadd.f32 %v7672_v11, %v10480_v38  ;;  %v6366_v21 = vpop.f32.mrb[17].mxu1 }
 0x50b   :  { %6833 = vst.msk [vmem:[%s10871_s5 + $0x68] sm:$0xff] %vm21_vm0, %v6769_v59  ;;  %v6644_v0 = vadd.f32 %v10480_v38, %v6366_v21  ;;  %v7673_v57 = vpop.f32.mrb[18].mxu1  ;;  %v11055_v21 = vld [vmem:[#allocation31_spill] sm:$0xff] }
 0x50c   :  { %v6710_v6 = vadd.f32 %v6646_v46, %v11043_v18  ;;  %v6647_v8 = vadd.f32 %v7673_v57, %v10480_v38  ;;  %v6369_v47 = vpop.f32.mrb[19].mxu1 }
 0x50d   :  { %v6708_v27 = vadd.f32 %v6644_v0, %v11044_v30  ;;  %v6645_v45 = vadd.f32 %v10480_v38, %v6369_v47 }
 0x50e   :  { %v6774_v37 = vmax.f32 %v6710_v6, 0.0  ;;  %v6711_v31 = vadd.f32 %v6647_v8, %v11045_v34  ;;  %v11056_v6 = vld [vmem:[#allocation33_spill] sm:$0xff]  ;;  %v11058_v34 = vld [vmem:[#allocation34_spill] sm:$0xff] }
 0x50f   :  { %v6772_v33 = vmax.f32 %v6708_v27, 0.0  ;;  %v6709_v1 = vadd.f32 %v6645_v45, %v11046_v4  ;;  %v11057_v27 = vld [vmem:[#allocation32_spill] sm:$0xff] }
 0x510   :  { %6838 = vst.msk [vmem:[%s10871_s5 + $0x90] sm:$0xff] %vm21_vm0, %v6774_v37  ;;  %v6775_v61 = vmax.f32 %v6711_v31, 0.0 }
 0x511   :  { %6836 = vst.msk [vmem:[%s10871_s5 + $0x80] sm:$0xff] %vm21_vm0, %v6772_v33  ;;  %v6773_v41 = vmax.f32 %v6709_v1, 0.0  ;;  %v7676_v51 = vpop.f32.mrb[20].mxu1 }
 0x512   :  { %6839 = vst.msk [vmem:[%s10871_s5 + $0x98] sm:$0xff] %vm21_vm0, %v6775_v61  ;;  %v6650_v49 = vadd.f32 %v7676_v51, %v10480_v38  ;;  %v6382_v17 = vpop.f32.mrb[21].mxu1 }
 0x513   :  { %6837 = vst.msk [vmem:[%s10871_s5 + $0x88] sm:$0xff] %vm21_vm0, %v6773_v41  ;;  %v6648_v44 = vadd.f32 %v10480_v38, %v6382_v17  ;;  %v7677_v3 = vpop.f32.mrb[22].mxu1  ;;  %v11059_v17 = vld [vmem:[#allocation35_spill] sm:$0xff] }
 0x514   :  { %v6714_v40 = vadd.f32 %v6650_v49, %v11047_v56  ;;  %v6651_v58 = vadd.f32 %v7677_v3, %v10480_v38  ;;  %v6385_v50 = vpop.f32.mrb[23].mxu1 }
 0x515   :  { %v6712_v53 = vadd.f32 %v6648_v44, %v11048_v29  ;;  %v6649_v20 = vadd.f32 %v10480_v38, %v6385_v50 }
 0x516   :  { %v6778_v13 = vmax.f32 %v6714_v40, 0.0  ;;  %v6715_v36 = vadd.f32 %v6651_v58, %v11049_v16  ;;  %v11060_v40 = vld [vmem:[#allocation37_spill] sm:$0xff]  ;;  %v11062_v16 = vld [vmem:[#allocation38_spill] sm:$0xff] }
 0x517   :  { %v6776_v2 = vmax.f32 %v6712_v53, 0.0  ;;  %v6713_v25 = vadd.f32 %v6649_v20, %v11050_v52  ;;  %v11061_v53 = vld [vmem:[#allocation36_spill] sm:$0xff] }
 0x518   :  { %6842 = vst.msk [vmem:[%s10871_s5 + $0xb0] sm:$0xff] %vm21_vm0, %v6778_v13  ;;  %v6779_v62 = vmax.f32 %v6715_v36, 0.0 }
 0x519   :  { %6840 = vst.msk [vmem:[%s10871_s5 + $0xa0] sm:$0xff] %vm21_vm0, %v6776_v2  ;;  %v6777_v54 = vmax.f32 %v6713_v25, 0.0  ;;  %v7680_v12 = vpop.f32.mrb[24].mxu1 }
 0x51a   :  { %6843 = vst.msk [vmem:[%s10871_s5 + $0xb8] sm:$0xff] %vm21_vm0, %v6779_v62  ;;  %v6654_v9 = vadd.f32 %v7680_v12, %v10480_v38  ;;  %v6398_v60 = vpop.f32.mrb[25].mxu1 }
 0x51b   :  { %6841 = vst.msk [vmem:[%s10871_s5 + $0xa8] sm:$0xff] %vm21_vm0, %v6777_v54  ;;  %v6652_v19 = vadd.f32 %v10480_v38, %v6398_v60  ;;  %v7681_v42 = vpop.f32.mrb[26].mxu1  ;;  %v11063_v60 = vld [vmem:[#allocation39_spill] sm:$0xff] }
 0x51c   :  { %v6718_v22 = vadd.f32 %v6654_v9, %v11051_v14  ;;  %v6655_v24 = vadd.f32 %v7681_v42, %v10480_v38  ;;  %v6401_v23 = vpop.f32.mrb[27].mxu1 }
 0x51d   :  { %v6716_v10 = vadd.f32 %v6652_v19, %v11052_v35  ;;  %v6653_v15 = vadd.f32 %v10480_v38, %v6401_v23 }
 0x51e   :  { %v6782_v7 = vmax.f32 %v6718_v22, 0.0  ;;  %v6719_v28 = vadd.f32 %v6655_v24, %v11053_v32  ;;  %v11064_v22 = vld [vmem:[#allocation41_spill] sm:$0xff]  ;;  %v11066_v32 = vld [vmem:[#allocation42_spill] sm:$0xff] }
 0x51f   :  { %v6780_v63 = vmax.f32 %v6716_v10, 0.0  ;;  %v6717_v48 = vadd.f32 %v6653_v15, %v11054_v39  ;;  %v11065_v10 = vld [vmem:[#allocation40_spill] sm:$0xff] }
 0x520   :  { %6846 = vst.msk [vmem:[%s10871_s5 + $0xd0] sm:$0xff] %vm21_vm0, %v6782_v7  ;;  %v6783_v26 = vmax.f32 %v6719_v28, 0.0 }
 0x521   :  { %6844 = vst.msk [vmem:[%s10871_s5 + $0xc0] sm:$0xff] %vm21_vm0, %v6780_v63  ;;  %v6781_v55 = vmax.f32 %v6717_v48, 0.0  ;;  %v7684_v43 = vpop.f32.mrb[28].mxu1 }
 0x522   :  { %6847 = vst.msk [vmem:[%s10871_s5 + $0xd8] sm:$0xff] %vm21_vm0, %v6783_v26  ;;  %v6658_v5 = vadd.f32 %v7684_v43, %v10480_v38  ;;  %v6414_v59 = vpop.f32.mrb[29].mxu1 }
 0x523   :  { %6845 = vst.msk [vmem:[%s10871_s5 + $0xc8] sm:$0xff] %vm21_vm0, %v6781_v55  ;;  %v6656_v11 = vadd.f32 %v10480_v38, %v6414_v59  ;;  %v7685_v46 = vpop.f32.mrb[30].mxu1  ;;  %v11067_v59 = vld [vmem:[#allocation43_spill] sm:$0xff] }
 0x524   :  { %v6722_v0 = vadd.f32 %v6658_v5, %v11055_v21  ;;  %v6659_v57 = vadd.f32 %v7685_v46, %v10480_v38  ;;  %v6417_v18 = vpop.f32.mrb[31].mxu1 }
 0x525   :  { %v6720_v8 = vadd.f32 %v6656_v11, %v11056_v6  ;;  %v6657_v47 = vadd.f32 %v10480_v38, %v6417_v18 }
 0x526   :  { %v6786_v30 = vmax.f32 %v6722_v0, 0.0  ;;  %v6723_v45 = vadd.f32 %v6659_v57, %v11057_v27  ;;  %v11068_v0 = vld [vmem:[#allocation45_spill] sm:$0xff]  ;;  %v11070_v27 = vld [vmem:[#allocation46_spill] sm:$0xff] }
 0x527   :  { %v6784_v37 = vmax.f32 %v6720_v8, 0.0  ;;  %v6721_v31 = vadd.f32 %v6657_v47, %v11058_v34  ;;  %v11069_v8 = vld [vmem:[#allocation44_spill] sm:$0xff] }
 0x528   :  { %6850 = vst.msk [vmem:[%s10871_s5 + $0xf0] sm:$0xff] %vm21_vm0, %v6786_v30  ;;  %v6787_v33 = vmax.f32 %v6723_v45, 0.0 }
 0x529   :  { %6848 = vst.msk [vmem:[%s10871_s5 + $0xe0] sm:$0xff] %vm21_vm0, %v6784_v37  ;;  %v6785_v4 = vmax.f32 %v6721_v31, 0.0  ;;  %v7688_v1 = vpop.f32.mrb[32].mxu1 }
 0x52a   :  { %6851 = vst.msk [vmem:[%s10871_s5 + $0xf8] sm:$0xff] %vm21_vm0, %v6787_v33  ;;  %v6662_v61 = vadd.f32 %v7688_v1, %v10480_v38  ;;  %v6430_v41 = vpop.f32.mrb[33].mxu1 }
 0x52b   :  { %6849 = vst.msk [vmem:[%s10871_s5 + $0xe8] sm:$0xff] %vm21_vm0, %v6785_v4  ;;  %v6660_v51 = vadd.f32 %v10480_v38, %v6430_v41  ;;  %v7689_v49 = vpop.f32.mrb[34].mxu1  ;;  %v11071_v41 = vld [vmem:[#allocation47_spill] sm:$0xff] }
 0x52c   :  { %v6726_v44 = vadd.f32 %v6662_v61, %v11059_v17  ;;  %v6663_v3 = vadd.f32 %v7689_v49, %v10480_v38  ;;  %v6433_v56 = vpop.f32.mrb[35].mxu1 }
 0x52d   :  { %v6724_v58 = vadd.f32 %v6660_v51, %v11060_v40  ;;  %v6661_v50 = vadd.f32 %v10480_v38, %v6433_v56 }
 0x52e   :  { %v6790_v29 = vmax.f32 %v6726_v44, 0.0  ;;  %v6727_v20 = vadd.f32 %v6663_v3, %v11061_v53  ;;  %v11072_v44 = vld [vmem:[#allocation49_spill] sm:$0xff]  ;;  %v11074_v53 = vld [vmem:[#allocation50_spill] sm:$0xff] }
 0x52f   :  { %v6788_v13 = vmax.f32 %v6724_v58, 0.0  ;;  %v6725_v36 = vadd.f32 %v6661_v50, %v11062_v16  ;;  %v11073_v58 = vld [vmem:[#allocation48_spill] sm:$0xff] }
 0x530   :  { %6854 = vst.msk [vmem:[%s10871_s5 + $0x110] sm:$0xff] %vm21_vm0, %v6790_v29  ;;  %v6791_v2 = vmax.f32 %v6727_v20, 0.0 }
 0x531   :  { %6852 = vst.msk [vmem:[%s10871_s5 + $0x100] sm:$0xff] %vm21_vm0, %v6788_v13  ;;  %v6789_v52 = vmax.f32 %v6725_v36, 0.0  ;;  %v7692_v25 = vpop.f32.mrb[36].mxu1 }
 0x532   :  { %6855 = vst.msk [vmem:[%s10871_s5 + $0x118] sm:$0xff] %vm21_vm0, %v6791_v2  ;;  %v6666_v62 = vadd.f32 %v7692_v25, %v10480_v38  ;;  %v6446_v54 = vpop.f32.mrb[37].mxu1 }
 0x533   :  { %6853 = vst.msk [vmem:[%s10871_s5 + $0x108] sm:$0xff] %vm21_vm0, %v6789_v52  ;;  %v6664_v12 = vadd.f32 %v10480_v38, %v6446_v54  ;;  %v7693_v9 = vpop.f32.mrb[38].mxu1  ;;  %v11075_v54 = vld [vmem:[#allocation51_spill] sm:$0xff] }
 0x534   :  { %v6730_v19 = vadd.f32 %v6666_v62, %v11063_v60  ;;  %v6667_v42 = vadd.f32 %v7693_v9, %v10480_v38  ;;  %v6449_v14 = vpop.f32.mrb[39].mxu1 }
 0x535   :  { %v6728_v24 = vadd.f32 %v6664_v12, %v11064_v22  ;;  %v6665_v23 = vadd.f32 %v10480_v38, %v6449_v14 }
 0x536   :  { %v6794_v35 = vmax.f32 %v6730_v19, 0.0  ;;  %v6731_v15 = vadd.f32 %v6667_v42, %v11065_v10  ;;  %v11076_v19 = vld [vmem:[#allocation53_spill] sm:$0xff]  ;;  %v11078_v10 = vld [vmem:[#allocation54_spill] sm:$0xff] }
 0x537   :  { %v6792_v7 = vmax.f32 %v6728_v24, 0.0  ;;  %v6729_v28 = vadd.f32 %v6665_v23, %v11066_v32  ;;  %v11077_v24 = vld [vmem:[#allocation52_spill] sm:$0xff] }
 0x538   :  { %6858 = vst.msk [vmem:[%s10871_s5 + $0x130] sm:$0xff] %vm21_vm0, %v6794_v35  ;;  %v6795_v63 = vmax.f32 %v6731_v15, 0.0 }
 0x539   :  { %6856 = vst.msk [vmem:[%s10871_s5 + $0x120] sm:$0xff] %vm21_vm0, %v6792_v7  ;;  %v6793_v39 = vmax.f32 %v6729_v28, 0.0  ;;  %v7696_v48 = vpop.f32.mrb[40].mxu1 }
 0x53a   :  { %6859 = vst.msk [vmem:[%s10871_s5 + $0x138] sm:$0xff] %vm21_vm0, %v6795_v63  ;;  %v6670_v26 = vadd.f32 %v7696_v48, %v10480_v38  ;;  %v6462_v55 = vpop.f32.mrb[41].mxu1 }
 0x53b   :  { %6857 = vst.msk [vmem:[%s10871_s5 + $0x128] sm:$0xff] %vm21_vm0, %v6793_v39  ;;  %v6668_v43 = vadd.f32 %v10480_v38, %v6462_v55  ;;  %v7697_v5 = vpop.f32.mrb[42].mxu1  ;;  %v11079_v55 = vld [vmem:[#allocation55_spill] sm:$0xff] }
 0x53c   :  { %v6734_v11 = vadd.f32 %v6670_v26, %v11067_v59  ;;  %v6671_v46 = vadd.f32 %v7697_v5, %v10480_v38  ;;  %v6465_v21 = vpop.f32.mrb[43].mxu1 }
 0x53d   :  { %v6732_v57 = vadd.f32 %v6668_v43, %v11068_v0  ;;  %v6669_v18 = vadd.f32 %v10480_v38, %v6465_v21 }
 0x53e   :  { %v6798_v6 = vmax.f32 %v6734_v11, 0.0  ;;  %v6735_v47 = vadd.f32 %v6671_v46, %v11069_v8  ;;  %v11080_v11 = vld [vmem:[#allocation57_spill] sm:$0xff]  ;;  %v11082_v8 = vld [vmem:[#allocation58_spill] sm:$0xff] }
 0x53f   :  { %v6796_v30 = vmax.f32 %v6732_v57, 0.0  ;;  %v6733_v45 = vadd.f32 %v6669_v18, %v11070_v27  ;;  %v11081_v57 = vld [vmem:[#allocation56_spill] sm:$0xff] }
 0x540   :  { %6862 = vst.msk [vmem:[%s10871_s5 + $0x150] sm:$0xff] %vm21_vm0, %v6798_v6  ;;  %v6799_v37 = vmax.f32 %v6735_v47, 0.0 }
 0x541   :  { %6860 = vst.msk [vmem:[%s10871_s5 + $0x140] sm:$0xff] %vm21_vm0, %v6796_v30  ;;  %v6797_v34 = vmax.f32 %v6733_v45, 0.0  ;;  %v7700_v31 = vpop.f32.mrb[44].mxu1 }
 0x542   :  { %6863 = vst.msk [vmem:[%s10871_s5 + $0x158] sm:$0xff] %vm21_vm0, %v6799_v37  ;;  %v6674_v33 = vadd.f32 %v7700_v31, %v10480_v38  ;;  %v6478_v4 = vpop.f32.mrb[45].mxu1 }
 0x543   :  { %6861 = vst.msk [vmem:[%s10871_s5 + $0x148] sm:$0xff] %vm21_vm0, %v6797_v34  ;;  %v6672_v1 = vadd.f32 %v10480_v38, %v6478_v4  ;;  %v7701_v61 = vpop.f32.mrb[46].mxu1  ;;  %v11083_v4 = vld [vmem:[#allocation59_spill] sm:$0xff] }
 0x544   :  { %v6738_v51 = vadd.f32 %v6674_v33, %v11071_v41  ;;  %v6675_v49 = vadd.f32 %v7701_v61, %v10480_v38  ;;  %v6481_v17 = vpop.f32.mrb[47].mxu1 }
 0x545   :  { %v6736_v3 = vadd.f32 %v6672_v1, %v11072_v44  ;;  %v6673_v56 = vadd.f32 %v10480_v38, %v6481_v17 }
 0x546   :  { %v6802_v40 = vmax.f32 %v6738_v51, 0.0  ;;  %v6739_v50 = vadd.f32 %v6675_v49, %v11073_v58  ;;  %v11084_v51 = vld [vmem:[#allocation61_spill] sm:$0xff]  ;;  %v11086_v58 = vld [vmem:[#allocation62_spill] sm:$0xff] }
 0x547   :  { %v6800_v29 = vmax.f32 %v6736_v3, 0.0  ;;  %v6737_v20 = vadd.f32 %v6673_v56, %v11074_v53  ;;  %v11085_v3 = vld [vmem:[#allocation60_spill] sm:$0xff] }
 0x548   :  { %6866 = vst.msk [vmem:[%s10871_s5 + $0x170] sm:$0xff] %vm21_vm0, %v6802_v40  ;;  %v6803_v13 = vmax.f32 %v6739_v50, 0.0 }
 0x549   :  { %6864 = vst.msk [vmem:[%s10871_s5 + $0x160] sm:$0xff] %vm21_vm0, %v6800_v29  ;;  %v6801_v16 = vmax.f32 %v6737_v20, 0.0  ;;  %v7704_v36 = vpop.f32.mrb[48].mxu1 }
 0x54a   :  { %6867 = vst.msk [vmem:[%s10871_s5 + $0x178] sm:$0xff] %vm21_vm0, %v6803_v13  ;;  %v6678_v2 = vadd.f32 %v7704_v36, %v10480_v38  ;;  %v6494_v52 = vpop.f32.mrb[49].mxu1 }
 0x54b   :  { %6865 = vst.msk [vmem:[%s10871_s5 + $0x168] sm:$0xff] %vm21_vm0, %v6801_v16  ;;  %v6676_v25 = vadd.f32 %v10480_v38, %v6494_v52  ;;  %v7705_v62 = vpop.f32.mrb[50].mxu1  ;;  %v11087_v52 = vld [vmem:[#allocation63_spill] sm:$0xff] }
 0x54c   :  { %v6742_v12 = vadd.f32 %v6678_v2, %v11075_v54  ;;  %v6679_v9 = vadd.f32 %v7705_v62, %v10480_v38  ;;  %v6497_v60 = vpop.f32.mrb[51].mxu1 }
 0x54d   :  { %v6740_v42 = vadd.f32 %v6676_v25, %v11076_v19  ;;  %v6677_v14 = vadd.f32 %v10480_v38, %v6497_v60 }
 0x54e   :  { %v6806_v22 = vmax.f32 %v6742_v12, 0.0  ;;  %v6743_v23 = vadd.f32 %v6679_v9, %v11077_v24  ;;  %v11088_v12 = vld [vmem:[#allocation65_spill] sm:$0xff]  ;;  %v11090_v24 = vld [vmem:[#allocation66_spill] sm:$0xff] }
 0x54f   :  { %v6804_v35 = vmax.f32 %v6740_v42, 0.0  ;;  %v6741_v15 = vadd.f32 %v6677_v14, %v11078_v10  ;;  %v11089_v42 = vld [vmem:[#allocation64_spill] sm:$0xff] }
 0x550   :  { %6870 = vst.msk [vmem:[%s10871_s5 + $0x190] sm:$0xff] %vm21_vm0, %v6806_v22  ;;  %v6807_v7 = vmax.f32 %v6743_v23, 0.0 }
 0x551   :  { %6868 = vst.msk [vmem:[%s10871_s5 + $0x180] sm:$0xff] %vm21_vm0, %v6804_v35  ;;  %v6805_v32 = vmax.f32 %v6741_v15, 0.0  ;;  %v7708_v28 = vpop.f32.mrb[52].mxu1 }
 0x552   :  { %6871 = vst.msk [vmem:[%s10871_s5 + $0x198] sm:$0xff] %vm21_vm0, %v6807_v7  ;;  %v6682_v63 = vadd.f32 %v7708_v28, %v10480_v38  ;;  %v6510_v39 = vpop.f32.mrb[53].mxu1 }
 0x553   :  { %6869 = vst.msk [vmem:[%s10871_s5 + $0x188] sm:$0xff] %vm21_vm0, %v6805_v32  ;;  %v6680_v48 = vadd.f32 %v10480_v38, %v6510_v39  ;;  %v7709_v26 = vpop.f32.mrb[54].mxu1 }
 0x554   :  { %v6746_v43 = vadd.f32 %v6682_v63, %v11079_v55  ;;  %v6683_v5 = vadd.f32 %v7709_v26, %v10480_v38  ;;  %v6513_v59 = vpop.f32.mrb[55].mxu1 }
 0x555   :  { %v6744_v46 = vadd.f32 %v6680_v48, %v11080_v11  ;;  %v6681_v21 = vadd.f32 %v10480_v38, %v6513_v59 }
 0x556   :  { %v6810_v0 = vmax.f32 %v6746_v43, 0.0  ;;  %v6747_v18 = vadd.f32 %v6683_v5, %v11081_v57 }
 0x557   :  { %v6808_v6 = vmax.f32 %v6744_v46, 0.0  ;;  %v6745_v47 = vadd.f32 %v6681_v21, %v11082_v8 }
 0x558   :  { %6874 = vst.msk [vmem:[%s10871_s5 + $0x1b0] sm:$0xff] %vm21_vm0, %v6810_v0  ;;  %v6811_v30 = vmax.f32 %v6747_v18, 0.0 }
 0x559   :  { %6872 = vst.msk [vmem:[%s10871_s5 + $0x1a0] sm:$0xff] %vm21_vm0, %v6808_v6  ;;  %v6809_v27 = vmax.f32 %v6745_v47, 0.0  ;;  %v7712_v45 = vpop.f32.mrb[56].mxu1 }
 0x55a   :  { %6875 = vst.msk [vmem:[%s10871_s5 + $0x1b8] sm:$0xff] %vm21_vm0, %v6811_v30  ;;  %v6686_v37 = vadd.f32 %v7712_v45, %v10480_v38  ;;  %v6526_v34 = vpop.f32.mrb[57].mxu1 }
 0x55b   :  { %6873 = vst.msk [vmem:[%s10871_s5 + $0x1a8] sm:$0xff] %vm21_vm0, %v6809_v27  ;;  %v6684_v31 = vadd.f32 %v10480_v38, %v6526_v34  ;;  %v7713_v33 = vpop.f32.mrb[58].mxu1 }
 0x55c   :  { %v6750_v1 = vadd.f32 %v6686_v37, %v11083_v4  ;;  %v6687_v61 = vadd.f32 %v7713_v33, %v10480_v38  ;;  %v6529_v41 = vpop.f32.mrb[59].mxu1 }
 0x55d   :  { %v6748_v49 = vadd.f32 %v6684_v31, %v11084_v51  ;;  %v6685_v17 = vadd.f32 %v10480_v38, %v6529_v41 }
 0x55e   :  { %v6814_v44 = vmax.f32 %v6750_v1, 0.0  ;;  %v6751_v56 = vadd.f32 %v6687_v61, %v11085_v3 }
 0x55f   :  { %v6812_v40 = vmax.f32 %v6748_v49, 0.0  ;;  %v6749_v50 = vadd.f32 %v6685_v17, %v11086_v58 }
 0x560   :  { %6878 = vst.msk [vmem:[%s10871_s5 + $0x1d0] sm:$0xff] %vm21_vm0, %v6814_v44  ;;  %v6815_v29 = vmax.f32 %v6751_v56, 0.0 }
 0x561   :  { %6876 = vst.msk [vmem:[%s10871_s5 + $0x1c0] sm:$0xff] %vm21_vm0, %v6812_v40  ;;  %v6813_v53 = vmax.f32 %v6749_v50, 0.0  ;;  %v7716_v20 = vpop.f32.mrb[60].mxu1 }
 0x562   :  { %6879 = vst.msk [vmem:[%s10871_s5 + $0x1d8] sm:$0xff] %vm21_vm0, %v6815_v29  ;;  %v6690_v13 = vadd.f32 %v7716_v20, %v10480_v38  ;;  %v6542_v16 = vpop.f32.mrb[61].mxu1 }
 0x563   :  { %6877 = vst.msk [vmem:[%s10871_s5 + $0x1c8] sm:$0xff] %vm21_vm0, %v6813_v53  ;;  %v6688_v36 = vadd.f32 %v10480_v38, %v6542_v16  ;;  %v7717_v2 = vpop.f32.mrb[62].mxu1 }
 0x564   :  { %v6754_v25 = vadd.f32 %v6690_v13, %v11087_v52  ;;  %v6691_v62 = vadd.f32 %v7717_v2, %v10480_v38  ;;  %v6545_v54 = vpop.f32.mrb[63].mxu1 }
 0x565   :  { %v6752_v9 = vadd.f32 %v6688_v36, %v11088_v12  ;;  %v6689_v60 = vadd.f32 %v10480_v38, %v6545_v54 }
 0x566   :  { %v6818_v19 = vmax.f32 %v6754_v25, 0.0  ;;  %v6755_v14 = vadd.f32 %v6691_v62, %v11089_v42 }
 0x567   :  { %v6816_v22 = vmax.f32 %v6752_v9, 0.0  ;;  %v6753_v23 = vadd.f32 %v6689_v60, %v11090_v24 }
 0x568   :  { %6882 = vst.msk [vmem:[%s10871_s5 + $0x1f0] sm:$0xff] %vm21_vm0, %v6818_v19  ;;  %v6819_v35 = vmax.f32 %v6755_v14, 0.0 }
 0x569   :  { %6880 = vst.msk [vmem:[%s10871_s5 + $0x1e0] sm:$0xff] %vm21_vm0, %v6816_v22  ;;  %v6817_v10 = vmax.f32 %v6753_v23, 0.0 }
 0x56a   :  { %6883 = vst.msk [vmem:[%s10871_s5 + $0x1f8] sm:$0xff] %vm21_vm0, %v6819_v35 }
 0x56b   :  { %6881 = vst.msk [vmem:[%s10871_s5 + $0x1e8] sm:$0xff] %vm21_vm0, %v6817_v10 }

</bundles_post_ra>
